<compile_context>
chip_gen: v7x
topology: tpu7x:2x2x1
jax: 0.10.0
libtpu: 0.0.40
codegen_flags: <defaults>
</compile_context>

<pallas_src>
import jax
import jax.numpy as jnp
from jax.experimental import pallas as pl
from jax.experimental.pallas import tpu as pltpu

EPS = 1e-5


# ---------------------------------------------------------------------------
# Kernels (one image per grid step; leading batch dim squeezed by BlockSpec)
# ---------------------------------------------------------------------------
def _conv1_kernel(xpad_ref, w_ref, y1_ref, stats_ref):
    """3x3 conv (padding=1) on one spatially pre-padded image.

    9 accumulating bf16 MXU dots (no im2col buffer).  Emits y1 UNPADDED and
    block-aligned (bf16) plus per-sample per-channel (sum, sum-of-squares) in
    f32 for the batch-norm statistics.
    """
    Hp, Wp, Cp = xpad_ref.shape
    H, W = Hp - 2, Wp - 2
    M = H * W

    xb = xpad_ref[...].astype(jnp.bfloat16)        # single cast per block
    acc = None
    for k in range(9):                             # static unroll, 9 MXU dots
        ky, kx = divmod(k, 3)
        tap = xb[ky:ky + H, kx:kx + W, :].reshape(M, Cp)
        d = jnp.dot(tap, w_ref[k], preferred_element_type=jnp.float32)
        acc = d if acc is None else acc + d

    y1_ref[...] = acc.reshape(H, W, Cp).astype(y1_ref.dtype)
    stats_ref[0:1, :] = jnp.sum(acc, axis=0, keepdims=True)
    stats_ref[1:2, :] = jnp.sum(acc * acc, axis=0, keepdims=True)


def _bn1_conv2_kernel(y1_ref, a_ref, c_ref, w_ref, y2_ref, stats_ref, tpad_ref):
    """Folded BN1 (a*x + c) + ReLU, then 3x3 conv2, on one unpadded image.

    conv2's zero padding is realized by writing bn1+relu of the interior into a
    halo-zeroed VMEM scratch (4 small strip stores), not an iota mask.
    """
    H, W, Cp = y1_ref.shape
    Hp, Wp = H + 2, W + 2
    M = H * W

    t = jnp.maximum(y1_ref[...].astype(jnp.float32) * a_ref[...] + c_ref[...], 0.0)

    zrow = jnp.zeros((1, Wp, Cp), tpad_ref.dtype)
    zcol = jnp.zeros((Hp, 1, Cp), tpad_ref.dtype)
    tpad_ref[0:1, :, :] = zrow
    tpad_ref[Hp - 1:Hp, :, :] = zrow
    tpad_ref[:, 0:1, :] = zcol
    tpad_ref[:, Wp - 1:Wp, :] = zcol
    tpad_ref[1:H + 1, 1:W + 1, :] = t

    tb = tpad_ref[...].astype(jnp.bfloat16)        # single cast per block
    acc = None
    for k in range(9):
        ky, kx = divmod(k, 3)
        tap = tb[ky:ky + H, kx:kx + W, :].reshape(M, Cp)
        d = jnp.dot(tap, w_ref[k], preferred_element_type=jnp.float32)
        acc = d if acc is None else acc + d

    y2_ref[...] = acc.reshape(H, W, Cp).astype(y2_ref.dtype)
    stats_ref[0:1, :] = jnp.sum(acc, axis=0, keepdims=True)
    stats_ref[1:2, :] = jnp.sum(acc * acc, axis=0, keepdims=True)


def _bn2_residual_kernel(y2_ref, xpad_ref, a_ref, c_ref, o_ref):
    """Folded BN2 + residual add + ReLU (VPU epilogue, lane-dense store).

    The residual is read as the interior of the padded input block, so the
    wrapper does not keep a second, unpadded copy of x.
    """
    Hp, Wp, Cp = xpad_ref.shape
    H, W = Hp - 2, Wp - 2
    x_int = xpad_ref[1:H + 1, 1:W + 1, :]
    o_ref[...] = jnp.maximum(
        y2_ref[...].astype(jnp.float32) * a_ref[...] + c_ref[...] + x_int, 0.0)


# ---------------------------------------------------------------------------
# Wrapper
# ---------------------------------------------------------------------------
def _fold_bn(stats, gamma, beta, m_total):
    """(N, 2, Cp) per-sample (sum, sumsq) -> folded BN scale/shift (1, Cp)."""
    s = jnp.sum(stats[:, 0, :], axis=0)
    ss = jnp.sum(stats[:, 1, :], axis=0)
    mean = s / m_total
    var = jnp.maximum(ss / m_total - mean * mean, 0.0)
    a = gamma * jax.lax.rsqrt(var + EPS)
    c = beta - mean * a
    return a.reshape(1, -1), c.reshape(1, -1)


@jax.jit
def residual_block_pallas(x_nchw, params):
    (w1, b1, g1, be1, w2, b2, g2, be2) = params
    del b1, b2  # cancelled exactly by training-mode BN mean subtraction

    N, C, H, W = x_nchw.shape
    Cp = ((C + 127) // 128) * 128          # lane-dense channel dim
    Hp, Wp = H + 2, W + 2

    # Boundary-only layout plumbing (NCHW interface): one padded NHWC copy of x.
    x = jnp.transpose(x_nchw, (0, 2, 3, 1)).astype(jnp.float32)
    xpad = jnp.pad(x, ((0, 0), (1, 1), (1, 1), (0, Cp - C)))

    def prep_w(w):                          # (3,3,C,C) HWIO -> (9, Cp, Cp) bf16
        wp = jnp.zeros((3, 3, Cp, Cp), jnp.float32)
        wp = wp.at[:, :, :C, :C].set(w.astype(jnp.float32))
        return wp.reshape(9, Cp, Cp).astype(jnp.bfloat16)

    def prep_v(v):                          # (C,) -> (Cp,)
        return jnp.pad(v.astype(jnp.float32), (0, Cp - C))

    w1p, w2p = prep_w(w1), prep_w(w2)
    g1p, be1p, g2p, be2p = prep_v(g1), prep_v(be1), prep_v(g2), prep_v(be2)

    img_pad_spec = pl.BlockSpec((None, Hp, Wp, Cp), lambda n: (n, 0, 0, 0))
    img_spec = pl.BlockSpec((None, H, W, Cp), lambda n: (n, 0, 0, 0))
    stat_spec = pl.BlockSpec((None, 2, Cp), lambda n: (n, 0, 0))
    w_spec = pl.BlockSpec((9, Cp, Cp), lambda n: (0, 0, 0))
    vec_spec = pl.BlockSpec((1, Cp), lambda n: (0, 0))

    # Explicit VMEM budget per pass, sized from the per-step footprint.
    F32, BF16 = 4, 2
    b_xpad = Hp * Wp * Cp * F32
    b_img16 = H * W * Cp * BF16
    b_img32 = H * W * Cp * F32
    b_w = 9 * Cp * Cp * BF16
    b_stat = 2 * Cp * F32
    b_vec = Cp * F32
    b_scr = Hp * Wp * Cp * F32
    need1 = 2 * (b_xpad + b_w + b_img16 + b_stat) + 2 * b_img32
    need2 = 2 * (b_img16 + 2 * b_vec + b_w + b_img16 + b_stat) + b_scr + 2 * b_img32
    need3 = 2 * (b_img16 + b_xpad + 2 * b_vec + b_img32)

    def cparams(need):
        limit = int(min(max(2 * need, 32 << 20), 64 << 20))
        return pltpu.CompilerParams(
            dimension_semantics=("parallel",), vmem_limit_bytes=limit)

    # ---- pass 1: conv1 -> unpadded bf16 y1 + per-sample BN1 partial stats ----
    y1, s1 = pl.pallas_call(
        _conv1_kernel,
        out_shape=(jax.ShapeDtypeStruct((N, H, W, Cp), jnp.bfloat16),
                   jax.ShapeDtypeStruct((N, 2, Cp), jnp.float32)),
        grid=(N,),
        in_specs=[img_pad_spec, w_spec],
        out_specs=(img_spec, stat_spec),
        compiler_params=cparams(need1),
    )(xpad, w1p)

    a1, c1 = _fold_bn(s1, g1p, be1p, N * H * W)

    # ---- pass 2: bn1 + relu + conv2 -> bf16 y2 + per-sample BN2 stats --------
    y2, s2 = pl.pallas_call(
        _bn1_conv2_kernel,
        out_shape=(jax.ShapeDtypeStruct((N, H, W, Cp), jnp.bfloat16),
                   jax.ShapeDtypeStruct((N, 2, Cp), jnp.float32)),
        grid=(N,),
        in_specs=[img_spec, vec_spec, vec_spec, w_spec],
        out_specs=(img_spec, stat_spec),
        scratch_shapes=[pltpu.VMEM((Hp, Wp, Cp), jnp.float32)],
        compiler_params=cparams(need2),
    )(y1, a1, c1, w2p)

    a2, c2 = _fold_bn(s2, g2p, be2p, N * H * W)

    # ---- pass 3: bn2 + residual + relu ---------------------------------------
    out_nhwc = pl.pallas_call(
        _bn2_residual_kernel,
        out_shape=jax.ShapeDtypeStruct((N, H, W, Cp), jnp.float32),
        grid=(N,),
        in_specs=[img_spec, img_pad_spec, vec_spec, vec_spec],
        out_specs=img_spec,
        compiler_params=cparams(need3),
    )(y2, xpad, a2, c2)

    # Strip channel padding, return NCHW to match the PyTorch interface.
    return jnp.transpose(out_nhwc[..., :C], (0, 3, 1, 2))


# ---------------------------------------------------------------------------
# Pure-JAX reference (matches the PyTorch module in its default training state)
# ---------------------------------------------------------------------------
def residual_block_reference(x_nchw, params):
    (w1, b1, g1, be1, w2, b2, g2, be2) = params

    def conv(x, w, b):  # w: (3,3,Cin,Cout) HWIO
        y = jax.lax.conv_general_dilated(
            x, w, window_strides=(1, 1), padding="SAME",
            dimension_numbers=("NCHW", "HWIO", "NCHW"))
        return y + b.reshape(1, -1, 1, 1)

    def bn(x, g, be):
        mean = jnp.mean(x, axis=(0, 2, 3), keepdims=True)
        var = jnp.mean((x - mean) ** 2, axis=(0, 2, 3), keepdims=True)
        return ((x - mean) * jax.lax.rsqrt(var + EPS)
                * g.reshape(1, -1, 1, 1) + be.reshape(1, -1, 1, 1))

    out = jax.nn.relu(bn(conv(x_nchw, w1, b1), g1, be1))
    out = bn(conv(out, w2, b2), g2, be2)
    return jax.nn.relu(out + x_nchw)


def init_params(key, channels):
    k1, k2, k3, k4 = jax.random.split(key, 4)
    fan_in = channels * 3 * 3
    bound = 1.0 / (fan_in ** 0.5)
    w1 = jax.random.uniform(k1, (3, 3, channels, channels),
                            minval=-bound, maxval=bound, dtype=jnp.float32)
    b1 = jax.random.uniform(k2, (channels,), minval=-bound, maxval=bound,
                            dtype=jnp.float32)
    w2 = jax.random.uniform(k3, (3, 3, channels, channels),
                            minval=-bound, maxval=bound, dtype=jnp.float32)
    b2 = jax.random.uniform(k4, (channels,), minval=-bound, maxval=bound,
                            dtype=jnp.float32)
    g1 = jnp.ones((channels,), jnp.float32)
    be1 = jnp.zeros((channels,), jnp.float32)
    g2 = jnp.ones((channels,), jnp.float32)
    be2 = jnp.zeros((channels,), jnp.float32)
    return (w1, b1, g1, be1, w2, b2, g2, be2)


if __name__ == "__main__":
    key = jax.random.PRNGKey(0)
    kx, kp = jax.random.split(key)

    N, C, H, W = 2, 4, 16, 16
    x = jax.random.normal(kx, (N, C, H, W), dtype=jnp.float32)
    params = init_params(kp, C)

    out = jax.block_until_ready(residual_block_pallas(x, params))
    ref = jax.block_until_ready(residual_block_reference(x, params))

    assert out.shape == (N, C, H, W)
    err = float(jnp.max(jnp.abs(out - ref)))
    # Tolerance loosened vs. the pure-f32 pipeline: two bf16-operand convs plus
    # bf16 inter-pass activations, each amplified by a BN normalization.
    assert jnp.allclose(out, ref, atol=1e-1, rtol=1e-1), f"max abs err = {err}"

    print("KERNEL_OK")
</pallas_src>

<mosaic_0001>
module attributes {stable_mosaic.version = 11 : i64} {
  func.func @_conv1_kernel(%arg0: i32, %arg1: memref<1x18x18x128xf32, #tpu.memory_space<vmem>>, %arg2: memref<9x128x128xbf16, #tpu.memory_space<vmem>>, %arg3: memref<1x16x16x128xbf16, #tpu.memory_space<vmem>>, %arg4: memref<1x2x128xf32, #tpu.memory_space<vmem>>) attributes {dimension_semantics = [#tpu.dimension_semantics<parallel>], iteration_bounds = array<i64: 2>, scalar_prefetch = 0 : i64, scratch_operands = 0 : i64, tpu.core_type = #tpu.core_type<tc>, window_params = [{transform_indices = @transform_0, window_bounds = array<i64: 1, 18, 18, 128>}, {pipeline_mode = #tpu.pipeline_mode<synchronous>, transform_indices = @transform_1, window_bounds = array<i64: 9, 128, 128>}, {transform_indices = @transform_2, window_bounds = array<i64: 1, 16, 16, 128>}, {transform_indices = @transform_3, window_bounds = array<i64: 1, 2, 128>}]} {
    %c0 = arith.constant 0 : index
    %c0_0 = arith.constant 0 : index
    %c0_1 = arith.constant 0 : index
    %c0_2 = arith.constant 0 : index
    %0 = vector.load %arg1[%c0, %c0_0, %c0_1, %c0_2] : memref<1x18x18x128xf32, #tpu.memory_space<vmem>>, vector<1x18x18x128xf32>
    %1 = vector.shape_cast %0 : vector<1x18x18x128xf32> to vector<18x18x128xf32>
    %2 = arith.truncf %1 : vector<18x18x128xf32> to vector<18x18x128xbf16>
    %3 = vector.extract_strided_slice %2 {offsets = [0, 0, 0], sizes = [16, 16, 128], strides = [1, 1, 1]} : vector<18x18x128xbf16> to vector<16x16x128xbf16>
    %4 = vector.shape_cast %3 : vector<16x16x128xbf16> to vector<256x128xbf16>
    %c0_3 = arith.constant 0 : index
    %c0_4 = arith.constant 0 : index
    %c0_5 = arith.constant 0 : index
    %5 = vector.load %arg2[%c0_3, %c0_4, %c0_5] : memref<9x128x128xbf16, #tpu.memory_space<vmem>>, vector<1x128x128xbf16>
    %6 = vector.shape_cast %5 : vector<1x128x128xbf16> to vector<128x128xbf16>
    %cst = arith.constant dense<0.000000e+00> : vector<256x128xf32>
    %7 = tpu.matmul %4, %6, %cst {dimension_numbers = #tpu.dot_dimension_numbers<[1], [0], [0], [1], [0, 0, 1, 1], [], []>} : vector<256x128xbf16>, vector<128x128xbf16>, vector<256x128xf32> -> vector<256x128xf32>
    %8 = vector.extract_strided_slice %2 {offsets = [0, 1, 0], sizes = [16, 16, 128], strides = [1, 1, 1]} : vector<18x18x128xbf16> to vector<16x16x128xbf16>
    %9 = vector.shape_cast %8 : vector<16x16x128xbf16> to vector<256x128xbf16>
    %c1 = arith.constant 1 : index
    %c0_6 = arith.constant 0 : index
    %c0_7 = arith.constant 0 : index
    %10 = vector.load %arg2[%c1, %c0_6, %c0_7] : memref<9x128x128xbf16, #tpu.memory_space<vmem>>, vector<1x128x128xbf16>
    %11 = vector.shape_cast %10 : vector<1x128x128xbf16> to vector<128x128xbf16>
    %cst_8 = arith.constant dense<0.000000e+00> : vector<256x128xf32>
    %12 = tpu.matmul %9, %11, %cst_8 {dimension_numbers = #tpu.dot_dimension_numbers<[1], [0], [0], [1], [0, 0, 1, 1], [], []>} : vector<256x128xbf16>, vector<128x128xbf16>, vector<256x128xf32> -> vector<256x128xf32>
    %13 = arith.addf %7, %12 : vector<256x128xf32>
    %14 = vector.extract_strided_slice %2 {offsets = [0, 2, 0], sizes = [16, 16, 128], strides = [1, 1, 1]} : vector<18x18x128xbf16> to vector<16x16x128xbf16>
    %15 = vector.shape_cast %14 : vector<16x16x128xbf16> to vector<256x128xbf16>
    %c2 = arith.constant 2 : index
    %c0_9 = arith.constant 0 : index
    %c0_10 = arith.constant 0 : index
    %16 = vector.load %arg2[%c2, %c0_9, %c0_10] : memref<9x128x128xbf16, #tpu.memory_space<vmem>>, vector<1x128x128xbf16>
    %17 = vector.shape_cast %16 : vector<1x128x128xbf16> to vector<128x128xbf16>
    %cst_11 = arith.constant dense<0.000000e+00> : vector<256x128xf32>
    %18 = tpu.matmul %15, %17, %cst_11 {dimension_numbers = #tpu.dot_dimension_numbers<[1], [0], [0], [1], [0, 0, 1, 1], [], []>} : vector<256x128xbf16>, vector<128x128xbf16>, vector<256x128xf32> -> vector<256x128xf32>
    %19 = arith.addf %13, %18 : vector<256x128xf32>
    %20 = vector.extract_strided_slice %2 {offsets = [1, 0, 0], sizes = [16, 16, 128], strides = [1, 1, 1]} : vector<18x18x128xbf16> to vector<16x16x128xbf16>
    %21 = vector.shape_cast %20 : vector<16x16x128xbf16> to vector<256x128xbf16>
    %c3 = arith.constant 3 : index
    %c0_12 = arith.constant 0 : index
    %c0_13 = arith.constant 0 : index
    %22 = vector.load %arg2[%c3, %c0_12, %c0_13] : memref<9x128x128xbf16, #tpu.memory_space<vmem>>, vector<1x128x128xbf16>
    %23 = vector.shape_cast %22 : vector<1x128x128xbf16> to vector<128x128xbf16>
    %cst_14 = arith.constant dense<0.000000e+00> : vector<256x128xf32>
    %24 = tpu.matmul %21, %23, %cst_14 {dimension_numbers = #tpu.dot_dimension_numbers<[1], [0], [0], [1], [0, 0, 1, 1], [], []>} : vector<256x128xbf16>, vector<128x128xbf16>, vector<256x128xf32> -> vector<256x128xf32>
    %25 = arith.addf %19, %24 : vector<256x128xf32>
    %26 = vector.extract_strided_slice %2 {offsets = [1, 1, 0], sizes = [16, 16, 128], strides = [1, 1, 1]} : vector<18x18x128xbf16> to vector<16x16x128xbf16>
    %27 = vector.shape_cast %26 : vector<16x16x128xbf16> to vector<256x128xbf16>
    %c4 = arith.constant 4 : index
    %c0_15 = arith.constant 0 : index
    %c0_16 = arith.constant 0 : index
    %28 = vector.load %arg2[%c4, %c0_15, %c0_16] : memref<9x128x128xbf16, #tpu.memory_space<vmem>>, vector<1x128x128xbf16>
    %29 = vector.shape_cast %28 : vector<1x128x128xbf16> to vector<128x128xbf16>
    %cst_17 = arith.constant dense<0.000000e+00> : vector<256x128xf32>
    %30 = tpu.matmul %27, %29, %cst_17 {dimension_numbers = #tpu.dot_dimension_numbers<[1], [0], [0], [1], [0, 0, 1, 1], [], []>} : vector<256x128xbf16>, vector<128x128xbf16>, vector<256x128xf32> -> vector<256x128xf32>
    %31 = arith.addf %25, %30 : vector<256x128xf32>
    %32 = vector.extract_strided_slice %2 {offsets = [1, 2, 0], sizes = [16, 16, 128], strides = [1, 1, 1]} : vector<18x18x128xbf16> to vector<16x16x128xbf16>
    %33 = vector.shape_cast %32 : vector<16x16x128xbf16> to vector<256x128xbf16>
    %c5 = arith.constant 5 : index
    %c0_18 = arith.constant 0 : index
    %c0_19 = arith.constant 0 : index
    %34 = vector.load %arg2[%c5, %c0_18, %c0_19] : memref<9x128x128xbf16, #tpu.memory_space<vmem>>, vector<1x128x128xbf16>
    %35 = vector.shape_cast %34 : vector<1x128x128xbf16> to vector<128x128xbf16>
    %cst_20 = arith.constant dense<0.000000e+00> : vector<256x128xf32>
    %36 = tpu.matmul %33, %35, %cst_20 {dimension_numbers = #tpu.dot_dimension_numbers<[1], [0], [0], [1], [0, 0, 1, 1], [], []>} : vector<256x128xbf16>, vector<128x128xbf16>, vector<256x128xf32> -> vector<256x128xf32>
    %37 = arith.addf %31, %36 : vector<256x128xf32>
    %38 = vector.extract_strided_slice %2 {offsets = [2, 0, 0], sizes = [16, 16, 128], strides = [1, 1, 1]} : vector<18x18x128xbf16> to vector<16x16x128xbf16>
    %39 = vector.shape_cast %38 : vector<16x16x128xbf16> to vector<256x128xbf16>
    %c6 = arith.constant 6 : index
    %c0_21 = arith.constant 0 : index
    %c0_22 = arith.constant 0 : index
    %40 = vector.load %arg2[%c6, %c0_21, %c0_22] : memref<9x128x128xbf16, #tpu.memory_space<vmem>>, vector<1x128x128xbf16>
    %41 = vector.shape_cast %40 : vector<1x128x128xbf16> to vector<128x128xbf16>
    %cst_23 = arith.constant dense<0.000000e+00> : vector<256x128xf32>
    %42 = tpu.matmul %39, %41, %cst_23 {dimension_numbers = #tpu.dot_dimension_numbers<[1], [0], [0], [1], [0, 0, 1, 1], [], []>} : vector<256x128xbf16>, vector<128x128xbf16>, vector<256x128xf32> -> vector<256x128xf32>
    %43 = arith.addf %37, %42 : vector<256x128xf32>
    %44 = vector.extract_strided_slice %2 {offsets = [2, 1, 0], sizes = [16, 16, 128], strides = [1, 1, 1]} : vector<18x18x128xbf16> to vector<16x16x128xbf16>
    %45 = vector.shape_cast %44 : vector<16x16x128xbf16> to vector<256x128xbf16>
    %c7 = arith.constant 7 : index
    %c0_24 = arith.constant 0 : index
    %c0_25 = arith.constant 0 : index
    %46 = vector.load %arg2[%c7, %c0_24, %c0_25] : memref<9x128x128xbf16, #tpu.memory_space<vmem>>, vector<1x128x128xbf16>
    %47 = vector.shape_cast %46 : vector<1x128x128xbf16> to vector<128x128xbf16>
    %cst_26 = arith.constant dense<0.000000e+00> : vector<256x128xf32>
    %48 = tpu.matmul %45, %47, %cst_26 {dimension_numbers = #tpu.dot_dimension_numbers<[1], [0], [0], [1], [0, 0, 1, 1], [], []>} : vector<256x128xbf16>, vector<128x128xbf16>, vector<256x128xf32> -> vector<256x128xf32>
    %49 = arith.addf %43, %48 : vector<256x128xf32>
    %50 = vector.extract_strided_slice %2 {offsets = [2, 2, 0], sizes = [16, 16, 128], strides = [1, 1, 1]} : vector<18x18x128xbf16> to vector<16x16x128xbf16>
    %51 = vector.shape_cast %50 : vector<16x16x128xbf16> to vector<256x128xbf16>
    %c8 = arith.constant 8 : index
    %c0_27 = arith.constant 0 : index
    %c0_28 = arith.constant 0 : index
    %52 = vector.load %arg2[%c8, %c0_27, %c0_28] : memref<9x128x128xbf16, #tpu.memory_space<vmem>>, vector<1x128x128xbf16>
    %53 = vector.shape_cast %52 : vector<1x128x128xbf16> to vector<128x128xbf16>
    %cst_29 = arith.constant dense<0.000000e+00> : vector<256x128xf32>
    %54 = tpu.matmul %51, %53, %cst_29 {dimension_numbers = #tpu.dot_dimension_numbers<[1], [0], [0], [1], [0, 0, 1, 1], [], []>} : vector<256x128xbf16>, vector<128x128xbf16>, vector<256x128xf32> -> vector<256x128xf32>
    %55 = arith.addf %49, %54 : vector<256x128xf32>
    %56 = vector.shape_cast %55 : vector<256x128xf32> to vector<16x16x128xf32>
    %57 = arith.truncf %56 : vector<16x16x128xf32> to vector<16x16x128xbf16>
    %c0_30 = arith.constant 0 : index
    %c0_31 = arith.constant 0 : index
    %c0_32 = arith.constant 0 : index
    %c0_33 = arith.constant 0 : index
    %58 = vector.load %arg3[%c0_30, %c0_31, %c0_32, %c0_33] : memref<1x16x16x128xbf16, #tpu.memory_space<vmem>>, vector<1x16x16x128xbf16>
    %59 = vector.shape_cast %58 : vector<1x16x16x128xbf16> to vector<16x16x128xbf16>
    %60 = vector.shape_cast %57 : vector<16x16x128xbf16> to vector<1x16x16x128xbf16>
    tpu.vector_store %arg3[%c0_30, %c0_31, %c0_32, %c0_33], %60 {strides = array<i32>} : memref<1x16x16x128xbf16, #tpu.memory_space<vmem>>, vector<1x16x16x128xbf16>,
    %cst_34 = arith.constant dense<0.000000e+00> : vector<128xf32>
    %61 = vector.multi_reduction <add>, %55, %cst_34 [0] : vector<256x128xf32> to vector<128xf32>
    %62 = vector.shape_cast %61 : vector<128xf32> to vector<1x128xf32>
    %c0_35 = arith.constant 0 : index
    %c0_36 = arith.constant 0 : index
    %c0_37 = arith.constant 0 : index
    %63 = vector.load %arg4[%c0_35, %c0_36, %c0_37] : memref<1x2x128xf32, #tpu.memory_space<vmem>>, vector<1x1x128xf32>
    %64 = vector.shape_cast %63 : vector<1x1x128xf32> to vector<1x128xf32>
    %65 = vector.shape_cast %62 : vector<1x128xf32> to vector<1x1x128xf32>
    tpu.vector_store %arg4[%c0_35, %c0_36, %c0_37], %65 {strides = array<i32>} : memref<1x2x128xf32, #tpu.memory_space<vmem>>, vector<1x1x128xf32>,
    %66 = arith.mulf %55, %55 : vector<256x128xf32>
    %cst_38 = arith.constant dense<0.000000e+00> : vector<128xf32>
    %67 = vector.multi_reduction <add>, %66, %cst_38 [0] : vector<256x128xf32> to vector<128xf32>
    %68 = vector.shape_cast %67 : vector<128xf32> to vector<1x128xf32>
    %c0_39 = arith.constant 0 : index
    %c1_40 = arith.constant 1 : index
    %c0_41 = arith.constant 0 : index
    %69 = vector.load %arg4[%c0_39, %c1_40, %c0_41] : memref<1x2x128xf32, #tpu.memory_space<vmem>>, vector<1x1x128xf32>
    %70 = vector.shape_cast %69 : vector<1x1x128xf32> to vector<1x128xf32>
    %71 = vector.shape_cast %68 : vector<1x128xf32> to vector<1x1x128xf32>
    tpu.vector_store %arg4[%c0_39, %c1_40, %c0_41], %71 {strides = array<i32>} : memref<1x2x128xf32, #tpu.memory_space<vmem>>, vector<1x1x128xf32>,
    return
  }
  func.func @transform_0(%arg0: i32) -> (i32, i32, i32, i32) {
    %c0_i32 = arith.constant 0 : i32
    %c0_i32_0 = arith.constant 0 : i32
    %c0_i32_1 = arith.constant 0 : i32
    %c0_i32_2 = arith.constant 0 : i32
    return %arg0, %c0_i32, %c0_i32_0, %c0_i32_1 : i32, i32, i32, i32
  }
  func.func @transform_1(%arg0: i32) -> (i32, i32, i32) {
    %c0_i32 = arith.constant 0 : i32
    %c0_i32_0 = arith.constant 0 : i32
    %c0_i32_1 = arith.constant 0 : i32
    %c0_i32_2 = arith.constant 0 : i32
    return %c0_i32, %c0_i32_0, %c0_i32_1 : i32, i32, i32
  }
  func.func @transform_2(%arg0: i32) -> (i32, i32, i32, i32) {
    %c0_i32 = arith.constant 0 : i32
    %c0_i32_0 = arith.constant 0 : i32
    %c0_i32_1 = arith.constant 0 : i32
    %c0_i32_2 = arith.constant 0 : i32
    return %arg0, %c0_i32, %c0_i32_0, %c0_i32_1 : i32, i32, i32, i32
  }
  func.func @transform_3(%arg0: i32) -> (i32, i32, i32) {
    %c0_i32 = arith.constant 0 : i32
    %c0_i32_0 = arith.constant 0 : i32
    %c0_i32_1 = arith.constant 0 : i32
    return %arg0, %c0_i32, %c0_i32_0 : i32, i32, i32
  }
}

module attributes {stable_mosaic.version = 11 : i64} {
  func.func @_bn1_conv2_kernel(%arg0: i32, %arg1: memref<1x16x16x128xbf16, #tpu.memory_space<vmem>>, %arg2: memref<1x128xf32, #tpu.memory_space<vmem>>, %arg3: memref<1x128xf32, #tpu.memory_space<vmem>>, %arg4: memref<9x128x128xbf16, #tpu.memory_space<vmem>>, %arg5: memref<1x16x16x128xbf16, #tpu.memory_space<vmem>>, %arg6: memref<1x2x128xf32, #tpu.memory_space<vmem>>, %arg7: memref<18x18x128xf32, #tpu.memory_space<vmem>>) attributes {dimension_semantics = [#tpu.dimension_semantics<parallel>], iteration_bounds = array<i64: 2>, scalar_prefetch = 0 : i64, scratch_operands = 1 : i64, tpu.core_type = #tpu.core_type<tc>, window_params = [{transform_indices = @transform_0, window_bounds = array<i64: 1, 16, 16, 128>}, {pipeline_mode = #tpu.pipeline_mode<synchronous>, transform_indices = @transform_1, window_bounds = array<i64: 1, 128>}, {pipeline_mode = #tpu.pipeline_mode<synchronous>, transform_indices = @transform_2, window_bounds = array<i64: 1, 128>}, {pipeline_mode = #tpu.pipeline_mode<synchronous>, transform_indices = @transform_3, window_bounds = array<i64: 9, 128, 128>}, {transform_indices = @transform_4, window_bounds = array<i64: 1, 16, 16, 128>}, {transform_indices = @transform_5, window_bounds = array<i64: 1, 2, 128>}]} {
    %c0 = arith.constant 0 : index
    %c0_0 = arith.constant 0 : index
    %c0_1 = arith.constant 0 : index
    %c0_2 = arith.constant 0 : index
    %0 = vector.load %arg1[%c0, %c0_0, %c0_1, %c0_2] : memref<1x16x16x128xbf16, #tpu.memory_space<vmem>>, vector<1x16x16x128xbf16>
    %1 = vector.shape_cast %0 : vector<1x16x16x128xbf16> to vector<16x16x128xbf16>
    %2 = arith.extf %1 : vector<16x16x128xbf16> to vector<16x16x128xf32>
    %c0_3 = arith.constant 0 : index
    %c0_4 = arith.constant 0 : index
    %3 = vector.load %arg2[%c0_3, %c0_4] : memref<1x128xf32, #tpu.memory_space<vmem>>, vector<1x128xf32>
    %4 = vector.shape_cast %3 : vector<1x128xf32> to vector<1x1x128xf32>
    %5 = vector.broadcast %4 : vector<1x1x128xf32> to vector<16x16x128xf32>
    %6 = arith.mulf %2, %5 : vector<16x16x128xf32>
    %c0_5 = arith.constant 0 : index
    %c0_6 = arith.constant 0 : index
    %7 = vector.load %arg3[%c0_5, %c0_6] : memref<1x128xf32, #tpu.memory_space<vmem>>, vector<1x128xf32>
    %8 = vector.shape_cast %7 : vector<1x128xf32> to vector<1x1x128xf32>
    %9 = vector.broadcast %8 : vector<1x1x128xf32> to vector<16x16x128xf32>
    %10 = arith.addf %6, %9 : vector<16x16x128xf32>
    %cst = arith.constant 0.000000e+00 : f32
    %11 = vector.broadcast %cst : f32 to vector<16x16x128xf32>
    %12 = arith.maximumf %10, %11 : vector<16x16x128xf32>
    %cst_7 = arith.constant 0.000000e+00 : f32
    %13 = vector.broadcast %cst_7 : f32 to vector<1x18x128xf32>
    %cst_8 = arith.constant 0.000000e+00 : f32
    %14 = vector.broadcast %cst_8 : f32 to vector<18x1x128xf32>
    %c0_9 = arith.constant 0 : index
    %c0_10 = arith.constant 0 : index
    %c0_11 = arith.constant 0 : index
    %15 = vector.load %arg7[%c0_9, %c0_10, %c0_11] : memref<18x18x128xf32, #tpu.memory_space<vmem>>, vector<1x18x128xf32>
    tpu.vector_store %arg7[%c0_9, %c0_10, %c0_11], %13 {strides = array<i32>} : memref<18x18x128xf32, #tpu.memory_space<vmem>>, vector<1x18x128xf32>,
    %c17 = arith.constant 17 : index
    %c0_12 = arith.constant 0 : index
    %c0_13 = arith.constant 0 : index
    %16 = vector.load %arg7[%c17, %c0_12, %c0_13] : memref<18x18x128xf32, #tpu.memory_space<vmem>>, vector<1x18x128xf32>
    tpu.vector_store %arg7[%c17, %c0_12, %c0_13], %13 {strides = array<i32>} : memref<18x18x128xf32, #tpu.memory_space<vmem>>, vector<1x18x128xf32>,
    %c0_14 = arith.constant 0 : index
    %c0_15 = arith.constant 0 : index
    %c0_16 = arith.constant 0 : index
    %17 = vector.load %arg7[%c0_14, %c0_15, %c0_16] : memref<18x18x128xf32, #tpu.memory_space<vmem>>, vector<18x1x128xf32>
    tpu.vector_store %arg7[%c0_14, %c0_15, %c0_16], %14 {strides = array<i32>} : memref<18x18x128xf32, #tpu.memory_space<vmem>>, vector<18x1x128xf32>,
    %c0_17 = arith.constant 0 : index
    %c17_18 = arith.constant 17 : index
    %c0_19 = arith.constant 0 : index
    %18 = vector.load %arg7[%c0_17, %c17_18, %c0_19] : memref<18x18x128xf32, #tpu.memory_space<vmem>>, vector<18x1x128xf32>
    tpu.vector_store %arg7[%c0_17, %c17_18, %c0_19], %14 {strides = array<i32>} : memref<18x18x128xf32, #tpu.memory_space<vmem>>, vector<18x1x128xf32>,
    %c1 = arith.constant 1 : index
    %c1_20 = arith.constant 1 : index
    %c0_21 = arith.constant 0 : index
    %19 = vector.load %arg7[%c1, %c1_20, %c0_21] : memref<18x18x128xf32, #tpu.memory_space<vmem>>, vector<16x16x128xf32>
    tpu.vector_store %arg7[%c1, %c1_20, %c0_21], %12 {strides = array<i32>} : memref<18x18x128xf32, #tpu.memory_space<vmem>>, vector<16x16x128xf32>,
    %c0_22 = arith.constant 0 : index
    %c0_23 = arith.constant 0 : index
    %c0_24 = arith.constant 0 : index
    %20 = vector.load %arg7[%c0_22, %c0_23, %c0_24] : memref<18x18x128xf32, #tpu.memory_space<vmem>>, vector<18x18x128xf32>
    %21 = arith.truncf %20 : vector<18x18x128xf32> to vector<18x18x128xbf16>
    %22 = vector.extract_strided_slice %21 {offsets = [0, 0, 0], sizes = [16, 16, 128], strides = [1, 1, 1]} : vector<18x18x128xbf16> to vector<16x16x128xbf16>
    %23 = vector.shape_cast %22 : vector<16x16x128xbf16> to vector<256x128xbf16>
    %c0_25 = arith.constant 0 : index
    %c0_26 = arith.constant 0 : index
    %c0_27 = arith.constant 0 : index
    %24 = vector.load %arg4[%c0_25, %c0_26, %c0_27] : memref<9x128x128xbf16, #tpu.memory_space<vmem>>, vector<1x128x128xbf16>
    %25 = vector.shape_cast %24 : vector<1x128x128xbf16> to vector<128x128xbf16>
    %cst_28 = arith.constant dense<0.000000e+00> : vector<256x128xf32>
    %26 = tpu.matmul %23, %25, %cst_28 {dimension_numbers = #tpu.dot_dimension_numbers<[1], [0], [0], [1], [0, 0, 1, 1], [], []>} : vector<256x128xbf16>, vector<128x128xbf16>, vector<256x128xf32> -> vector<256x128xf32>
    %27 = vector.extract_strided_slice %21 {offsets = [0, 1, 0], sizes = [16, 16, 128], strides = [1, 1, 1]} : vector<18x18x128xbf16> to vector<16x16x128xbf16>
    %28 = vector.shape_cast %27 : vector<16x16x128xbf16> to vector<256x128xbf16>
    %c1_29 = arith.constant 1 : index
    %c0_30 = arith.constant 0 : index
    %c0_31 = arith.constant 0 : index
    %29 = vector.load %arg4[%c1_29, %c0_30, %c0_31] : memref<9x128x128xbf16, #tpu.memory_space<vmem>>, vector<1x128x128xbf16>
    %30 = vector.shape_cast %29 : vector<1x128x128xbf16> to vector<128x128xbf16>
    %cst_32 = arith.constant dense<0.000000e+00> : vector<256x128xf32>
    %31 = tpu.matmul %28, %30, %cst_32 {dimension_numbers = #tpu.dot_dimension_numbers<[1], [0], [0], [1], [0, 0, 1, 1], [], []>} : vector<256x128xbf16>, vector<128x128xbf16>, vector<256x128xf32> -> vector<256x128xf32>
    %32 = arith.addf %26, %31 : vector<256x128xf32>
    %33 = vector.extract_strided_slice %21 {offsets = [0, 2, 0], sizes = [16, 16, 128], strides = [1, 1, 1]} : vector<18x18x128xbf16> to vector<16x16x128xbf16>
    %34 = vector.shape_cast %33 : vector<16x16x128xbf16> to vector<256x128xbf16>
    %c2 = arith.constant 2 : index
    %c0_33 = arith.constant 0 : index
    %c0_34 = arith.constant 0 : index
    %35 = vector.load %arg4[%c2, %c0_33, %c0_34] : memref<9x128x128xbf16, #tpu.memory_space<vmem>>, vector<1x128x128xbf16>
    %36 = vector.shape_cast %35 : vector<1x128x128xbf16> to vector<128x128xbf16>
    %cst_35 = arith.constant dense<0.000000e+00> : vector<256x128xf32>
    %37 = tpu.matmul %34, %36, %cst_35 {dimension_numbers = #tpu.dot_dimension_numbers<[1], [0], [0], [1], [0, 0, 1, 1], [], []>} : vector<256x128xbf16>, vector<128x128xbf16>, vector<256x128xf32> -> vector<256x128xf32>
    %38 = arith.addf %32, %37 : vector<256x128xf32>
    %39 = vector.extract_strided_slice %21 {offsets = [1, 0, 0], sizes = [16, 16, 128], strides = [1, 1, 1]} : vector<18x18x128xbf16> to vector<16x16x128xbf16>
    %40 = vector.shape_cast %39 : vector<16x16x128xbf16> to vector<256x128xbf16>
    %c3 = arith.constant 3 : index
    %c0_36 = arith.constant 0 : index
    %c0_37 = arith.constant 0 : index
    %41 = vector.load %arg4[%c3, %c0_36, %c0_37] : memref<9x128x128xbf16, #tpu.memory_space<vmem>>, vector<1x128x128xbf16>
    %42 = vector.shape_cast %41 : vector<1x128x128xbf16> to vector<128x128xbf16>
    %cst_38 = arith.constant dense<0.000000e+00> : vector<256x128xf32>
    %43 = tpu.matmul %40, %42, %cst_38 {dimension_numbers = #tpu.dot_dimension_numbers<[1], [0], [0], [1], [0, 0, 1, 1], [], []>} : vector<256x128xbf16>, vector<128x128xbf16>, vector<256x128xf32> -> vector<256x128xf32>
    %44 = arith.addf %38, %43 : vector<256x128xf32>
    %45 = vector.extract_strided_slice %21 {offsets = [1, 1, 0], sizes = [16, 16, 128], strides = [1, 1, 1]} : vector<18x18x128xbf16> to vector<16x16x128xbf16>
    %46 = vector.shape_cast %45 : vector<16x16x128xbf16> to vector<256x128xbf16>
    %c4 = arith.constant 4 : index
    %c0_39 = arith.constant 0 : index
    %c0_40 = arith.constant 0 : index
    %47 = vector.load %arg4[%c4, %c0_39, %c0_40] : memref<9x128x128xbf16, #tpu.memory_space<vmem>>, vector<1x128x128xbf16>
    %48 = vector.shape_cast %47 : vector<1x128x128xbf16> to vector<128x128xbf16>
    %cst_41 = arith.constant dense<0.000000e+00> : vector<256x128xf32>
    %49 = tpu.matmul %46, %48, %cst_41 {dimension_numbers = #tpu.dot_dimension_numbers<[1], [0], [0], [1], [0, 0, 1, 1], [], []>} : vector<256x128xbf16>, vector<128x128xbf16>, vector<256x128xf32> -> vector<256x128xf32>
    %50 = arith.addf %44, %49 : vector<256x128xf32>
    %51 = vector.extract_strided_slice %21 {offsets = [1, 2, 0], sizes = [16, 16, 128], strides = [1, 1, 1]} : vector<18x18x128xbf16> to vector<16x16x128xbf16>
    %52 = vector.shape_cast %51 : vector<16x16x128xbf16> to vector<256x128xbf16>
    %c5 = arith.constant 5 : index
    %c0_42 = arith.constant 0 : index
    %c0_43 = arith.constant 0 : index
    %53 = vector.load %arg4[%c5, %c0_42, %c0_43] : memref<9x128x128xbf16, #tpu.memory_space<vmem>>, vector<1x128x128xbf16>
    %54 = vector.shape_cast %53 : vector<1x128x128xbf16> to vector<128x128xbf16>
    %cst_44 = arith.constant dense<0.000000e+00> : vector<256x128xf32>
    %55 = tpu.matmul %52, %54, %cst_44 {dimension_numbers = #tpu.dot_dimension_numbers<[1], [0], [0], [1], [0, 0, 1, 1], [], []>} : vector<256x128xbf16>, vector<128x128xbf16>, vector<256x128xf32> -> vector<256x128xf32>
    %56 = arith.addf %50, %55 : vector<256x128xf32>
    %57 = vector.extract_strided_slice %21 {offsets = [2, 0, 0], sizes = [16, 16, 128], strides = [1, 1, 1]} : vector<18x18x128xbf16> to vector<16x16x128xbf16>
    %58 = vector.shape_cast %57 : vector<16x16x128xbf16> to vector<256x128xbf16>
    %c6 = arith.constant 6 : index
    %c0_45 = arith.constant 0 : index
    %c0_46 = arith.constant 0 : index
    %59 = vector.load %arg4[%c6, %c0_45, %c0_46] : memref<9x128x128xbf16, #tpu.memory_space<vmem>>, vector<1x128x128xbf16>
    %60 = vector.shape_cast %59 : vector<1x128x128xbf16> to vector<128x128xbf16>
    %cst_47 = arith.constant dense<0.000000e+00> : vector<256x128xf32>
    %61 = tpu.matmul %58, %60, %cst_47 {dimension_numbers = #tpu.dot_dimension_numbers<[1], [0], [0], [1], [0, 0, 1, 1], [], []>} : vector<256x128xbf16>, vector<128x128xbf16>, vector<256x128xf32> -> vector<256x128xf32>
    %62 = arith.addf %56, %61 : vector<256x128xf32>
    %63 = vector.extract_strided_slice %21 {offsets = [2, 1, 0], sizes = [16, 16, 128], strides = [1, 1, 1]} : vector<18x18x128xbf16> to vector<16x16x128xbf16>
    %64 = vector.shape_cast %63 : vector<16x16x128xbf16> to vector<256x128xbf16>
    %c7 = arith.constant 7 : index
    %c0_48 = arith.constant 0 : index
    %c0_49 = arith.constant 0 : index
    %65 = vector.load %arg4[%c7, %c0_48, %c0_49] : memref<9x128x128xbf16, #tpu.memory_space<vmem>>, vector<1x128x128xbf16>
    %66 = vector.shape_cast %65 : vector<1x128x128xbf16> to vector<128x128xbf16>
    %cst_50 = arith.constant dense<0.000000e+00> : vector<256x128xf32>
    %67 = tpu.matmul %64, %66, %cst_50 {dimension_numbers = #tpu.dot_dimension_numbers<[1], [0], [0], [1], [0, 0, 1, 1], [], []>} : vector<256x128xbf16>, vector<128x128xbf16>, vector<256x128xf32> -> vector<256x128xf32>
    %68 = arith.addf %62, %67 : vector<256x128xf32>
    %69 = vector.extract_strided_slice %21 {offsets = [2, 2, 0], sizes = [16, 16, 128], strides = [1, 1, 1]} : vector<18x18x128xbf16> to vector<16x16x128xbf16>
    %70 = vector.shape_cast %69 : vector<16x16x128xbf16> to vector<256x128xbf16>
    %c8 = arith.constant 8 : index
    %c0_51 = arith.constant 0 : index
    %c0_52 = arith.constant 0 : index
    %71 = vector.load %arg4[%c8, %c0_51, %c0_52] : memref<9x128x128xbf16, #tpu.memory_space<vmem>>, vector<1x128x128xbf16>
    %72 = vector.shape_cast %71 : vector<1x128x128xbf16> to vector<128x128xbf16>
    %cst_53 = arith.constant dense<0.000000e+00> : vector<256x128xf32>
    %73 = tpu.matmul %70, %72, %cst_53 {dimension_numbers = #tpu.dot_dimension_numbers<[1], [0], [0], [1], [0, 0, 1, 1], [], []>} : vector<256x128xbf16>, vector<128x128xbf16>, vector<256x128xf32> -> vector<256x128xf32>
    %74 = arith.addf %68, %73 : vector<256x128xf32>
    %75 = vector.shape_cast %74 : vector<256x128xf32> to vector<16x16x128xf32>
    %76 = arith.truncf %75 : vector<16x16x128xf32> to vector<16x16x128xbf16>
    %c0_54 = arith.constant 0 : index
    %c0_55 = arith.constant 0 : index
    %c0_56 = arith.constant 0 : index
    %c0_57 = arith.constant 0 : index
    %77 = vector.load %arg5[%c0_54, %c0_55, %c0_56, %c0_57] : memref<1x16x16x128xbf16, #tpu.memory_space<vmem>>, vector<1x16x16x128xbf16>
    %78 = vector.shape_cast %77 : vector<1x16x16x128xbf16> to vector<16x16x128xbf16>
    %79 = vector.shape_cast %76 : vector<16x16x128xbf16> to vector<1x16x16x128xbf16>
    tpu.vector_store %arg5[%c0_54, %c0_55, %c0_56, %c0_57], %79 {strides = array<i32>} : memref<1x16x16x128xbf16, #tpu.memory_space<vmem>>, vector<1x16x16x128xbf16>,
    %cst_58 = arith.constant dense<0.000000e+00> : vector<128xf32>
    %80 = vector.multi_reduction <add>, %74, %cst_58 [0] : vector<256x128xf32> to vector<128xf32>
    %81 = vector.shape_cast %80 : vector<128xf32> to vector<1x128xf32>
    %c0_59 = arith.constant 0 : index
    %c0_60 = arith.constant 0 : index
    %c0_61 = arith.constant 0 : index
    %82 = vector.load %arg6[%c0_59, %c0_60, %c0_61] : memref<1x2x128xf32, #tpu.memory_space<vmem>>, vector<1x1x128xf32>
    %83 = vector.shape_cast %82 : vector<1x1x128xf32> to vector<1x128xf32>
    %84 = vector.shape_cast %81 : vector<1x128xf32> to vector<1x1x128xf32>
    tpu.vector_store %arg6[%c0_59, %c0_60, %c0_61], %84 {strides = array<i32>} : memref<1x2x128xf32, #tpu.memory_space<vmem>>, vector<1x1x128xf32>,
    %85 = arith.mulf %74, %74 : vector<256x128xf32>
    %cst_62 = arith.constant dense<0.000000e+00> : vector<128xf32>
    %86 = vector.multi_reduction <add>, %85, %cst_62 [0] : vector<256x128xf32> to vector<128xf32>
    %87 = vector.shape_cast %86 : vector<128xf32> to vector<1x128xf32>
    %c0_63 = arith.constant 0 : index
    %c1_64 = arith.constant 1 : index
    %c0_65 = arith.constant 0 : index
    %88 = vector.load %arg6[%c0_63, %c1_64, %c0_65] : memref<1x2x128xf32, #tpu.memory_space<vmem>>, vector<1x1x128xf32>
    %89 = vector.shape_cast %88 : vector<1x1x128xf32> to vector<1x128xf32>
    %90 = vector.shape_cast %87 : vector<1x128xf32> to vector<1x1x128xf32>
    tpu.vector_store %arg6[%c0_63, %c1_64, %c0_65], %90 {strides = array<i32>} : memref<1x2x128xf32, #tpu.memory_space<vmem>>, vector<1x1x128xf32>,
    return
  }
  func.func @transform_0(%arg0: i32) -> (i32, i32, i32, i32) {
    %c0_i32 = arith.constant 0 : i32
    %c0_i32_0 = arith.constant 0 : i32
    %c0_i32_1 = arith.constant 0 : i32
    %c0_i32_2 = arith.constant 0 : i32
    return %arg0, %c0_i32, %c0_i32_0, %c0_i32_1 : i32, i32, i32, i32
  }
  func.func @transform_1(%arg0: i32) -> (i32, i32) {
    %c0_i32 = arith.constant 0 : i32
    %c0_i32_0 = arith.constant 0 : i32
    %c0_i32_1 = arith.constant 0 : i32
    return %c0_i32, %c0_i32_0 : i32, i32
  }
  func.func @transform_2(%arg0: i32) -> (i32, i32) {
    %c0_i32 = arith.constant 0 : i32
    %c0_i32_0 = arith.constant 0 : i32
    %c0_i32_1 = arith.constant 0 : i32
    return %c0_i32, %c0_i32_0 : i32, i32
  }
  func.func @transform_3(%arg0: i32) -> (i32, i32, i32) {
    %c0_i32 = arith.constant 0 : i32
    %c0_i32_0 = arith.constant 0 : i32
    %c0_i32_1 = arith.constant 0 : i32
    %c0_i32_2 = arith.constant 0 : i32
    return %c0_i32, %c0_i32_0, %c0_i32_1 : i32, i32, i32
  }
  func.func @transform_4(%arg0: i32) -> (i32, i32, i32, i32) {
    %c0_i32 = arith.constant 0 : i32
    %c0_i32_0 = arith.constant 0 : i32
    %c0_i32_1 = arith.constant 0 : i32
    %c0_i32_2 = arith.constant 0 : i32
    return %arg0, %c0_i32, %c0_i32_0, %c0_i32_1 : i32, i32, i32, i32
  }
  func.func @transform_5(%arg0: i32) -> (i32, i32, i32) {
    %c0_i32 = arith.constant 0 : i32
    %c0_i32_0 = arith.constant 0 : i32
    %c0_i32_1 = arith.constant 0 : i32
    return %arg0, %c0_i32, %c0_i32_0 : i32, i32, i32
  }
}

module attributes {stable_mosaic.version = 11 : i64} {
  func.func @_bn2_residual_kernel(%arg0: i32, %arg1: memref<1x16x16x128xbf16, #tpu.memory_space<vmem>>, %arg2: memref<1x18x18x128xf32, #tpu.memory_space<vmem>>, %arg3: memref<1x128xf32, #tpu.memory_space<vmem>>, %arg4: memref<1x128xf32, #tpu.memory_space<vmem>>, %arg5: memref<1x16x16x128xf32, #tpu.memory_space<vmem>>) attributes {dimension_semantics = [#tpu.dimension_semantics<parallel>], iteration_bounds = array<i64: 2>, scalar_prefetch = 0 : i64, scratch_operands = 0 : i64, tpu.core_type = #tpu.core_type<tc>, window_params = [{transform_indices = @transform_0, window_bounds = array<i64: 1, 16, 16, 128>}, {transform_indices = @transform_1, window_bounds = array<i64: 1, 18, 18, 128>}, {pipeline_mode = #tpu.pipeline_mode<synchronous>, transform_indices = @transform_2, window_bounds = array<i64: 1, 128>}, {pipeline_mode = #tpu.pipeline_mode<synchronous>, transform_indices = @transform_3, window_bounds = array<i64: 1, 128>}, {transform_indices = @transform_4, window_bounds = array<i64: 1, 16, 16, 128>}]} {
    %c0 = arith.constant 0 : index
    %c1 = arith.constant 1 : index
    %c1_0 = arith.constant 1 : index
    %c0_1 = arith.constant 0 : index
    %0 = vector.load %arg2[%c0, %c1, %c1_0, %c0_1] : memref<1x18x18x128xf32, #tpu.memory_space<vmem>>, vector<1x16x16x128xf32>
    %1 = vector.shape_cast %0 : vector<1x16x16x128xf32> to vector<16x16x128xf32>
    %c0_2 = arith.constant 0 : index
    %c0_3 = arith.constant 0 : index
    %c0_4 = arith.constant 0 : index
    %c0_5 = arith.constant 0 : index
    %2 = vector.load %arg1[%c0_2, %c0_3, %c0_4, %c0_5] : memref<1x16x16x128xbf16, #tpu.memory_space<vmem>>, vector<1x16x16x128xbf16>
    %3 = vector.shape_cast %2 : vector<1x16x16x128xbf16> to vector<16x16x128xbf16>
    %4 = arith.extf %3 : vector<16x16x128xbf16> to vector<16x16x128xf32>
    %c0_6 = arith.constant 0 : index
    %c0_7 = arith.constant 0 : index
    %5 = vector.load %arg3[%c0_6, %c0_7] : memref<1x128xf32, #tpu.memory_space<vmem>>, vector<1x128xf32>
    %6 = vector.shape_cast %5 : vector<1x128xf32> to vector<1x1x128xf32>
    %7 = vector.broadcast %6 : vector<1x1x128xf32> to vector<16x16x128xf32>
    %8 = arith.mulf %4, %7 : vector<16x16x128xf32>
    %c0_8 = arith.constant 0 : index
    %c0_9 = arith.constant 0 : index
    %9 = vector.load %arg4[%c0_8, %c0_9] : memref<1x128xf32, #tpu.memory_space<vmem>>, vector<1x128xf32>
    %10 = vector.shape_cast %9 : vector<1x128xf32> to vector<1x1x128xf32>
    %11 = vector.broadcast %10 : vector<1x1x128xf32> to vector<16x16x128xf32>
    %12 = arith.addf %8, %11 : vector<16x16x128xf32>
    %13 = arith.addf %12, %1 : vector<16x16x128xf32>
    %cst = arith.constant 0.000000e+00 : f32
    %14 = vector.broadcast %cst : f32 to vector<16x16x128xf32>
    %15 = arith.maximumf %13, %14 : vector<16x16x128xf32>
    %c0_10 = arith.constant 0 : index
    %c0_11 = arith.constant 0 : index
    %c0_12 = arith.constant 0 : index
    %c0_13 = arith.constant 0 : index
    %16 = vector.load %arg5[%c0_10, %c0_11, %c0_12, %c0_13] : memref<1x16x16x128xf32, #tpu.memory_space<vmem>>, vector<1x16x16x128xf32>
    %17 = vector.shape_cast %16 : vector<1x16x16x128xf32> to vector<16x16x128xf32>
    %18 = vector.shape_cast %15 : vector<16x16x128xf32> to vector<1x16x16x128xf32>
    tpu.vector_store %arg5[%c0_10, %c0_11, %c0_12, %c0_13], %18 {strides = array<i32>} : memref<1x16x16x128xf32, #tpu.memory_space<vmem>>, vector<1x16x16x128xf32>,
    return
  }
  func.func @transform_0(%arg0: i32) -> (i32, i32, i32, i32) {
    %c0_i32 = arith.constant 0 : i32
    %c0_i32_0 = arith.constant 0 : i32
    %c0_i32_1 = arith.constant 0 : i32
    %c0_i32_2 = arith.constant 0 : i32
    return %arg0, %c0_i32, %c0_i32_0, %c0_i32_1 : i32, i32, i32, i32
  }
  func.func @transform_1(%arg0: i32) -> (i32, i32, i32, i32) {
    %c0_i32 = arith.constant 0 : i32
    %c0_i32_0 = arith.constant 0 : i32
    %c0_i32_1 = arith.constant 0 : i32
    %c0_i32_2 = arith.constant 0 : i32
    return %arg0, %c0_i32, %c0_i32_0, %c0_i32_1 : i32, i32, i32, i32
  }
  func.func @transform_2(%arg0: i32) -> (i32, i32) {
    %c0_i32 = arith.constant 0 : i32
    %c0_i32_0 = arith.constant 0 : i32
    %c0_i32_1 = arith.constant 0 : i32
    return %c0_i32, %c0_i32_0 : i32, i32
  }
  func.func @transform_3(%arg0: i32) -> (i32, i32) {
    %c0_i32 = arith.constant 0 : i32
    %c0_i32_0 = arith.constant 0 : i32
    %c0_i32_1 = arith.constant 0 : i32
    return %c0_i32, %c0_i32_0 : i32, i32
  }
  func.func @transform_4(%arg0: i32) -> (i32, i32, i32, i32) {
    %c0_i32 = arith.constant 0 : i32
    %c0_i32_0 = arith.constant 0 : i32
    %c0_i32_1 = arith.constant 0 : i32
    %c0_i32_2 = arith.constant 0 : i32
    return %arg0, %c0_i32, %c0_i32_0, %c0_i32_1 : i32, i32, i32, i32
  }
}

</mosaic_0001>

<bundles_post_ra>
// kernel: residual_block_pallas.5
= control target key start
LH: loop header
LB: loop body
LE: loop exit
PB: predicated region body
PF: predicated region fallthrough
CT: control target
= control target key end

     0   :  { %s725_s15 = smov 0   ;;  %s910_s0 = inlined_call_operand.vmem [shape: bf16[2,16,16,128], index: 0, kind: input, shape index: {}]   ;;  %s911_s1 = inlined_call_operand.vmem [shape: f32[2,18,18,128], index: 1, kind: input, shape index: {}]   ;;  %s912_s2 = inlined_call_operand.vmem [shape: f32[1,128], index: 2, kind: input, shape index: {}]   ;;  %s913_s3 = inlined_call_operand.vmem [shape: f32[1,128], index: 3, kind: input, shape index: {}]   ;;  %s914_s4 = inlined_call_operand.vmem [shape: f32[2,16,16,128], index: 4, kind: output, shape index: {}]  }
   0x1 LB: > { %s556_s16 = sadd.s32 4294967295, %s698_s15   ;;  %p560_p0 = scmp.ge.s32.totalorder %s698_s15, 1  ;;  %s698_s15 = sphi %s725_s15, %s14_s15  }
   0x2   : > { %p172_p1 = scmp.lt.s32.totalorder %s698_s15, 3 }
   0x4   : > { %p173_p2 = pnand %p560_p0, %p172_p1 }
   0x5   : > { %p203_p3 = scmp.lt.s32.totalorder (!%p173_p2), %s556_s16, 1  ;;  %v745_v0 = vld [vmem:[%s912_s2] ss:$0 sm:$0xff] (!%p173_p2) }
   0x6   : > { %176 = sbr.rel (%p173_p2) target bundleno = 61 (0x3d), region = 36  ;;  %v758_v8 = vld [vmem:[%s913_s3] ss:$0 sm:$0xff] (!%p173_p2) }
   0xd   : > { %s916_s16 = smov (!%p203_p3, %s556_s16), 1 }
   0xe   : > { %s602_s17 = sshll.u32 %s916_s16, 7  ;;  %s683_s18 = smul.u32 432, %s916_s16 }
   0xf   : > { %s740_s21 = scalar_lea.vmem %s910_s0, %s602_s17  ;;  %s603_s29 = sshll.u32 %s916_s16, 8 }
  0x10   : > { %s750_s26 = scalar_lea.vmem %s911_s1, %s683_s18  ;;  %v605_v1 = vld [vmem:[%s740_s21] sm:$0xff]   ;;  %v668_v2 = vld [vmem:[%s740_s21 + $0x8] sm:$0xff]   ;;  %v669_v3 = vld [vmem:[%s740_s21 + $0x10] sm:$0xff]   ;;  %s787_s6 = scalar_lea.vmem %s914_s4, %s603_s29 }
  0x11   : > { %v606_v4 = vunpack.c.l.bf16 %v605_v1  ;;  %v607_v5 = vunpack.c.h.bf16 %v605_v1  ;;  %v610_v6 = vunpack.c.l.bf16 %v668_v2  ;;  %v611_v7 = vunpack.c.h.bf16 %v668_v2  ;;  %v566_v11 = vld [vmem:[%s750_s26 + $0x19] sm:$0xff]  ;;  %v567_v17 = vld [vmem:[%s750_s26 + $0x21] sm:$0xff]  ;;  %v568_v18 = vld [vmem:[%s750_s26 + $0x31] sm:$0xff] }
  0x12   : > { %v614_v9 = vunpack.c.l.bf16 %v669_v3  ;;  %v615_v10 = vunpack.c.h.bf16 %v669_v3  ;;  %v670_v16 = vld [vmem:[%s740_s21 + $0x18] sm:$0xff]   ;;  %v570_v28 = vld [vmem:[%s750_s26 + $0x49] sm:$0xff]  ;;  %v572_v38 = vld [vmem:[%s750_s26 + $0x61] sm:$0xff] }
  0x13   : > { %v322_v12 = vmul.f32 %v606_v4, %v745_v0  ;;  %v323_v13 = vmul.f32 %v607_v5, %v745_v0  ;;  %v324_v14 = vmul.f32 %v610_v6, %v745_v0  ;;  %v325_v15 = vmul.f32 %v611_v7, %v745_v0  ;;  %v569_v19 = vld [vmem:[%s750_s26 + $0x39] sm:$0xff]  ;;  %v571_v29 = vld [vmem:[%s750_s26 + $0x51] sm:$0xff]  ;;  %v573_v39 = vld [vmem:[%s750_s26 + $0x69] sm:$0xff] }
  0x14   : > { %v326_v20 = vmul.f32 %v614_v9, %v745_v0  ;;  %v327_v21 = vmul.f32 %v615_v10, %v745_v0  ;;  %v618_v22 = vunpack.c.l.bf16 %v670_v16  ;;  %v619_v23 = vunpack.c.h.bf16 %v670_v16  ;;  %v671_v44 = vld [vmem:[%s740_s21 + $0x20] sm:$0xff]   ;;  %v672_v45 = vld [vmem:[%s740_s21 + $0x28] sm:$0xff]   ;;  %v673_v50 = vld [vmem:[%s740_s21 + $0x30] sm:$0xff]  }
  0x15   : > { %v361_v24 = vadd.f32 %v758_v8, %v322_v12  ;;  %v362_v25 = vadd.f32 %v758_v8, %v323_v13  ;;  %v363_v26 = vadd.f32 %v758_v8, %v324_v14  ;;  %v364_v27 = vadd.f32 %v758_v8, %v325_v15  ;;  %v674_v59 = vld [vmem:[%s740_s21 + $0x38] sm:$0xff]   ;;  %v575_v6 = vld [vmem:[%s750_s26 + $0x81] sm:$0xff] }
  0x16   : > { %v365_v30 = vadd.f32 %v758_v8, %v326_v20  ;;  %v366_v31 = vadd.f32 %v758_v8, %v327_v21  ;;  %v328_v32 = vmul.f32 %v618_v22, %v745_v0  ;;  %v329_v33 = vmul.f32 %v619_v23, %v745_v0  ;;  %v574_v1 = vld [vmem:[%s750_s26 + $0x79] sm:$0xff]  ;;  %v576_v7 = vld [vmem:[%s750_s26 + $0x91] sm:$0xff] }
  0x17   : > { %v393_v34 = vadd.f32 %v566_v11, %v361_v24  ;;  %v394_v35 = vadd.f32 %v567_v17, %v362_v25  ;;  %v395_v36 = vadd.f32 %v568_v18, %v363_v26  ;;  %v396_v37 = vadd.f32 %v569_v19, %v364_v27  ;;  %v577_v9 = vld [vmem:[%s750_s26 + $0x99] sm:$0xff]  ;;  %v578_v18 = vld [vmem:[%s750_s26 + $0xa9] sm:$0xff]  ;;  %v579_v19 = vld [vmem:[%s750_s26 + $0xb1] sm:$0xff] }
  0x18   : > { %v397_v40 = vadd.f32 %v570_v28, %v365_v30  ;;  %v398_v41 = vadd.f32 %v571_v29, %v366_v31  ;;  %v367_v42 = vadd.f32 %v758_v8, %v328_v32  ;;  %v368_v43 = vadd.f32 %v758_v8, %v329_v33  ;;  %v580_v28 = vld [vmem:[%s750_s26 + $0xc1] sm:$0xff]  ;;  %v581_v29 = vld [vmem:[%s750_s26 + $0xc9] sm:$0xff] }
  0x19   : > { %v425_v46 = vmax.f32 %v393_v34, 0.0  ;;  %v426_v47 = vmax.f32 %v394_v35, 0.0  ;;  %v427_v48 = vmax.f32 %v395_v36, 0.0  ;;  %v428_v49 = vmax.f32 %v396_v37, 0.0  ;;  %v675_v34 = vld [vmem:[%s740_s21 + $0x40] sm:$0xff]   ;;  %v676_v35 = vld [vmem:[%s740_s21 + $0x48] sm:$0xff]  }
  0x1a   : > { %v429_v51 = vmax.f32 %v397_v40, 0.0  ;;  %v430_v52 = vmax.f32 %v398_v41, 0.0  ;;  %v399_v53 = vadd.f32 %v572_v38, %v367_v42  ;;  %v400_v54 = vadd.f32 %v573_v39, %v368_v43  ;;  %v677_v40 = vld [vmem:[%s740_s21 + $0x50] sm:$0xff]  }
  0x1b   : > { %457 = vst [vmem:[%s787_s6] sm:$0xff] %v425_v46  ;;  %458 = vst [vmem:[%s787_s6 + $0x8] sm:$0xff] %v426_v47  ;;  %v622_v55 = vunpack.c.l.bf16 %v671_v44  ;;  %v623_v56 = vunpack.c.h.bf16 %v671_v44  ;;  %v626_v57 = vunpack.c.l.bf16 %v672_v45  ;;  %v627_v58 = vunpack.c.h.bf16 %v672_v45 }
  0x1c   : > { %459 = vst [vmem:[%s787_s6 + $0x10] sm:$0xff] %v427_v48  ;;  %460 = vst [vmem:[%s787_s6 + $0x18] sm:$0xff] %v428_v49  ;;  %v431_v60 = vmax.f32 %v399_v53, 0.0  ;;  %v432_v61 = vmax.f32 %v400_v54, 0.0  ;;  %v630_v62 = vunpack.c.l.bf16 %v673_v50  ;;  %v631_v63 = vunpack.c.h.bf16 %v673_v50  ;;  %v678_v49 = vld [vmem:[%s740_s21 + $0x58] sm:$0xff]  }
  0x1d   : > { %461 = vst [vmem:[%s787_s6 + $0x20] sm:$0xff] %v429_v51  ;;  %462 = vst [vmem:[%s787_s6 + $0x28] sm:$0xff] %v430_v52  ;;  %v330_v2 = vmul.f32 %v622_v55, %v745_v0  ;;  %v331_v3 = vmul.f32 %v623_v56, %v745_v0  ;;  %v332_v4 = vmul.f32 %v626_v57, %v745_v0  ;;  %v634_v12 = vunpack.c.l.bf16 %v674_v59  ;;  %v582_v54 = vld [vmem:[%s750_s26 + $0xd9] sm:$0xff] }
  0x1e   : > { %v333_v5 = vmul.f32 %v627_v58, %v745_v0  ;;  %463 = vst [vmem:[%s787_s6 + $0x30] sm:$0xff] %v431_v60  ;;  %464 = vst [vmem:[%s787_s6 + $0x38] sm:$0xff] %v432_v61  ;;  %v334_v10 = vmul.f32 %v630_v62, %v745_v0  ;;  %v335_v11 = vmul.f32 %v631_v63, %v745_v0  ;;  %v635_v13 = vunpack.c.h.bf16 %v674_v59  ;;  %v583_v59 = vld [vmem:[%s750_s26 + $0xe1] sm:$0xff]  ;;  %v584_v60 = vld [vmem:[%s750_s26 + $0xf1] sm:$0xff] }
  0x1f   : > { %v369_v14 = vadd.f32 %v758_v8, %v330_v2  ;;  %v370_v15 = vadd.f32 %v758_v8, %v331_v3  ;;  %v371_v16 = vadd.f32 %v758_v8, %v332_v4  ;;  %v336_v22 = vmul.f32 %v634_v12, %v745_v0  ;;  %v585_v61 = vld [vmem:[%s750_s26 + $0xf9] sm:$0xff] }
  0x20   : > { %v372_v17 = vadd.f32 %v758_v8, %v333_v5  ;;  %v373_v20 = vadd.f32 %v758_v8, %v334_v10  ;;  %v374_v21 = vadd.f32 %v758_v8, %v335_v11  ;;  %v337_v23 = vmul.f32 %v635_v13, %v745_v0 }
  0x21   : > { %v401_v24 = vadd.f32 %v574_v1, %v369_v14  ;;  %v402_v25 = vadd.f32 %v575_v6, %v370_v15  ;;  %v403_v26 = vadd.f32 %v576_v7, %v371_v16  ;;  %v375_v32 = vadd.f32 %v758_v8, %v336_v22  ;;  %v586_v7 = vld [vmem:[%s750_s26 + $0x109] sm:$0xff] }
  0x22   : > { %v404_v27 = vadd.f32 %v577_v9, %v372_v17  ;;  %v405_v30 = vadd.f32 %v578_v18, %v373_v20  ;;  %v406_v31 = vadd.f32 %v579_v19, %v374_v21  ;;  %v376_v33 = vadd.f32 %v758_v8, %v337_v23  ;;  %v587_v9 = vld [vmem:[%s750_s26 + $0x111] sm:$0xff]  ;;  %v588_v18 = vld [vmem:[%s750_s26 + $0x121] sm:$0xff]  ;;  %v589_v19 = vld [vmem:[%s750_s26 + $0x129] sm:$0xff] }
  0x23   : > { %v433_v36 = vmax.f32 %v401_v24, 0.0  ;;  %v434_v37 = vmax.f32 %v402_v25, 0.0  ;;  %v435_v38 = vmax.f32 %v403_v26, 0.0  ;;  %v407_v43 = vadd.f32 %v580_v28, %v375_v32  ;;  %v679_v24 = vld [vmem:[%s740_s21 + $0x60] sm:$0xff]   ;;  %v680_v25 = vld [vmem:[%s740_s21 + $0x68] sm:$0xff]  }
  0x24   : > { %v436_v39 = vmax.f32 %v404_v27, 0.0  ;;  %v437_v41 = vmax.f32 %v405_v30, 0.0  ;;  %v438_v42 = vmax.f32 %v406_v31, 0.0  ;;  %v408_v44 = vadd.f32 %v581_v29, %v376_v33  ;;  %v681_v30 = vld [vmem:[%s740_s21 + $0x70] sm:$0xff]  }
  0x25   : > { %465 = vst [vmem:[%s787_s6 + $0x40] sm:$0xff] %v433_v36  ;;  %466 = vst [vmem:[%s787_s6 + $0x48] sm:$0xff] %v434_v37  ;;  %v638_v45 = vunpack.c.l.bf16 %v675_v34  ;;  %v639_v46 = vunpack.c.h.bf16 %v675_v34  ;;  %v642_v47 = vunpack.c.l.bf16 %v676_v35  ;;  %v643_v48 = vunpack.c.h.bf16 %v676_v35 }
  0x26   : > { %467 = vst [vmem:[%s787_s6 + $0x50] sm:$0xff] %v435_v38  ;;  %468 = vst [vmem:[%s787_s6 + $0x58] sm:$0xff] %v436_v39  ;;  %v439_v50 = vmax.f32 %v407_v43, 0.0  ;;  %v440_v51 = vmax.f32 %v408_v44, 0.0  ;;  %v646_v52 = vunpack.c.l.bf16 %v677_v40  ;;  %v647_v53 = vunpack.c.h.bf16 %v677_v40  ;;  %v682_v39 = vld [vmem:[%s740_s21 + $0x78] sm:$0xff]  }
  0x27   : > { %469 = vst [vmem:[%s787_s6 + $0x60] sm:$0xff] %v437_v41  ;;  %470 = vst [vmem:[%s787_s6 + $0x68] sm:$0xff] %v438_v42  ;;  %v338_v55 = vmul.f32 %v638_v45, %v745_v0  ;;  %v339_v56 = vmul.f32 %v639_v46, %v745_v0  ;;  %v340_v57 = vmul.f32 %v642_v47, %v745_v0  ;;  %v650_v1 = vunpack.c.l.bf16 %v678_v49  ;;  %v590_v44 = vld [vmem:[%s750_s26 + $0x139] sm:$0xff] }
  0x28   : > { %v341_v58 = vmul.f32 %v643_v48, %v745_v0  ;;  %471 = vst [vmem:[%s787_s6 + $0x70] sm:$0xff] %v439_v50  ;;  %472 = vst [vmem:[%s787_s6 + $0x78] sm:$0xff] %v440_v51  ;;  %v342_v62 = vmul.f32 %v646_v52, %v745_v0  ;;  %v343_v63 = vmul.f32 %v647_v53, %v745_v0  ;;  %v651_v2 = vunpack.c.h.bf16 %v678_v49  ;;  %v591_v49 = vld [vmem:[%s750_s26 + $0x141] sm:$0xff]  ;;  %v592_v50 = vld [vmem:[%s750_s26 + $0x151] sm:$0xff] }
  0x29   : > { %v377_v3 = vadd.f32 %v758_v8, %v338_v55  ;;  %v378_v4 = vadd.f32 %v758_v8, %v339_v56  ;;  %v379_v5 = vadd.f32 %v758_v8, %v340_v57  ;;  %v344_v12 = vmul.f32 %v650_v1, %v745_v0  ;;  %v593_v51 = vld [vmem:[%s750_s26 + $0x159] sm:$0xff] }
  0x2a   : > { %v380_v6 = vadd.f32 %v758_v8, %v341_v58  ;;  %v381_v10 = vadd.f32 %v758_v8, %v342_v62  ;;  %v382_v11 = vadd.f32 %v758_v8, %v343_v63  ;;  %v345_v13 = vmul.f32 %v651_v2, %v745_v0 }
  0x2b   : > { %v409_v14 = vadd.f32 %v582_v54, %v377_v3  ;;  %v410_v15 = vadd.f32 %v583_v59, %v378_v4  ;;  %v411_v16 = vadd.f32 %v584_v60, %v379_v5  ;;  %v383_v22 = vadd.f32 %v758_v8, %v344_v12  ;;  %v594_v60 = vld [vmem:[%s750_s26 + $0x169] sm:$0xff] }
  0x2c   : > { %v412_v17 = vadd.f32 %v585_v61, %v380_v6  ;;  %v413_v20 = vadd.f32 %v586_v7, %v381_v10  ;;  %v414_v21 = vadd.f32 %v587_v9, %v382_v11  ;;  %v384_v23 = vadd.f32 %v758_v8, %v345_v13  ;;  %v595_v61 = vld [vmem:[%s750_s26 + $0x171] sm:$0xff]  ;;  %v596_v7 = vld [vmem:[%s750_s26 + $0x181] sm:$0xff]  ;;  %v597_v9 = vld [vmem:[%s750_s26 + $0x189] sm:$0xff] }
  0x2d   : > { %v441_v26 = vmax.f32 %v409_v14, 0.0  ;;  %v442_v27 = vmax.f32 %v410_v15, 0.0  ;;  %v443_v28 = vmax.f32 %v411_v16, 0.0  ;;  %v415_v33 = vadd.f32 %v588_v18, %v383_v22 }
  0x2e   : > { %v444_v29 = vmax.f32 %v412_v17, 0.0  ;;  %v445_v31 = vmax.f32 %v413_v20, 0.0  ;;  %v446_v32 = vmax.f32 %v414_v21, 0.0  ;;  %v416_v34 = vadd.f32 %v589_v19, %v384_v23 }
  0x2f   : > { %473 = vst [vmem:[%s787_s6 + $0x80] sm:$0xff] %v441_v26  ;;  %474 = vst [vmem:[%s787_s6 + $0x88] sm:$0xff] %v442_v27  ;;  %v654_v35 = vunpack.c.l.bf16 %v679_v24  ;;  %v655_v36 = vunpack.c.h.bf16 %v679_v24  ;;  %v658_v37 = vunpack.c.l.bf16 %v680_v25  ;;  %v659_v38 = vunpack.c.h.bf16 %v680_v25 }
  0x30   : > { %475 = vst [vmem:[%s787_s6 + $0x90] sm:$0xff] %v443_v28  ;;  %476 = vst [vmem:[%s787_s6 + $0x98] sm:$0xff] %v444_v29  ;;  %v447_v40 = vmax.f32 %v415_v33, 0.0  ;;  %v448_v41 = vmax.f32 %v416_v34, 0.0  ;;  %v662_v42 = vunpack.c.l.bf16 %v681_v30  ;;  %v663_v43 = vunpack.c.h.bf16 %v681_v30 }
  0x31   : > { %477 = vst [vmem:[%s787_s6 + $0xa0] sm:$0xff] %v445_v31  ;;  %478 = vst [vmem:[%s787_s6 + $0xa8] sm:$0xff] %v446_v32  ;;  %v346_v45 = vmul.f32 %v654_v35, %v745_v0  ;;  %v347_v46 = vmul.f32 %v655_v36, %v745_v0  ;;  %v348_v47 = vmul.f32 %v658_v37, %v745_v0  ;;  %v666_v54 = vunpack.c.l.bf16 %v682_v39 }
  0x32   : > { %v349_v48 = vmul.f32 %v659_v38, %v745_v0  ;;  %479 = vst [vmem:[%s787_s6 + $0xb0] sm:$0xff] %v447_v40  ;;  %480 = vst [vmem:[%s787_s6 + $0xb8] sm:$0xff] %v448_v41  ;;  %v350_v52 = vmul.f32 %v662_v42, %v745_v0  ;;  %v351_v53 = vmul.f32 %v663_v43, %v745_v0  ;;  %v667_v55 = vunpack.c.h.bf16 %v682_v39 }
  0x33   : > { %v385_v56 = vadd.f32 %v758_v8, %v346_v45  ;;  %v386_v57 = vadd.f32 %v758_v8, %v347_v46  ;;  %v387_v58 = vadd.f32 %v758_v8, %v348_v47  ;;  %v352_v1 = vmul.f32 %v666_v54, %v745_v0 }
  0x34   : > { %v388_v59 = vadd.f32 %v758_v8, %v349_v48  ;;  %v389_v62 = vadd.f32 %v758_v8, %v350_v52  ;;  %v390_v63 = vadd.f32 %v758_v8, %v351_v53  ;;  %v353_v2 = vmul.f32 %v667_v55, %v745_v0 }
  0x35   : > { %v417_v3 = vadd.f32 %v590_v44, %v385_v56  ;;  %v418_v4 = vadd.f32 %v591_v49, %v386_v57  ;;  %v419_v5 = vadd.f32 %v592_v50, %v387_v58  ;;  %v391_v12 = vadd.f32 %v758_v8, %v352_v1 }
  0x36   : > { %v420_v6 = vadd.f32 %v593_v51, %v388_v59  ;;  %v421_v10 = vadd.f32 %v594_v60, %v389_v62  ;;  %v422_v11 = vadd.f32 %v595_v61, %v390_v63  ;;  %v392_v13 = vadd.f32 %v758_v8, %v353_v2 }
  0x37   : > { %v449_v14 = vmax.f32 %v417_v3, 0.0  ;;  %v450_v0 = vmax.f32 %v418_v4, 0.0  ;;  %v451_v15 = vmax.f32 %v419_v5, 0.0  ;;  %v423_v19 = vadd.f32 %v596_v7, %v391_v12 }
  0x38   : > { %v452_v16 = vmax.f32 %v420_v6, 0.0  ;;  %v453_v17 = vmax.f32 %v421_v10, 0.0  ;;  %v454_v18 = vmax.f32 %v422_v11, 0.0  ;;  %v424_v20 = vadd.f32 %v597_v9, %v392_v13 }
  0x39   : > { %481 = vst [vmem:[%s787_s6 + $0xc0] sm:$0xff] %v449_v14  ;;  %482 = vst [vmem:[%s787_s6 + $0xc8] sm:$0xff] %v450_v0  ;;  %v455_v21 = vmax.f32 %v423_v19, 0.0 }
  0x3a   : > { %483 = vst [vmem:[%s787_s6 + $0xd0] sm:$0xff] %v451_v15  ;;  %484 = vst [vmem:[%s787_s6 + $0xd8] sm:$0xff] %v452_v16  ;;  %v456_v22 = vmax.f32 %v424_v20, 0.0 }
  0x3b   : > { %485 = vst [vmem:[%s787_s6 + $0xe0] sm:$0xff] %v453_v17  ;;  %486 = vst [vmem:[%s787_s6 + $0xe8] sm:$0xff] %v454_v18 }
  0x3c   : > { %487 = vst [vmem:[%s787_s6 + $0xf0] sm:$0xff] %v455_v21  ;;  %488 = vst [vmem:[%s787_s6 + $0xf8] sm:$0xff] %v456_v22 }
  0x3d PF: > { %s14_s15 = sadd.s32 1, %s698_s15  }
  0x3e   : > { %p11_p4 = scmp.ge.s32.totalorder %s14_s15, 4  }
  0x40   :  { %13 = sbr.rel (!%p11_p4) target bundleno = 1 (0x1), region = 70 }

// kernel: residual_block_pallas.3
= control target key start
LH: loop header
LB: loop body
LE: loop exit
PB: predicated region body
PF: predicated region fallthrough
CT: control target
= control target key end

     0   :  { %s4636_s12 = smov 0   ;;  %s5389_s0 = inlined_call_operand.vmem [shape: f32[2,18,18,128], index: 0, kind: input, shape index: {}]   ;;  %s5390_s1 = inlined_call_operand.vmem [shape: bf16[9,128,128], index: 1, kind: input, shape index: {}]   ;;  %s5391_s2 = inlined_call_operand.vmem [shape: bf16[2,16,16,128], index: 2, kind: output, shape index: {0}]   ;;  %s5392_s3 = inlined_call_operand.vmem [shape: f32[2,2,128], index: 3, kind: output, shape index: {1}]  }
   0x1 LB: > { %s3228_s13 = sadd.s32 4294967295, %s4614_s12   ;;  %p3232_p0 = scmp.ge.s32.totalorder %s4614_s12, 1  ;;  %s4614_s12 = sphi %s4636_s12, %s14_s12  }
   0x2   : > { %p140_p1 = scmp.lt.s32.totalorder %s4614_s12, 3 }
   0x4   : > { %p141_p2 = pnand %p3232_p0, %p140_p1 }
   0x5   : > { %v4528_v0 = vld [vmem:[%s5390_s1 + $0x40] sm:$0xff] (!%p141_p2)   ;;  %p168_p3 = scmp.lt.s32.totalorder (!%p141_p2), %s3228_s13, 1  ;;  %v4530_v2 = vld [vmem:[%s5390_s1 + $0x48] sm:$0xff] (!%p141_p2)   ;;  %v4532_v4 = vld [vmem:[%s5390_s1 + $0x50] sm:$0xff] (!%p141_p2)   ;;  %vm289_vm0 = vsmask.f32 (!%p141_p2), 7424 }
   0x6   : > { %144 = sbr.rel (%p141_p2) target bundleno = 557 (0x22d), region = 28  ;;  %v4529_v1 = vld [vmem:[%s5390_s1 + $0x100] sm:$0xff] (!%p141_p2)   ;;  %3815 = vmatprep.subr.bf16.mxu1 (!%p141_p2), %v4528_v0  ;;  %v4531_v3 = vld [vmem:[%s5390_s1 + $0x108] sm:$0xff] (!%p141_p2)   ;;  %v4533_v5 = vld [vmem:[%s5390_s1 + $0x110] sm:$0xff] (!%p141_p2)   ;;  %vm965_vm1 = vcmask (!%p141_p2), 1046528  }
   0x7   : > { %4007 = vmatprep.subr.bf16.mxu0 (!%p141_p2), %v4529_v1  ;;  %3816 = vmatpush3.bf16.msra.mxu1 (!%p141_p2), %v4528_v0  ;;  %v4534_v6 = vld [vmem:[%s5390_s1 + $0x58] sm:$0xff] (!%p141_p2)   ;;  %v4536_v8 = vld [vmem:[%s5390_s1 + $0x60] sm:$0xff] (!%p141_p2)   ;;  %v4538_v10 = vld [vmem:[%s5390_s1 + $0x68] sm:$0xff] (!%p141_p2)  }
   0x8   : > { %4008 = vmatpush3.bf16.msra.mxu0 (!%p141_p2), %v4529_v1  ;;  %3817 = vmatprep.subr.bf16.mxu1 (!%p141_p2), %v4530_v2  ;;  %v4535_v7 = vld [vmem:[%s5390_s1 + $0x118] sm:$0xff] (!%p141_p2)   ;;  %v4537_v9 = vld [vmem:[%s5390_s1 + $0x120] sm:$0xff] (!%p141_p2)   ;;  %v4539_v11 = vld [vmem:[%s5390_s1 + $0x128] sm:$0xff] (!%p141_p2)  }
   0x9   : > { %4009 = vmatprep.subr.bf16.mxu0 (!%p141_p2), %v4531_v3  ;;  %v4540_v22 = vld [vmem:[%s5390_s1 + $0x70] sm:$0xff] (!%p141_p2)   ;;  %v4542_v37 = vld [vmem:[%s5390_s1 + $0x78] sm:$0xff] (!%p141_p2)   ;;  %v4544_v62 = vld [vmem:[%s5390_s1] sm:$0xff] (!%p141_p2)  }
   0xa   : > { %v4541_v28 = vld [vmem:[%s5390_s1 + $0x130] sm:$0xff] (!%p141_p2)   ;;  %v4543_v41 = vld [vmem:[%s5390_s1 + $0x138] sm:$0xff] (!%p141_p2)  }
   0xb   : > { %3818 = vmatpush3.bf16.msra.mxu1 (!%p141_p2), %v4530_v2 }
   0xc   : > { %4010 = vmatpush3.bf16.msra.mxu0 (!%p141_p2), %v4531_v3  ;;  %3819 = vmatprep.subr.bf16.mxu1 (!%p141_p2), %v4532_v4  ;;  %v4545_v3 = vld [vmem:[%s5390_s1 + $0x140] sm:$0xff] (!%p141_p2)  }
   0xd   : > { %s5394_s13 = smov (!%p168_p3, %s3228_s13), 1  ;;  %4011 = vmatprep.subr.bf16.mxu0 %v4533_v5 }
   0xe   : > { %s4519_s30 = smul.u32 432, %s5394_s13  ;;  %s3471_s5 = sshll.u32 %s5394_s13, 7 }
   0xf   : > { %3820 = vmatpush3.bf16.msra.mxu1 %v4532_v4  ;;  %s5360_s8 = scalar_lea.vmem %s5391_s2, %s3471_s5  ;;  %s3236_s9 = sshll.u32 %s5394_s13, 1 }
  0x10   : > { %4012 = vmatpush3.bf16.msra.mxu0 %v4533_v5  ;;  %3821 = vmatprep.subr.bf16.mxu1 %v4534_v6  ;;  %s4680_s10 = scalar_lea.vmem %s5389_s0, %s4519_s30  ;;  %s181_s15 = scalar_lea.vmem %s5392_s3, %s3236_s9 }
  0x11   : > { %4013 = vmatprep.subr.bf16.mxu0 %v4535_v7  ;;  %v183_v12 = vld [vmem:[%s4680_s10] sm:$0xff]  ;;  %v184_v13 = vld [vmem:[%s4680_s10 + $0x8] sm:$0xff]  ;;  %v185_v14 = vld [vmem:[%s4680_s10 + $0x10] sm:$0x3] }
  0x12   : > { %v4691_v15 = vpack.c.bf16 %v184_v13, %v183_v12  ;;  %v4693_v16 = vpack.c.bf16 %v185_v14, %v185_v14  ;;  %v186_v17 = vld [vmem:[%s4680_s10 + $0x18] sm:$0xff]  ;;  %v187_v18 = vld [vmem:[%s4680_s10 + $0x20] sm:$0xff]  ;;  %v188_v19 = vld [vmem:[%s4680_s10 + $0x28] sm:$0x3] }
  0x13   : > { %3822 = vmatpush3.bf16.msra.mxu1 %v4534_v6  ;;  %v4698_v20 = vpack.c.bf16 %v187_v18, %v186_v17  ;;  %v4700_v21 = vpack.c.bf16 %v188_v19, %v188_v19  ;;  %v189_v26 = vld [vmem:[%s4680_s10 + $0x30] sm:$0xff]  ;;  %v190_v27 = vld [vmem:[%s4680_s10 + $0x38] sm:$0xff]  ;;  %v191_v32 = vld [vmem:[%s4680_s10 + $0x40] sm:$0x3] }
  0x14   : > { %4014 = vmatpush3.bf16.msra.mxu0 %v4535_v7  ;;  %3823 = vmatprep.subr.bf16.mxu1 %v4536_v8  ;;  %v291_v23 = vshrl.u32 %v4691_v15, 16  ;;  %v293_v24 = vshll.u32 %v4691_v15, 16  ;;  %v298_v25 = vshll.u32 %v4693_v16, 16  ;;  %v4717_v33 = vpack.c.bf16 %v190_v27, %v189_v26  ;;  %v192_v44 = vld [vmem:[%s4680_s10 + $0x48] sm:$0xff]  ;;  %v193_v45 = vld [vmem:[%s4680_s10 + $0x50] sm:$0xff]  ;;  %v195_v53 = vld [vmem:[%s4680_s10 + $0x60] sm:$0xff] }
  0x15   : > { %4015 = vmatprep.subr.bf16.mxu0 %v4537_v9  ;;  %v303_v29 = vshrl.u32 %v4698_v20, 16  ;;  %v305_v30 = vshll.u32 %v4698_v20, 16  ;;  %v310_v31 = vshll.u32 %v4700_v21, 16  ;;  %v4719_v36 = vpack.c.bf16 %v191_v32, %v191_v32  ;;  %v194_v49 = vld [vmem:[%s4680_s10 + $0x58] sm:$0x3]  ;;  %v196_v54 = vld [vmem:[%s4680_s10 + $0x68] sm:$0xff] }
  0x16   : > { %v295_v34 = vrot.slane %v293_v24, 1  ;;  %v300_v35 = vrot.slane %v298_v25, 1  ;;  %v317_v40 = vshll.u32 %v4717_v33, 16  ;;  %v315_v43 = vshrl.u32 %v4717_v33, 16  ;;  %v197_v58 = vld [vmem:[%s4680_s10 + $0x70] sm:$0x3] }
  0x17   : > { %3824 = vmatpush3.bf16.msra.mxu1 %v4536_v8  ;;  %v307_v38 = vrot.slane %v305_v30, 1  ;;  %v312_v39 = vrot.slane %v310_v31, 1  ;;  %v322_v48 = vshll.u32 %v4719_v36, 16  ;;  %v4733_v50 = vpack.c.bf16 %v193_v45, %v192_v44  ;;  %v198_v2 = vld [vmem:[%s4680_s10 + $0x78] sm:$0xff]  ;;  %v199_v7 = vld [vmem:[%s4680_s10 + $0x80] sm:$0xff]  ;;  %v201_v14 = vld [vmem:[%s4680_s10 + $0x90] sm:$0xff] }
  0x18   : > { %4016 = vmatpush3.bf16.msra.mxu0 %v4537_v9  ;;  %3825 = vmatprep.subr.bf16.mxu1 %v4538_v10  ;;  %v296_v42 = vor.u32 %v295_v34, %v291_v23  ;;  %v319_v47 = vrot.slane %v317_v40, 1  ;;  %v4736_v52 = vpack.c.bf16 %v194_v49, %v194_v49  ;;  %v4745_v60 = vpack.c.bf16 %v196_v54, %v195_v53  ;;  %v200_v9 = vld [vmem:[%s4680_s10 + $0x88] sm:$0x3]  ;;  %v202_v17 = vld [vmem:[%s4680_s10 + $0x98] sm:$0xff]  ;;  %v203_v18 = vld [vmem:[%s4680_s10 + $0xa0] sm:$0x3] }
  0x19   : > { %4017 = vmatprep.subr.bf16.mxu0 %v4539_v11  ;;  %v308_v46 = vor.u32 %v307_v38, %v303_v29  ;;  %v327_v56 = vshrl.u32 %v4733_v50, 16  ;;  %v329_v57 = vshll.u32 %v4733_v50, 16  ;;  %v4747_v61 = vpack.c.bf16 %v197_v58, %v197_v58  ;;  %v204_v30 = vld [vmem:[%s4680_s10 + $0xa8] sm:$0xff]  ;;  %v205_v31 = vld [vmem:[%s4680_s10 + $0xb0] sm:$0xff] }
  0x1a   : > { %v301_v51 = vsel %vm289_vm0, %v296_v42, %v300_v35  ;;  %v334_v59 = vshll.u32 %v4736_v52, 16  ;;  %v320_v63 = vor.u32 %v319_v47, %v315_v43  ;;  %v324_v0 = vrot.slane %v322_v48, 1  ;;  %v206_v35 = vld [vmem:[%s4680_s10 + $0xb8] sm:$0x3]  ;;  %v4550_v38 = vld [vmem:[%s5390_s1 + $0x10] sm:$0xff]   ;;  %v208_v47 = vld [vmem:[%s4680_s10 + $0xc8] sm:$0xff] }
  0x1b   : > { %3826 = vmatpush3.bf16.msra.mxu1 %v4538_v10  ;;  %3831 = vmatprep.mubr.bf16.mxu1 %v301_v51  ;;  %v313_v55 = vsel %vm289_vm0, %v308_v46, %v312_v39  ;;  %v331_v1 = vrot.slane %v329_v57, 1  ;;  %v339_v5 = vshrl.u32 %v4745_v60, 16  ;;  %v341_v6 = vshll.u32 %v4745_v60, 16  ;;  %v207_v46 = vld [vmem:[%s4680_s10 + $0xc0] sm:$0xff]  ;;  %v4549_v51 = vld [vmem:[%s5390_s1 + $0x158] sm:$0xff]  }
  0x1c   : > { %4018 = vmatpush3.bf16.msra.mxu0 %v4539_v11  ;;  %3827 = vmatprep.subr.bf16.mxu1 %v4540_v22  ;;  %v336_v4 = vrot.slane %v334_v59, 1  ;;  %v4760_v10 = vpack.c.bf16 %v199_v7, %v198_v2  ;;  %v346_v12 = vshll.u32 %v4747_v61, 16  ;;  %v4763_v13 = vpack.c.bf16 %v200_v9, %v200_v9  ;;  %v214_v7 = vld [vmem:[%s4680_s10 + $0xf8] sm:$0xff] }
  0x1d   : > { %4019 = vmatprep.subr.bf16.mxu0 %v4541_v28  ;;  %4023 = vmatprep.mubr.bf16.mxu0 %v313_v55  ;;  %v332_v8 = vor.u32 %v331_v1, %v327_v56  ;;  %v343_v11 = vrot.slane %v341_v6, 1  ;;  %v4769_v19 = vsel %vm289_vm0, %v320_v63, %v324_v0  ;;  %v4775_v24 = vpack.c.bf16 %v202_v17, %v201_v14  ;;  %v4553_v63 = vld [vmem:[%s5390_s1 + $0x18] sm:$0xff]   ;;  %v211_v1 = vld [vmem:[%s4680_s10 + $0xe0] sm:$0xff]  ;;  %v213_v6 = vld [vmem:[%s4680_s10 + $0xf0] sm:$0xff] }
  0x1e   : > { %v353_v23 = vshll.u32 %v4760_v10, 16  ;;  %v351_v25 = vshrl.u32 %v4760_v10, 16  ;;  %v358_v26 = vshll.u32 %v4763_v13, 16  ;;  %v348_v34 = vrot.slane %v346_v12, 1  ;;  %v210_v0 = vld [vmem:[%s4680_s10 + $0xd8] sm:$0xff]  ;;  %v4556_v14 = vld [vmem:[%s5390_s1 + $0x20] sm:$0xff]  }
  0x1f   : > { %3828 = vmatpush3.bf16.msra.mxu1 %v4540_v22  ;;  %v4546_v22 = vld [vmem:[%s5390_s1 + $0x148] sm:$0xff]   ;;  %v4780_v27 = vsel %vm289_vm0, %v332_v8, %v336_v4  ;;  %v344_v32 = vor.u32 %v343_v11, %v339_v5  ;;  %v4795_v39 = vpack.c.bf16 %v203_v18, %v203_v18  ;;  %v365_v40 = vshll.u32 %v4775_v24, 16  ;;  %v4551_v8 = vld [vmem:[%s5390_s1 + $0x160] sm:$0xff]  }
  0x20   : > { %4020 = vmatpush3.bf16.msra.mxu0 %v4541_v28  ;;  %3829 = vmatprep.subr.bf16.mxu1 %v4542_v37  ;;  %v4547_v28 = vld [vmem:[%s5390_s1 + $0x8] sm:$0xff]   ;;  %v355_v29 = vrot.slane %v353_v23, 1  ;;  %v360_v43 = vrot.slane %v358_v26, 1  ;;  %v4802_v44 = vpack.c.bf16 %v206_v35, %v206_v35  ;;  %v363_v49 = vshrl.u32 %v4775_v24, 16 }
  0x21   : > { %4021 = vmatprep.subr.bf16.mxu0 %v4543_v41  ;;  %v4808_v48 = vsel %vm289_vm0, %v344_v32, %v348_v34  ;;  %v367_v53 = vrot.slane %v365_v40, 1  ;;  %v370_v54 = vshll.u32 %v4795_v39, 16  ;;  %v4816_v56 = vpack.c.bf16 %v208_v47, %v207_v46  ;;  %v212_v17 = vld [vmem:[%s4680_s10 + $0xe8] sm:$0x3] }
  0x22   : > { %v356_v42 = vor.u32 %v355_v29, %v351_v25  ;;  %v382_v59 = vshll.u32 %v4802_v44, 16  ;;  %v4840_v12 = vpack.c.bf16 %v211_v1, %v210_v0  ;;  %v4846_v18 = vpack.c.bf16 %v214_v7, %v213_v6  ;;  %v4552_v29 = vld [vmem:[%s5390_s1 + $0x168] sm:$0xff]   ;;  %v218_v1 = vld [vmem:[%s4680_s10 + $0x118] sm:$0x3]  ;;  %v221_v6 = vld [vmem:[%s4680_s10 + $0x130] sm:$0x3] }
  0x23   : > { %3830 = vmatpush3.bf16.msra.mxu1 %v4542_v37  ;;  %v4789_v37 = vpack.c.bf16 %v205_v31, %v204_v30  ;;  %v368_v2 = vor.u32 %v367_v53, %v363_v49  ;;  %v389_v5 = vshll.u32 %v4816_v56, 16  ;;  %v387_v23 = vshrl.u32 %v4816_v56, 16  ;;  %v4558_v34 = vld [vmem:[%s5390_s1 + $0x28] sm:$0xff]   ;;  %v219_v49 = vld [vmem:[%s4680_s10 + $0x120] sm:$0xff] }
  0x24   : > { %4022 = vmatpush3.bf16.msra.mxu0 %v4543_v41  ;;  %3863 = vmatprep.subr.bf16.mxu1 %v4544_v62  ;;  %v4548_v41 = vld [vmem:[%s5390_s1 + $0x150] sm:$0xff]   ;;  %v4819_v57 = vsel %vm289_vm0, %v356_v42, %v360_v43  ;;  %v384_v11 = vrot.slane %v382_v59, 1  ;;  %v4861_v31 = vpack.c.bf16 %v212_v17, %v212_v17  ;;  %v401_v32 = vshll.u32 %v4840_v12, 16  ;;  %v216_v40 = vld [vmem:[%s4680_s10 + $0x108] sm:$0xff]  ;;  %v4557_v17 = vld [vmem:[%s5390_s1 + $0x180] sm:$0xff]  }
  0x25   : > { %4055 = vmatprep.subr.bf16.mxu0 %v4545_v3  ;;  %v377_v45 = vshll.u32 %v4789_v37, 16  ;;  %v391_v25 = vrot.slane %v389_v5, 1  ;;  %v217_v43 = vld [vmem:[%s4680_s10 + $0x110] sm:$0xff]  ;;  %v969_v46 = vrot.slane %v4698_v20, 1  ;;  %v970_v47 = vrot.slane %v4700_v21, 1 }
  0x26   : > { %3832 = vmatmul.mubr.bf16.vlgmr.msra.gmra.mrb[0].mxu1 %v313_v55  ;;  %v375_v55 = vshrl.u32 %v4789_v37, 16  ;;  %v399_v53 = vshrl.u32 %v4840_v12, 16  ;;  %v411_v59 = vshrl.u32 %v4846_v18, 16 }
  0x27   : > { %4024 = vmatmul.mubr.bf16.vlgmr.msra.gmra.mrb[0].mxu0 %v4769_v19  ;;  %3864 = vmatpush3.bf16.msra.mxu1 %v4544_v62  ;;  %v379_v58 = vrot.slane %v377_v45, 1  ;;  %v209_v62 = vld [vmem:[%s4680_s10 + $0xd0] sm:$0x3]  ;;  %v4901_v5 = vsel %vm965_vm1, %v969_v46, %v970_v47  ;;  %v4938_v47 = vld [vmem:[%s5390_s1 + $0x80] sm:$0xff]  }
  0x28   : > { %4056 = vmatpush3.bf16.msra.mxu0 %v4545_v3  ;;  %3835 = vmatprep.mubr.bf16.mxu1 %v4769_v19  ;;  %v372_v3 = vrot.slane %v370_v54, 1  ;;  %v4832_v4 = vpack.c.bf16 %v209_v62, %v209_v62  ;;  %v4554_v45 = vld [vmem:[%s5390_s1 + $0x170] sm:$0xff]   ;;  %v403_v54 = vrot.slane %v401_v32, 1  ;;  %v222_v32 = vld [vmem:[%s4680_s10 + $0x138] sm:$0xff] }
  0x29   : > { %4057 = vmatprep.subr.bf16.mxu0 %v4546_v22  ;;  %4027 = vmatprep.mubr.bf16.mxu0 %v4780_v27  ;;  %v380_v9 = vor.u32 %v379_v58, %v375_v55  ;;  %v406_v55 = vshll.u32 %v4861_v31, 16  ;;  %v4560_v58 = vld [vmem:[%s5390_s1 + $0x30] sm:$0xff]  }
  0x2a   : > { %3865 = vmatprep.subr.bf16.mxu1 %v4547_v28  ;;  %v394_v26 = vshll.u32 %v4832_v4, 16  ;;  %v404_v7 = vor.u32 %v403_v54, %v399_v53  ;;  %v224_v53 = vld [vmem:[%s4680_s10 + $0x148] sm:$0x3] }
  0x2b   : > { %3866 = vmatpush3.bf16.msra.mxu1 %v4547_v28  ;;  %v215_v28 = vld [vmem:[%s4680_s10 + $0x100] sm:$0x3]  ;;  %v4858_v30 = vsel %vm289_vm0, %v380_v9, %v384_v11  ;;  %v972_v9 = vrot.slane %v4717_v33, 1  ;;  %v973_v11 = vrot.slane %v4719_v36, 1 }
  0x2c   : > { %4058 = vmatpush3.bf16.msra.mxu0 %v4546_v22  ;;  %3867 = vmatprep.subr.bf16.mxu1 %v4550_v38  ;;  %v4849_v22 = vsel %vm289_vm0, %v368_v2, %v372_v3  ;;  %v4869_v35 = vpack.c.bf16 %v215_v28, %v215_v28  ;;  %v396_v42 = vrot.slane %v394_v26, 1  ;;  %v4555_v3 = vld [vmem:[%s5390_s1 + $0x178] sm:$0xff]   ;;  %v4915_v26 = vpack.c.bf16 %v218_v1, %v218_v1 }
  0x2d   : > { %4059 = vmatprep.subr.bf16.mxu0 %v4548_v41  ;;  %v4919_v28 = vpack.c.bf16 %v221_v6, %v221_v6  ;;  %v227_v6 = vld [vmem:[%s4680_s10 + $0x160] sm:$0x3] }
  0x2e   : > { %3836 = vmatmul.mubr.bf16.gmra.mrb[4].mxu1 %v4780_v27  ;;  %v418_v21 = vshll.u32 %v4869_v35, 16 }
  0x2f   : > { %4028 = vmatmul.mubr.bf16.gmra.mrb[4].mxu0 %v4808_v48  ;;  %3839 = vmatprep.mubr.bf16.mxu1 %v4808_v48 }
  0x30   : > { %4060 = vmatpush3.bf16.msra.mxu0 %v4548_v41  ;;  %4031 = vmatprep.mubr.bf16.mxu0 %v4819_v57  ;;  %v392_v41 = vor.u32 %v391_v25, %v387_v23  ;;  %v420_v25 = vrot.slane %v418_v21, 1 }
  0x31   : > { %4061 = vmatprep.subr.bf16.mxu0 %v4549_v51  ;;  %3868 = vmatpush3.bf16.msra.mxu1 %v4550_v38  ;;  %v413_v38 = vshll.u32 %v4846_v18, 16 }
  0x32   : > { %3869 = vmatprep.subr.bf16.mxu1 %v4553_v63  ;;  %v4892_v0 = vsel %vm289_vm0, %v392_v41, %v396_v42  ;;  %v225_v41 = vld [vmem:[%s4680_s10 + $0x150] sm:$0xff]  ;;  %v226_v42 = vld [vmem:[%s4680_s10 + $0x158] sm:$0xff] }
  0x33   : > { %v415_v62 = vrot.slane %v413_v38, 1  ;;  %v975_v38 = vrot.slane %v4733_v50, 1  ;;  %v4952_v21 = vpack.c.bf16 %v226_v42, %v225_v41  ;;  %v230_v42 = vld [vmem:[%s4680_s10 + $0x178] sm:$0x3] }
  0x34   : > { %4062 = vmatpush3.bf16.msra.mxu0 %v4549_v51  ;;  %v220_v51 = vld [vmem:[%s4680_s10 + $0x128] sm:$0xff] }
  0x35   : > { %4063 = vmatprep.subr.bf16.mxu0 %v4551_v8  ;;  %3870 = vmatpush3.bf16.msra.mxu1 %v4553_v63  ;;  %v4889_v63 = vpack.c.bf16 %v217_v43, %v216_v40  ;;  %v4895_v2 = vpack.c.bf16 %v220_v51, %v219_v49  ;;  %v416_v23 = vor.u32 %v415_v62, %v411_v59  ;;  %v976_v40 = vrot.slane %v4736_v52, 1 }
  0x36   : > { %3840 = vmatmul.mubr.bf16.gmra.mrb[8].mxu1 %v4819_v57  ;;  %3871 = vmatprep.subr.bf16.mxu1 %v4556_v14  ;;  %v430_v51 = vshll.u32 %v4915_v26, 16  ;;  %v442_v62 = vshll.u32 %v4919_v28, 16 }
  0x37   : > { %4032 = vmatmul.mubr.bf16.gmra.mrb[8].mxu0 %v4849_v22  ;;  %3843 = vmatprep.mubr.bf16.mxu1 %v4849_v22  ;;  %v425_v36 = vshll.u32 %v4889_v63, 16  ;;  %v423_v46 = vshrl.u32 %v4889_v63, 16  ;;  %v4941_v52 = vsel %vm289_vm0, %v416_v23, %v420_v25  ;;  %v4955_v1 = vsel %vm965_vm1, %v975_v38, %v976_v40 }
  0x38   : > { %4064 = vmatpush3.bf16.msra.mxu0 %v4551_v8  ;;  %4035 = vmatprep.mubr.bf16.mxu0 %v4858_v30  ;;  %v408_v8 = vrot.slane %v406_v55, 1  ;;  %v4559_v55 = vld [vmem:[%s5390_s1 + $0x188] sm:$0xff]   ;;  %v444_v25 = vrot.slane %v442_v62, 1  ;;  %v982_v38 = vrot.slane %v4763_v13, 1 }
  0x39   : > { %4065 = vmatprep.subr.bf16.mxu0 %v4552_v29  ;;  %3872 = vmatpush3.bf16.msra.mxu1 %v4556_v14  ;;  %v4562_v14 = vld [vmem:[%s5390_s1 + $0x38] sm:$0xff]   ;;  %v427_v49 = vrot.slane %v425_v36, 1  ;;  %v4968_v36 = vpack.c.bf16 %v227_v6, %v227_v6 }
  0x3a   : > { %3873 = vmatprep.subr.bf16.mxu1 %v4558_v34  ;;  %v4929_v43 = vsel %vm289_vm0, %v404_v7, %v408_v8  ;;  %v979_v7 = vrot.slane %v4747_v61, 1  ;;  %v461_v61 = vshll.u32 %v4952_v21, 16  ;;  %v4563_v6 = vld [vmem:[%s5390_s1 + $0x198] sm:$0xff]  }
  0x3b   : > { %v428_v8 = vor.u32 %v427_v49, %v423_v46  ;;  %v466_v62 = vshll.u32 %v4968_v36, 16 }
  0x3c   : > { %4066 = vmatpush3.bf16.msra.mxu0 %v4552_v29  ;;  %v437_v29 = vshll.u32 %v4895_v2, 16 }
  0x3d   : > { %4067 = vmatprep.subr.bf16.mxu0 %v4554_v45  ;;  %3874 = vmatpush3.bf16.msra.mxu1 %v4558_v34  ;;  %v223_v34 = vld [vmem:[%s4680_s10 + $0x140] sm:$0xff] }
  0x3e   : > { %3844 = vmatmul.mubr.bf16.gmra.mrb[12].mxu1 %v4858_v30  ;;  %3875 = vmatprep.subr.bf16.mxu1 %v4560_v58  ;;  %v4945_v54 = vpack.c.bf16 %v223_v34, %v222_v32  ;;  %v439_v59 = vrot.slane %v437_v29, 1  ;;  %v228_v29 = vld [vmem:[%s4680_s10 + $0x168] sm:$0xff]  ;;  %v229_v32 = vld [vmem:[%s4680_s10 + $0x170] sm:$0xff]  ;;  %v981_v34 = vrot.slane %v4760_v10, 1 }
  0x3f   : > { %4036 = vmatmul.mubr.bf16.gmra.mrb[12].mxu0 %v4892_v0  ;;  %3847 = vmatprep.mubr.bf16.mxu1 %v4892_v0 }
  0x40   : > { %4068 = vmatpush3.bf16.msra.mxu0 %v4554_v45  ;;  %4071 = vmatprep.mubr.bf16.mxu0 %v4901_v5  ;;  %v4932_v45 = vsel %vm965_vm1, %v972_v9, %v973_v11  ;;  %v432_v9 = vrot.slane %v430_v51, 1  ;;  %v4964_v11 = vpack.c.bf16 %v224_v53, %v224_v53  ;;  %v447_v40 = vshrl.u32 %v4945_v54, 16 }
  0x41   : > { %4069 = vmatprep.subr.bf16.mxu0 %v4555_v3  ;;  %3876 = vmatpush3.bf16.msra.mxu1 %v4560_v58  ;;  %v435_v58 = vshrl.u32 %v4895_v2, 16  ;;  %v4987_v53 = vpack.c.bf16 %v229_v32, %v228_v29  ;;  %v987_v29 = vrot.slane %v4789_v37, 1  ;;  %v988_v32 = vrot.slane %v4802_v44, 1 }
  0x42   : > { %3877 = vmatprep.subr.bf16.mxu1 %v4562_v14  ;;  %v4984_v46 = vsel %vm289_vm0, %v428_v8, %v432_v9  ;;  %v454_v51 = vshll.u32 %v4964_v11, 16 }
  0x43   : > { %v440_v23 = vor.u32 %v439_v59, %v435_v58  ;;  %v459_v58 = vshrl.u32 %v4952_v21, 16  ;;  %v463_v59 = vrot.slane %v461_v61, 1  ;;  %v468_v61 = vrot.slane %v466_v62, 1 }
  0x44   : > { %4070 = vmatpush3.bf16.msra.mxu0 %v4555_v3  ;;  %v978_v3 = vrot.slane %v4745_v60, 1  ;;  %v456_v9 = vrot.slane %v454_v51, 1  ;;  %v5026_v44 = vsel %vm965_vm1, %v987_v29, %v988_v32  ;;  %v4567_v51 = vld [vmem:[%s5390_s1 + $0x1a8] sm:$0xff]   ;;  %v990_v62 = vrot.slane %v4816_v56, 1 }
  0x45   : > { %4103 = vmatprep.subr.bf16.mxu0 %v4557_v17  ;;  %3878 = vmatpush3.bf16.msra.mxu1 %v4562_v14  ;;  %v449_v14 = vshll.u32 %v4945_v54, 16  ;;  %v4990_v13 = vsel %vm289_vm0, %v440_v23, %v444_v25  ;;  %v473_v23 = vshll.u32 %v4987_v53, 16  ;;  %v464_v25 = vor.u32 %v463_v59, %v459_v58 }
  0x46   : > { %3848 = vmatmul.mubr.bf16.gmra.mrb[16].mxu1 %v4929_v43  ;;  %3911 = vmatprep.subr.bf16.mxu1 %v4938_v47  ;;  %v4980_v41 = vsel %vm965_vm1, %v978_v3, %v979_v7  ;;  %v4998_v3 = vsel %vm965_vm1, %v981_v34, %v982_v38  ;;  %v985_v7 = vrot.slane %v4795_v39, 1  ;;  %v4565_v39 = vld [vmem:[%s5390_s1 + $0x1a0] sm:$0xff]   ;;  %v471_v34 = vshrl.u32 %v4987_v53, 16 }
  0x47   : > { %4072 = vmatmul.mubr.bf16.vlgmr.msra.gmra.mrb[0].mxu0 %v4932_v45  ;;  %3851 = vmatprep.mubr.bf16.mxu1 %v4941_v52  ;;  %v451_v49 = vrot.slane %v449_v14, 1  ;;  %v5005_v14 = vpack.c.bf16 %v230_v42, %v230_v42  ;;  %v999_v29 = vrot.slane %v4889_v63, 1  ;;  %v1000_v32 = vrot.slane %v4915_v26, 1 }
  0x48   : > { %4104 = vmatpush3.bf16.msra.mxu0 %v4557_v17  ;;  %4075 = vmatprep.mubr.bf16.mxu0 %v4955_v1  ;;  %v4561_v17 = vld [vmem:[%s5390_s1 + $0x190] sm:$0xff]   ;;  %v1002_v26 = vrot.slane %v4895_v2, 1 }
  0x49   : > { %4105 = vmatprep.subr.bf16.mxu0 %v4559_v55  ;;  %v452_v8 = vor.u32 %v451_v49, %v447_v40  ;;  %v475_v40 = vrot.slane %v473_v23, 1  ;;  %v478_v42 = vshll.u32 %v5005_v14, 16  ;;  %v5023_v49 = vsel %vm289_vm0, %v464_v25, %v468_v61 }
  0x4a   : > { %v997_v61 = vrot.slane %v4869_v35, 1  ;;  %v5074_v35 = vsel %vm965_vm1, %v999_v29, %v1000_v32 }
  0x4b   : > { %v5016_v38 = vsel %vm289_vm0, %v452_v8, %v456_v9  ;;  %v476_v58 = vor.u32 %v475_v40, %v471_v34  ;;  %v480_v59 = vrot.slane %v478_v42, 1  ;;  %v4569_v8 = vld [vmem:[%s5390_s1 + $0x1b0] sm:$0xff]   ;;  %v4566_v34 = vld [vmem:[%s5390_s1 + $0x88] sm:$0xff]   ;;  %v1003_v42 = vrot.slane %v4919_v28, 1  ;;  %v4570_v28 = vld [vmem:[%s5390_s1 + $0x98] sm:$0xff]  }
  0x4c   : > { %4106 = vmatpush3.bf16.msra.mxu0 %v4559_v55  ;;  %v984_v55 = vrot.slane %v4775_v24, 1 }
  0x4d   : > { %4107 = vmatprep.subr.bf16.mxu0 %v4561_v17  ;;  %v5043_v9 = vsel %vm289_vm0, %v476_v58, %v480_v59  ;;  %v1005_v58 = vrot.slane %v4945_v54, 1  ;;  %v1006_v59 = vrot.slane %v4964_v11, 1  ;;  %v1008_v11 = vrot.slane %v4952_v21, 1 }
  0x4e   : > { %3852 = vmatmul.mubr.bf16.gmra.mrb[20].mxu1 %v4984_v46 }
  0x4f   : > { %4076 = vmatmul.mubr.bf16.gmra.mrb[4].mxu0 %v4980_v41  ;;  %3855 = vmatprep.mubr.bf16.mxu1 %v4990_v13 }
  0x50   : > { %4079 = vmatprep.mubr.bf16.mxu0 %v4998_v3  ;;  %4108 = vmatpush3.bf16.msra.mxu0 %v4561_v17  ;;  %v5020_v17 = vsel %vm965_vm1, %v984_v55, %v985_v7  ;;  %v993_v55 = vrot.slane %v4840_v12, 1  ;;  %v994_v7 = vrot.slane %v4861_v31, 1  ;;  %v996_v31 = vrot.slane %v4846_v18, 1 }
  0x51   : > { %4109 = vmatprep.subr.bf16.mxu0 %v4563_v6 }
  0x52   : > { %v5049_v25 = vsel %vm965_vm1, %v993_v55, %v994_v7  ;;  %v5071_v40 = vsel %vm965_vm1, %v996_v31, %v997_v61  ;;  %v231_v55 = vld [vmem:[%s4680_s10 + $0x180] sm:$0xff]  ;;  %v1011_v7 = vrot.slane %v4987_v53, 1  ;;  %v233_v31 = vld [vmem:[%s4680_s10 + $0x190] sm:$0x3] }
  0x53   : > { %v4572_v61 = vld [vmem:[%s5390_s1 + $0xa0] sm:$0xff]  }
  0x54   : > { %4110 = vmatpush3.bf16.msra.mxu0 %v4563_v6  ;;  %v991_v6 = vrot.slane %v4832_v4, 1  ;;  %v4571_v4 = vld [vmem:[%s5390_s1 + $0x1b8] sm:$0xff]  }
  0x55   : > { %4111 = vmatprep.subr.bf16.mxu0 %v4565_v39 }
  0x56   : > { %3856 = vmatmul.mubr.bf16.gmra.mrb[24].mxu1 %v5016_v38  ;;  %v5046_v23 = vsel %vm965_vm1, %v990_v62, %v991_v6  ;;  %v5093_v62 = vsel %vm965_vm1, %v1005_v58, %v1006_v59  ;;  %v1009_v6 = vrot.slane %v4968_v36, 1  ;;  %v4578_v59 = vld [vmem:[%s5390_s1 + $0xb8] sm:$0xff]  }
  0x57   : > { %4080 = vmatmul.mubr.bf16.gmra.mrb[8].mxu0 %v5020_v17  ;;  %3859 = vmatprep.mubr.bf16.mxu1 %v5023_v49 }
  0x58   : > { %4083 = vmatprep.mubr.bf16.mxu0 %v5026_v44  ;;  %4112 = vmatpush3.bf16.msra.mxu0 %v4565_v39  ;;  %v5065_v39 = vld [vmem:[%s5390_s1 + $0x1c0] sm:$0xff]   ;;  %v5113_v29 = vsel %vm965_vm1, %v1008_v11, %v1009_v6  ;;  %v4575_v11 = vld [vmem:[%s5390_s1 + $0x1c8] sm:$0xff]   ;;  %v4577_v6 = vld [vmem:[%s5390_s1 + $0x1d0] sm:$0xff]  }
  0x59   : > { %4113 = vmatprep.subr.bf16.mxu0 %v4567_v51 }
  0x5c   : > { %4114 = vmatpush3.bf16.msra.mxu0 %v4567_v51  ;;  %v4568_v51 = vld [vmem:[%s5390_s1 + $0x90] sm:$0xff]  }
  0x5d   : > { %4115 = vmatprep.subr.bf16.mxu0 %v4569_v8 }
  0x5e   : > { %3860 = vmatmul.mubr.bf16.gmra.mrb[28].mxu1 %v5043_v9 }
  0x5f   : > { %4084 = vmatmul.mubr.bf16.gmra.mrb[12].mxu0 %v5046_v23  ;;  %3879 = vmatprep.mubr.bf16.mxu1 %v4691_v15 }
  0x60   : > { %4087 = vmatprep.mubr.bf16.mxu0 %v5049_v25  ;;  %4116 = vmatpush3.bf16.msra.mxu0 %v4569_v8  ;;  %v1012_v8 = vrot.slane %v5005_v14, 1  ;;  %v4574_v14 = vld [vmem:[%s5390_s1 + $0xa8] sm:$0xff]  }
  0x61   : > { %4117 = vmatprep.subr.bf16.mxu0 %v4571_v4 }
  0x62   : > { %v5120_v36 = vsel %vm965_vm1, %v1011_v7, %v1012_v8  ;;  %v4583_v7 = vld [vmem:[%s5390_s1 + $0x1e8] sm:$0xff]   ;;  %v966_v8 = vrot.slane %v4691_v15, 1  ;;  %v4589_v15 = vld [vmem:[%s5390_s1 + $0x200] sm:$0xff]  }
  0x64   : > { %4118 = vmatpush3.bf16.msra.mxu0 %v4571_v4  ;;  %v232_v4 = vld [vmem:[%s4680_s10 + $0x188] sm:$0xff] }
  0x65   : > { %4151 = vmatprep.subr.bf16.mxu0 %v5065_v39  ;;  %v5115_v32 = vpack.c.bf16 %v232_v4, %v231_v55  ;;  %v4579_v55 = vld [vmem:[%s5390_s1 + $0x1d8] sm:$0xff]   ;;  %v967_v4 = vrot.slane %v4693_v16, 1  ;;  %v4582_v16 = vld [vmem:[%s5390_s1 + $0xc8] sm:$0xff]  }
  0x66   : > { %3880 = vmatmul.mubr.bf16.vlgmr.msra.gmra.mrb[0].mxu1 %v4698_v20 }
  0x67   : > { %4088 = vmatmul.mubr.bf16.gmra.mrb[16].mxu0 %v5071_v40  ;;  %3912 = vmatpush3.bf16.msra.mxu1 %v4938_v47  ;;  %v5090_v47 = vsel %vm965_vm1, %v1002_v26, %v1003_v42  ;;  %v1819_v26 = vrot.slane %v5115_v32, 1 }
  0x68   : > { %3883 = vmatprep.mubr.bf16.mxu1 %v4717_v33  ;;  %4091 = vmatprep.mubr.bf16.mxu0 %v5074_v35 }
  0x69   : > { %3913 = vmatprep.subr.bf16.mxu1 %v4566_v34 }
  0x6b   : > { %3914 = vmatpush3.bf16.msra.mxu1 %v4566_v34  ;;  %v5117_v34 = vpack.c.bf16 %v233_v31, %v233_v31  ;;  %v4585_v31 = vld [vmem:[%s5390_s1 + $0x1f0] sm:$0xff]  }
  0x6c   : > { %3915 = vmatprep.subr.bf16.mxu1 %v4568_v51 }
  0x6d   : > { %v1820_v42 = vrot.slane %v5117_v34, 1 }
  0x6e   : > { %3884 = vmatmul.mubr.bf16.gmra.mrb[4].mxu1 %v4733_v50 }
  0x6f   : > { %4092 = vmatmul.mubr.bf16.gmra.mrb[20].mxu0 %v5090_v47  ;;  %3887 = vmatprep.mubr.bf16.mxu1 %v4745_v60  ;;  %v5135_v58 = vsel %vm965_vm1, %v1819_v26, %v1820_v42  ;;  %v4584_v26 = vld [vmem:[%s5390_s1 + $0xd0] sm:$0xff]   ;;  %v4586_v42 = vld [vmem:[%s5390_s1 + $0xd8] sm:$0xff]  }
  0x70   : > { %4095 = vmatprep.mubr.bf16.mxu0 %v5093_v62  ;;  %3916 = vmatpush3.bf16.msra.mxu1 %v4568_v51  ;;  %v4576_v51 = vld [vmem:[%s5390_s1 + $0xb0] sm:$0xff]  }
  0x71   : > { %3917 = vmatprep.subr.bf16.mxu1 %v4570_v28 }
  0x74   : > { %3918 = vmatpush3.bf16.msra.mxu1 %v4570_v28  ;;  %v4580_v28 = vld [vmem:[%s5390_s1 + $0xc0] sm:$0xff]  }
  0x75   : > { %3919 = vmatprep.subr.bf16.mxu1 %v4572_v61 }
  0x76   : > { %3888 = vmatmul.mubr.bf16.gmra.mrb[8].mxu1 %v4760_v10 }
  0x77   : > { %4096 = vmatmul.mubr.bf16.gmra.mrb[24].mxu0 %v5113_v29  ;;  %3891 = vmatprep.mubr.bf16.mxu1 %v4775_v24 }
  0x78   : > { %4099 = vmatprep.mubr.bf16.mxu0 %v5120_v36  ;;  %3920 = vmatpush3.bf16.msra.mxu1 %v4572_v61  ;;  %v968_v61 = vsel %vm965_vm1, %v966_v8, %v967_v4  ;;  %v4595_v8 = vld [vmem:[%s5390_s1 + $0x218] sm:$0xff]  }
  0x79   : > { %3921 = vmatprep.subr.bf16.mxu1 %v4574_v14 }
  0x7c   : > { %3922 = vmatpush3.bf16.msra.mxu1 %v4574_v14  ;;  %v4587_v14 = vld [vmem:[%s5390_s1 + $0x1f8] sm:$0xff]  }
  0x7d   : > { %3923 = vmatprep.subr.bf16.mxu1 %v4576_v51 }
  0x7e   : > { %3892 = vmatmul.mubr.bf16.gmra.mrb[12].mxu1 %v4789_v37 }
  0x7f   : > { %4100 = vmatmul.mubr.bf16.gmra.mrb[28].mxu0 %v5135_v58  ;;  %3895 = vmatprep.mubr.bf16.mxu1 %v4816_v56 }
  0x80   : > { %4119 = vmatprep.mubr.bf16.mxu0 %v4717_v33  ;;  %3924 = vmatpush3.bf16.msra.mxu1 %v4576_v51  ;;  %v4590_v51 = vld [vmem:[%s5390_s1 + $0xe8] sm:$0xff]  }
  0x81   : > { %3925 = vmatprep.subr.bf16.mxu1 %v4578_v59 }
  0x84   : > { %3926 = vmatpush3.bf16.msra.mxu1 %v4578_v59  ;;  %v234_v59 = vld [vmem:[%s4680_s10 + $0x198] sm:$0xff] }
  0x85   : > { %3959 = vmatprep.subr.bf16.mxu1 %v4580_v28 }
  0x86   : > { %3896 = vmatmul.mubr.bf16.gmra.mrb[16].mxu1 %v4840_v12 }
  0x87   : > { %4120 = vmatmul.mubr.bf16.vlgmr.msra.gmra.mrb[0].mxu0 %v4733_v50  ;;  %3899 = vmatprep.mubr.bf16.mxu1 %v4846_v18 }
  0x88   : > { %4152 = vmatpush3.bf16.msra.mxu0 %v5065_v39  ;;  %4123 = vmatprep.mubr.bf16.mxu0 %v4745_v60  ;;  %v4581_v39 = vld [vmem:[%s5390_s1 + $0x1e0] sm:$0xff]  }
  0x89   : > { %4153 = vmatprep.subr.bf16.mxu0 %v4575_v11 }
  0x8c   : > { %4154 = vmatpush3.bf16.msra.mxu0 %v4575_v11  ;;  %v4592_v11 = vld [vmem:[%s5390_s1 + $0xf0] sm:$0xff]  }
  0x8d   : > { %4155 = vmatprep.subr.bf16.mxu0 %v4577_v6 }
  0x8e   : > { %3900 = vmatmul.mubr.bf16.gmra.mrb[20].mxu1 %v4889_v63 }
  0x8f   : > { %4124 = vmatmul.mubr.bf16.gmra.mrb[4].mxu0 %v4760_v10  ;;  %3903 = vmatprep.mubr.bf16.mxu1 %v4895_v2 }
  0x90   : > { %4127 = vmatprep.mubr.bf16.mxu0 %v4775_v24  ;;  %4156 = vmatpush3.bf16.msra.mxu0 %v4577_v6 }
  0x91   : > { %4157 = vmatprep.subr.bf16.mxu0 %v4579_v55 }
  0x94   : > { %4158 = vmatpush3.bf16.msra.mxu0 %v4579_v55  ;;  %v4594_v55 = vld [vmem:[%s5390_s1 + $0xf8] sm:$0xff]  }
  0x95   : > { %4159 = vmatprep.subr.bf16.mxu0 %v4581_v39 }
  0x96   : > { %3904 = vmatmul.mubr.bf16.gmra.mrb[24].mxu1 %v4945_v54 }
  0x97   : > { %4128 = vmatmul.mubr.bf16.gmra.mrb[8].mxu0 %v4789_v37  ;;  %3907 = vmatprep.mubr.bf16.mxu1 %v4952_v21 }
  0x98   : > { %4131 = vmatprep.mubr.bf16.mxu0 %v4816_v56  ;;  %4160 = vmatpush3.bf16.msra.mxu0 %v4581_v39  ;;  %v4591_v39 = vld [vmem:[%s5390_s1 + $0x208] sm:$0xff]  }
  0x99   : > { %4161 = vmatprep.subr.bf16.mxu0 %v4583_v7 }
  0x9c   : > { %4162 = vmatpush3.bf16.msra.mxu0 %v4583_v7  ;;  %v4600_v7 = vld [vmem:[%s5390_s1 + $0x100] sm:$0xff]  }
  0x9d   : > { %4163 = vmatprep.subr.bf16.mxu0 %v4585_v31 }
  0x9e   : > { %3908 = vmatmul.mubr.bf16.gmra.mrb[28].mxu1 %v4987_v53 }
  0x9f   : > { %4132 = vmatmul.mubr.bf16.gmra.mrb[12].mxu0 %v4840_v12  ;;  %3927 = vmatprep.mubr.bf16.mxu1 %v968_v61 }
  0xa0   : > { %4135 = vmatprep.mubr.bf16.mxu0 %v4846_v18  ;;  %4164 = vmatpush3.bf16.msra.mxu0 %v4585_v31  ;;  %v236_v31 = vld [vmem:[%s4680_s10 + $0x1a8] sm:$0x3] }
  0xa1   : > { %4165 = vmatprep.subr.bf16.mxu0 %v4587_v14  ;;  %v5289_v61 = vpack.c.bf16 %v236_v31, %v236_v31 }
  0xa4   : > { %4166 = vmatpush3.bf16.msra.mxu0 %v4587_v14 }
  0xa5   : > { %4199 = vmatprep.subr.bf16.mxu0 %v4589_v15 }
  0xa6   : > { %3928 = vmatmul.mubr.bf16.vlgmr.msra.gmra.mrb[0].mxu1 %v4901_v5  ;;  %v4588_v5 = vld [vmem:[%s5390_s1 + $0xe0] sm:$0xff]  }
  0xa7   : > { %4136 = vmatmul.mubr.bf16.gmra.mrb[16].mxu0 %v4889_v63  ;;  %3960 = vmatpush3.bf16.msra.mxu1 %v4580_v28  ;;  %v235_v28 = vld [vmem:[%s4680_s10 + $0x1a0] sm:$0xff] }
  0xa8   : > { %3931 = vmatprep.mubr.bf16.mxu1 %v4932_v45  ;;  %4139 = vmatprep.mubr.bf16.mxu0 %v4895_v2  ;;  %v5222_v6 = vpack.c.bf16 %v235_v28, %v234_v59  ;;  %v4605_v28 = vld [vmem:[%s5390_s1 + $0x128] sm:$0xff]  }
  0xa9   : > { %3961 = vmatprep.subr.bf16.mxu1 %v4582_v16 }
  0xaa   : > { %v2342_v14 = vshll.u32 %v5222_v6, 16 }
  0xab   : > { %3962 = vmatpush3.bf16.msra.mxu1 %v4582_v16 }
  0xac   : > { %3963 = vmatprep.subr.bf16.mxu1 %v4584_v26 }
  0xae   : > { %3932 = vmatmul.mubr.bf16.gmra.mrb[4].mxu1 %v4955_v1 }
  0xaf   : > { %4140 = vmatmul.mubr.bf16.gmra.mrb[20].mxu0 %v4945_v54  ;;  %3935 = vmatprep.mubr.bf16.mxu1 %v4980_v41 }
  0xb0   : > { %4143 = vmatprep.mubr.bf16.mxu0 %v4952_v21  ;;  %3964 = vmatpush3.bf16.msra.mxu1 %v4584_v26  ;;  %v2344_v26 = vrot.slane %v2342_v14, 1 }
  0xb1   : > { %3965 = vmatprep.subr.bf16.mxu1 %v4586_v42 }
  0xb4   : > { %3966 = vmatpush3.bf16.msra.mxu1 %v4586_v42  ;;  %v2347_v42 = vshll.u32 %v5289_v61, 16 }
  0xb5   : > { %3967 = vmatprep.subr.bf16.mxu1 %v4588_v5 }
  0xb6   : > { %3936 = vmatmul.mubr.bf16.gmra.mrb[8].mxu1 %v4998_v3  ;;  %v2349_v59 = vrot.slane %v2347_v42, 1 }
  0xb7   : > { %4144 = vmatmul.mubr.bf16.gmra.mrb[24].mxu0 %v4987_v53  ;;  %3939 = vmatprep.mubr.bf16.mxu1 %v5020_v17 }
  0xb8   : > { %4147 = vmatprep.mubr.bf16.mxu0 %v5115_v32  ;;  %3968 = vmatpush3.bf16.msra.mxu1 %v4588_v5  ;;  %v4604_v5 = vld [vmem:[%s5390_s1 + $0x120] sm:$0xff]  }
  0xb9   : > { %3969 = vmatprep.subr.bf16.mxu1 %v4590_v51 }
  0xbc   : > { %3970 = vmatpush3.bf16.msra.mxu1 %v4590_v51 }
  0xbd   : > { %3971 = vmatprep.subr.bf16.mxu1 %v4592_v11 }
  0xbe   : > { %3940 = vmatmul.mubr.bf16.gmra.mrb[12].mxu1 %v5026_v44 }
  0xbf   : > { %4148 = vmatmul.mubr.bf16.gmra.mrb[28].mxu0 %v5222_v6  ;;  %3943 = vmatprep.mubr.bf16.mxu1 %v5046_v23 }
  0xc0   : > { %4167 = vmatprep.mubr.bf16.mxu0 %v4769_v19  ;;  %3972 = vmatpush3.bf16.msra.mxu1 %v4592_v11  ;;  %v4593_v19 = vld [vmem:[%s5390_s1 + $0x210] sm:$0xff]  }
  0xc1   : > { %3973 = vmatprep.subr.bf16.mxu1 %v4594_v55 }
  0xc4   : > { %3974 = vmatpush3.bf16.msra.mxu1 %v4594_v55 }
  0xc5   : > { %4247 = vmatprep.subr.bf16.mxu1 %v4600_v7 }
  0xc6   : > { %3944 = vmatmul.mubr.bf16.gmra.mrb[16].mxu1 %v5049_v25 }
  0xc7   : > { %4168 = vmatmul.mubr.bf16.vlgmr.msra.gmra.mrb[0].mxu0 %v4780_v27  ;;  %3947 = vmatprep.mubr.bf16.mxu1 %v5071_v40  ;;  %v4596_v27 = vld [vmem:[%s5390_s1 + $0x220] sm:$0xff]  }
  0xc8   : > { %4200 = vmatpush3.bf16.msra.mxu0 %v4589_v15  ;;  %4171 = vmatprep.mubr.bf16.mxu0 %v4808_v48  ;;  %v4597_v48 = vld [vmem:[%s5390_s1 + $0x228] sm:$0xff]  }
  0xc9   : > { %4201 = vmatprep.subr.bf16.mxu0 %v4591_v39 }
  0xcc   : > { %4202 = vmatpush3.bf16.msra.mxu0 %v4591_v39 }
  0xcd   : > { %4203 = vmatprep.subr.bf16.mxu0 %v4593_v19 }
  0xce   : > { %3948 = vmatmul.mubr.bf16.gmra.mrb[20].mxu1 %v5074_v35 }
  0xcf   : > { %4172 = vmatmul.mubr.bf16.gmra.mrb[4].mxu0 %v4819_v57  ;;  %3951 = vmatprep.mubr.bf16.mxu1 %v5090_v47  ;;  %v4598_v57 = vld [vmem:[%s5390_s1 + $0x230] sm:$0xff]  }
  0xd0   : > { %4175 = vmatprep.mubr.bf16.mxu0 %v4849_v22  ;;  %4204 = vmatpush3.bf16.msra.mxu0 %v4593_v19  ;;  %v4599_v22 = vld [vmem:[%s5390_s1 + $0x238] sm:$0xff]  }
  0xd1   : > { %4205 = vmatprep.subr.bf16.mxu0 %v4595_v8 }
  0xd4   : > { %4206 = vmatpush3.bf16.msra.mxu0 %v4595_v8 }
  0xd5   : > { %4207 = vmatprep.subr.bf16.mxu0 %v4596_v27 }
  0xd6   : > { %3952 = vmatmul.mubr.bf16.gmra.mrb[24].mxu1 %v5093_v62 }
  0xd7   : > { %4176 = vmatmul.mubr.bf16.gmra.mrb[8].mxu0 %v4858_v30  ;;  %3955 = vmatprep.mubr.bf16.mxu1 %v5113_v29  ;;  %v4601_v30 = vld [vmem:[%s5390_s1 + $0x108] sm:$0xff]  }
  0xd8   : > { %4179 = vmatprep.mubr.bf16.mxu0 %v4892_v0  ;;  %4208 = vmatpush3.bf16.msra.mxu0 %v4596_v27  ;;  %v4602_v0 = vld [vmem:[%s5390_s1 + $0x110] sm:$0xff]  }
  0xd9   : > { %4209 = vmatprep.subr.bf16.mxu0 %v4597_v48 }
  0xdc   : > { %4210 = vmatpush3.bf16.msra.mxu0 %v4597_v48 }
  0xdd   : > { %4211 = vmatprep.subr.bf16.mxu0 %v4598_v57 }
  0xde   : > { %3956 = vmatmul.mubr.bf16.gmra.mrb[28].mxu1 %v5120_v36 }
  0xdf   : > { %4180 = vmatmul.mubr.bf16.gmra.mrb[12].mxu0 %v4929_v43  ;;  %3975 = vmatprep.mubr.bf16.mxu1 %v4698_v20  ;;  %v1549_v20 = vshll.u32 %v5115_v32, 16 }
  0xe0   : > { %4183 = vmatprep.mubr.bf16.mxu0 %v4941_v52  ;;  %4212 = vmatpush3.bf16.msra.mxu0 %v4598_v57 }
  0xe1   : > { %4213 = vmatprep.subr.bf16.mxu0 %v4599_v22  ;;  %v1551_v4 = vrot.slane %v1549_v20, 1 }
  0xe4   : > { %4214 = vmatpush3.bf16.msra.mxu0 %v4599_v22 }
  0xe6   : > { %3976 = vmatmul.mubr.bf16.vlgmr.msra.gmra.mrb[0].mxu1 %v4717_v33  ;;  %v1547_v33 = vshrl.u32 %v5115_v32, 16 }
  0xe7   : > { %4184 = vmatmul.mubr.bf16.gmra.mrb[16].mxu0 %v4984_v46  ;;  %4255 = vmatpush3.bf16.msra.mxu1 %v4600_v7 }
  0xe8   : > { %3979 = vmatprep.mubr.bf16.mxu1 %v4733_v50  ;;  %4187 = vmatprep.mubr.bf16.mxu0 %v4990_v13  ;;  %v1554_v50 = vshll.u32 %v5117_v34, 16  ;;  %v1552_v15 = vor.u32 %v1551_v4, %v1547_v33  ;;  %v4603_v34 = vld [vmem:[%s5390_s1 + $0x118] sm:$0xff]  }
  0xe9   : > { %4248 = vmatprep.subr.bf16.mxu1 %v4601_v30 }
  0xea   : > { %v1556_v16 = vrot.slane %v1554_v50, 1 }
  0xeb   : > { %4256 = vmatpush3.bf16.msra.mxu1 %v4601_v30 }
  0xec   : > { %4249 = vmatprep.subr.bf16.mxu1 %v4602_v0 }
  0xee   : > { %3980 = vmatmul.mubr.bf16.gmra.mrb[4].mxu1 %v4745_v60  ;;  %v2340_v60 = vshrl.u32 %v5222_v6, 16 }
  0xef   : > { %4188 = vmatmul.mubr.bf16.gmra.mrb[20].mxu0 %v5016_v38  ;;  %3983 = vmatprep.mubr.bf16.mxu1 %v4760_v10  ;;  %v1557_v10 = vsel %vm289_vm0, %v1552_v15, %v1556_v16 }
  0xf0   : > { %4191 = vmatprep.mubr.bf16.mxu0 %v5023_v49  ;;  %4257 = vmatpush3.bf16.msra.mxu1 %v4602_v0  ;;  %v2345_v51 = vor.u32 %v2344_v26, %v2340_v60 }
  0xf1   : > { %4250 = vmatprep.subr.bf16.mxu1 %v4603_v34 }
  0xf2   : > { %v2350_v11 = vsel %vm289_vm0, %v2345_v51, %v2349_v59 }
  0xf4   : > { %4258 = vmatpush3.bf16.msra.mxu1 %v4603_v34 }
  0xf5   : > { %4251 = vmatprep.subr.bf16.mxu1 %v4604_v5 }
  0xf6   : > { %3984 = vmatmul.mubr.bf16.gmra.mrb[8].mxu1 %v4775_v24  ;;  %v4606_v24 = vld [vmem:[%s5390_s1 + $0x130] sm:$0xff]  }
  0xf7   : > { %4192 = vmatmul.mubr.bf16.gmra.mrb[24].mxu0 %v5043_v9  ;;  %3987 = vmatprep.mubr.bf16.mxu1 %v4789_v37  ;;  %v4607_v37 = vld [vmem:[%s5390_s1 + $0x138] sm:$0xff]  }
  0xf8   : > { %4195 = vmatprep.mubr.bf16.mxu0 %v1557_v10  ;;  %4259 = vmatpush3.bf16.msra.mxu1 %v4604_v5 }
  0xf9   : > { %4252 = vmatprep.subr.bf16.mxu1 %v4605_v28 }
  0xfc   : > { %4260 = vmatpush3.bf16.msra.mxu1 %v4605_v28 }
  0xfd   : > { %4253 = vmatprep.subr.bf16.mxu1 %v4606_v24 }
  0xfe   : > { %3988 = vmatmul.mubr.bf16.gmra.mrb[12].mxu1 %v4816_v56  ;;  %v2612_v56 = vrot.slane %v5222_v6, 1 }
  0xff   : > { %4196 = vmatmul.mubr.bf16.gmra.mrb[28].mxu0 %v2350_v11  ;;  %3991 = vmatprep.mubr.bf16.mxu1 %v4840_v12  ;;  %v2613_v12 = vrot.slane %v5289_v61, 1 }
 0x100   : > { %4215 = vmatprep.mubr.bf16.mxu0 %v4932_v45  ;;  %4261 = vmatpush3.bf16.msra.mxu1 %v4606_v24 }
 0x101   : > { %4254 = vmatprep.subr.bf16.mxu1 %v4607_v37 }
 0x104   : > { %4262 = vmatpush3.bf16.msra.mxu1 %v4607_v37 }
 0x106   : > { %3992 = vmatmul.mubr.bf16.gmra.mrb[16].mxu1 %v4846_v18  ;;  %v2614_v18 = vsel %vm965_vm1, %v2612_v56, %v2613_v12 }
 0x107   : > { %4216 = vmatmul.mubr.bf16.vlgmr.msra.gmra.mrb[0].mxu0 %v4955_v1  ;;  %3995 = vmatprep.mubr.bf16.mxu1 %v4889_v63 }
 0x108   : > { %4219 = vmatprep.mubr.bf16.mxu0 %v4980_v41 }
 0x10e   : > { %3996 = vmatmul.mubr.bf16.gmra.mrb[20].mxu1 %v4895_v2 }
 0x10f   : > { %4220 = vmatmul.mubr.bf16.gmra.mrb[4].mxu0 %v4998_v3  ;;  %3999 = vmatprep.mubr.bf16.mxu1 %v4945_v54 }
 0x110   : > { %4223 = vmatprep.mubr.bf16.mxu0 %v5020_v17 }
 0x116   : > { %4000 = vmatmul.mubr.bf16.gmra.mrb[24].mxu1 %v4952_v21 }
 0x117   : > { %4224 = vmatmul.mubr.bf16.gmra.mrb[8].mxu0 %v5026_v44  ;;  %4003 = vmatprep.mubr.bf16.mxu1 %v4987_v53 }
 0x118   : > { %4227 = vmatprep.mubr.bf16.mxu0 %v5046_v23 }
 0x11e   : > { %4004 = vmatmul.mubr.bf16.gmra.mrb[28].mxu1 %v5115_v32 }
 0x11f   : > { %4228 = vmatmul.mubr.bf16.gmra.mrb[12].mxu0 %v5049_v25  ;;  %4039 = vmatprep.mubr.bf16.mxu1 %v4929_v43 }
 0x120   : > { %4231 = vmatprep.mubr.bf16.mxu0 %v5071_v40 }
 0x126   : > { %4040 = vmatmul.mubr.bf16.vlgmr.msra.gmra.mrb[16].mxu1 %v4941_v52 }
 0x127   : > { %4232 = vmatmul.mubr.bf16.gmra.mrb[16].mxu0 %v5074_v35  ;;  %4043 = vmatprep.mubr.bf16.mxu1 %v4984_v46 }
 0x128   : > { %4235 = vmatprep.mubr.bf16.mxu0 %v5090_v47 }
 0x12e   : > { %4044 = vmatmul.mubr.bf16.gmra.mrb[20].mxu1 %v4990_v13 }
 0x12f   : > { %4236 = vmatmul.mubr.bf16.gmra.mrb[20].mxu0 %v5093_v62  ;;  %4047 = vmatprep.mubr.bf16.mxu1 %v5016_v38 }
 0x130   : > { %4239 = vmatprep.mubr.bf16.mxu0 %v5113_v29 }
 0x136   : > { %4048 = vmatmul.mubr.bf16.gmra.mrb[24].mxu1 %v5023_v49 }
 0x137   : > { %4240 = vmatmul.mubr.bf16.gmra.mrb[24].mxu0 %v5120_v36  ;;  %4051 = vmatprep.mubr.bf16.mxu1 %v5043_v9 }
 0x138   : > { %4243 = vmatprep.mubr.bf16.mxu0 %v5135_v58 }
 0x13e   : > { %4052 = vmatmul.mubr.bf16.gmra.mrb[28].mxu1 %v1557_v10 }
 0x13f   : > { %4244 = vmatmul.mubr.bf16.gmra.mrb[28].mxu0 %v2614_v18 }
 0x1b9   : > { %v3977_v63 = vpop.f32.mrb[0].mxu1 }
 0x1ba   : > { %v1387_v2 = vpop.f32.mrb[1].mxu1 }
 0x1bb   : > { %v3978_v43 = vpop.f32.mrb[2].mxu1 }
 0x1bc   : > { %v1390_v45 = vpop.f32.mrb[3].mxu1 }
 0x1c1   : > { %v3981_v52 = vpop.f32.mrb[4].mxu1 }
 0x1c2   : > { %v1403_v54 = vpop.f32.mrb[5].mxu1 }
 0x1c3   : > { %v3982_v21 = vpop.f32.mrb[6].mxu1 }
 0x1c4   : > { %v1406_v1 = vpop.f32.mrb[7].mxu1 }
 0x1c9   : > { %v3985_v41 = vpop.f32.mrb[8].mxu1 }
 0x1ca   : > { %v1419_v46 = vpop.f32.mrb[9].mxu1 }
 0x1cb   : > { %v3986_v53 = vpop.f32.mrb[10].mxu1 }
 0x1cc   : > { %v1422_v13 = vpop.f32.mrb[11].mxu1 }
 0x1d1   : > { %v5348_v3 = vpop.f32.mrb[12].mxu1 }
 0x1d2   : > { %v5350_v38 = vpop.f32.mrb[13].mxu1 }
 0x1d3   : > { %v5352_v17 = vpop.f32.mrb[14].mxu1 }
 0x1d4   : > { %v5354_v49 = vpop.f32.mrb[15].mxu1 }
 0x1da   : > { %v4217_v44 = vpop.f32.mrb[0].mxu0 }
 0x1db   : > { %v4263_v9 = vadd.f32 %v4217_v44, %v3977_v63  ;;  %v2715_v23 = vpop.f32.mrb[1].mxu0 }
 0x1dc   : > { %v4264_v25 = vadd.f32 %v2715_v23, %v1387_v2  ;;  %v4218_v40 = vpop.f32.mrb[2].mxu0 }
 0x1dd   : > { %v4265_v35 = vadd.f32 %v4218_v40, %v3978_v43  ;;  %v2718_v47 = vpop.f32.mrb[3].mxu0  ;;  %v3074_v55 = vmul.f32 %v4263_v9, %v4263_v9 }
 0x1de   : > { %v4266_v62 = vadd.f32 %v2718_v47, %v1390_v45  ;;  %v3072_v32 = vmul.f32 %v4264_v25, %v4264_v25 }
 0x1df   : > { %v3512_v29 = vpack.c.bf16 %v4265_v35, %v4263_v9  ;;  %v3075_v48 = vmul.f32 %v4265_v35, %v4265_v35 }
 0x1e0   : > { %v3507_v36 = vpack.c.bf16 %v4266_v62, %v4264_v25  ;;  %v3034_v58 = vadd.f32 %v4266_v62, %v4264_v25  ;;  %v3073_v6 = vmul.f32 %v4266_v62, %v4266_v62 }
 0x1e1   : > { %3584 = vst [vmem:[%s5360_s8 + $0x8] sm:$0xff] %v3512_v29  }
 0x1e2   : > { %3508 = vst [vmem:[%s5360_s8] sm:$0xff] %v3507_v36   ;;  %v3035_v39 = vadd.f32 %v4263_v9, %v3034_v58  ;;  %v3104_v7 = vadd.f32 %v3073_v6, %v3072_v32  ;;  %v4221_v19 = vpop.f32.mrb[4].mxu0 }
 0x1e3   : > { %v4267_v8 = vadd.f32 %v4221_v19, %v3981_v52  ;;  %v2731_v27 = vpop.f32.mrb[5].mxu0 }
 0x1e4   : > { %v3105_v57 = vadd.f32 %v3104_v7, %v3074_v55  ;;  %v4268_v22 = vadd.f32 %v2731_v27, %v1403_v54  ;;  %v3036_v30 = vadd.f32 %v4265_v35, %v3035_v39  ;;  %v4222_v20 = vpop.f32.mrb[6].mxu0 }
 0x1e5   : > { %v4269_v0 = vadd.f32 %v4222_v20, %v3982_v21  ;;  %v2734_v33 = vpop.f32.mrb[7].mxu0  ;;  %v3078_v26 = vmul.f32 %v4267_v8, %v4267_v8 }
 0x1e6   : > { %v3037_v4 = vadd.f32 %v4268_v22, %v3036_v30  ;;  %v3076_v50 = vmul.f32 %v4268_v22, %v4268_v22  ;;  %v3106_v31 = vadd.f32 %v3105_v57, %v3075_v48  ;;  %v4270_v61 = vadd.f32 %v2734_v33, %v1406_v1 }
 0x1e7   : > { %v3522_v14 = vpack.c.bf16 %v4269_v0, %v4267_v8  ;;  %v3079_v28 = vmul.f32 %v4269_v0, %v4269_v0 }
 0x1e8   : > { %v3107_v15 = vadd.f32 %v3106_v31, %v3076_v50  ;;  %v3517_v16 = vpack.c.bf16 %v4270_v61, %v4268_v22  ;;  %v3038_v34 = vadd.f32 %v4270_v61, %v3037_v4  ;;  %v3077_v60 = vmul.f32 %v4270_v61, %v4270_v61 }
 0x1e9   : > { %3586 = vst [vmem:[%s5360_s8 + $0x18] sm:$0xff] %v3522_v14  }
 0x1ea   : > { %3585 = vst [vmem:[%s5360_s8 + $0x10] sm:$0xff] %v3517_v16   ;;  %v3039_v42 = vadd.f32 %v4267_v8, %v3038_v34  ;;  %v3108_v10 = vadd.f32 %v3107_v15, %v3077_v60  ;;  %v4225_v5 = vpop.f32.mrb[8].mxu0 }
 0x1eb   : > { %v4271_v51 = vadd.f32 %v4225_v5, %v3985_v41  ;;  %v2747_v59 = vpop.f32.mrb[9].mxu0 }
 0x1ec   : > { %v3109_v11 = vadd.f32 %v3108_v10, %v3078_v26  ;;  %v4272_v24 = vadd.f32 %v2747_v59, %v1419_v46  ;;  %v3040_v37 = vadd.f32 %v4269_v0, %v3039_v42  ;;  %v4226_v56 = vpop.f32.mrb[10].mxu0 }
 0x1ed   : > { %v4273_v12 = vadd.f32 %v4226_v56, %v3986_v53  ;;  %v2750_v18 = vpop.f32.mrb[11].mxu0  ;;  %v3082_v41 = vmul.f32 %v4271_v51, %v4271_v51 }
 0x1ee   : > { %v3041_v63 = vadd.f32 %v4272_v24, %v3040_v37  ;;  %v3080_v2 = vmul.f32 %v4272_v24, %v4272_v24  ;;  %v3110_v43 = vadd.f32 %v3109_v11, %v3079_v28  ;;  %v4274_v45 = vadd.f32 %v2750_v18, %v1422_v13 }
 0x1ef   : > { %v3532_v52 = vpack.c.bf16 %v4273_v12, %v4271_v51  ;;  %v3083_v53 = vmul.f32 %v4273_v12, %v4273_v12 }
 0x1f0   : > { %v3111_v54 = vadd.f32 %v3110_v43, %v3080_v2  ;;  %v3527_v21 = vpack.c.bf16 %v4274_v45, %v4272_v24  ;;  %v3042_v1 = vadd.f32 %v4274_v45, %v3041_v63  ;;  %v3081_v44 = vmul.f32 %v4274_v45, %v4274_v45 }
 0x1f1   : > { %3588 = vst [vmem:[%s5360_s8 + $0x28] sm:$0xff] %v3532_v52  }
 0x1f2   : > { %3587 = vst [vmem:[%s5360_s8 + $0x20] sm:$0xff] %v3527_v21   ;;  %v3043_v9 = vadd.f32 %v4271_v51, %v3042_v1  ;;  %v3112_v23 = vadd.f32 %v3111_v54, %v3081_v44  ;;  %v4229_v46 = vpop.f32.mrb[12].mxu0 }
 0x1f3   : > { %v4275_v25 = vadd.f32 %v4229_v46, %v5348_v3  ;;  %v2763_v40 = vpop.f32.mrb[13].mxu0 }
 0x1f4   : > { %v3113_v35 = vadd.f32 %v3112_v23, %v3082_v41  ;;  %v4276_v47 = vadd.f32 %v2763_v40, %v5350_v38  ;;  %v3044_v13 = vadd.f32 %v4273_v12, %v3043_v9  ;;  %v4230_v62 = vpop.f32.mrb[14].mxu0 }
 0x1f5   : > { %v4277_v29 = vadd.f32 %v4230_v62, %v5352_v17  ;;  %v2766_v32 = vpop.f32.mrb[15].mxu0  ;;  %v3086_v48 = vmul.f32 %v4275_v25, %v4275_v25 }
 0x1f6   : > { %v3045_v36 = vadd.f32 %v4276_v47, %v3044_v13  ;;  %v3084_v58 = vmul.f32 %v4276_v47, %v4276_v47  ;;  %v3114_v6 = vadd.f32 %v3113_v35, %v3083_v53  ;;  %v4278_v55 = vadd.f32 %v2766_v32, %v5354_v49 }
 0x1f7   : > { %v3542_v39 = vpack.c.bf16 %v4277_v29, %v4275_v25  ;;  %v3087_v33 = vmul.f32 %v4277_v29, %v4277_v29 }
 0x1f8   : > { %v3115_v7 = vadd.f32 %v3114_v6, %v3084_v58  ;;  %v3537_v3 = vpack.c.bf16 %v4278_v55, %v4276_v47  ;;  %v3046_v19 = vadd.f32 %v4278_v55, %v3045_v36  ;;  %v3085_v8 = vmul.f32 %v4278_v55, %v4278_v55 }
 0x1f9   : > { %3590 = vst [vmem:[%s5360_s8 + $0x38] sm:$0xff] %v3542_v39   ;;  %v4041_v27 = vpop.f32.mrb[16].mxu1 }
 0x1fa   : > { %3589 = vst [vmem:[%s5360_s8 + $0x30] sm:$0xff] %v3537_v3   ;;  %v3047_v38 = vadd.f32 %v4275_v25, %v3046_v19  ;;  %v3116_v57 = vadd.f32 %v3115_v7, %v3085_v8  ;;  %v4233_v22 = vpop.f32.mrb[16].mxu0  ;;  %v1722_v30 = vpop.f32.mrb[17].mxu1 }
 0x1fb   : > { %v4279_v17 = vadd.f32 %v4233_v22, %v4041_v27  ;;  %v2779_v20 = vpop.f32.mrb[17].mxu0  ;;  %v4042_v0 = vpop.f32.mrb[18].mxu1 }
 0x1fc   : > { %v3117_v4 = vadd.f32 %v3116_v57, %v3086_v48  ;;  %v4280_v49 = vadd.f32 %v2779_v20, %v1722_v30  ;;  %v3048_v50 = vadd.f32 %v4277_v29, %v3047_v38  ;;  %v4234_v31 = vpop.f32.mrb[18].mxu0  ;;  %v1725_v61 = vpop.f32.mrb[19].mxu1 }
 0x1fd   : > { %v4281_v14 = vadd.f32 %v4234_v31, %v4042_v0  ;;  %v2782_v15 = vpop.f32.mrb[19].mxu0  ;;  %v3090_v11 = vmul.f32 %v4279_v17, %v4279_v17 }
 0x1fe   : > { %v3049_v16 = vadd.f32 %v4280_v49, %v3048_v50  ;;  %v3088_v34 = vmul.f32 %v4280_v49, %v4280_v49  ;;  %v3118_v60 = vadd.f32 %v3117_v4, %v3087_v33  ;;  %v4282_v26 = vadd.f32 %v2782_v15, %v1725_v61 }
 0x1ff   : > { %v3552_v42 = vpack.c.bf16 %v4281_v14, %v4279_v17  ;;  %v3091_v43 = vmul.f32 %v4281_v14, %v4281_v14 }
 0x200   : > { %v3119_v10 = vadd.f32 %v3118_v60, %v3088_v34  ;;  %v3547_v5 = vpack.c.bf16 %v4282_v26, %v4280_v49  ;;  %v3050_v51 = vadd.f32 %v4282_v26, %v3049_v16  ;;  %v3089_v59 = vmul.f32 %v4282_v26, %v4282_v26 }
 0x201   : > { %3592 = vst [vmem:[%s5360_s8 + $0x48] sm:$0xff] %v3552_v42   ;;  %v4045_v28 = vpop.f32.mrb[20].mxu1 }
 0x202   : > { %3591 = vst [vmem:[%s5360_s8 + $0x40] sm:$0xff] %v3547_v5   ;;  %v3051_v24 = vadd.f32 %v4279_v17, %v3050_v51  ;;  %v3120_v37 = vadd.f32 %v3119_v10, %v3089_v59  ;;  %v4237_v56 = vpop.f32.mrb[20].mxu0  ;;  %v1738_v12 = vpop.f32.mrb[21].mxu1 }
 0x203   : > { %v4283_v18 = vadd.f32 %v4237_v56, %v4045_v28  ;;  %v2795_v63 = vpop.f32.mrb[21].mxu0  ;;  %v4046_v2 = vpop.f32.mrb[22].mxu1 }
 0x204   : > { %v3121_v45 = vadd.f32 %v3120_v37, %v3090_v11  ;;  %v4284_v52 = vadd.f32 %v2795_v63, %v1738_v12  ;;  %v3052_v54 = vadd.f32 %v4281_v14, %v3051_v24  ;;  %v4238_v21 = vpop.f32.mrb[22].mxu0  ;;  %v1741_v1 = vpop.f32.mrb[23].mxu1 }
 0x205   : > { %v4285_v44 = vadd.f32 %v4238_v21, %v4046_v2  ;;  %v2798_v41 = vpop.f32.mrb[23].mxu0  ;;  %v3094_v29 = vmul.f32 %v4283_v18, %v4283_v18 }
 0x206   : > { %v3053_v9 = vadd.f32 %v4284_v52, %v3052_v54  ;;  %v3092_v23 = vmul.f32 %v4284_v52, %v4284_v52  ;;  %v3122_v46 = vadd.f32 %v3121_v45, %v3091_v43  ;;  %v4286_v25 = vadd.f32 %v2798_v41, %v1741_v1 }
 0x207   : > { %v3562_v40 = vpack.c.bf16 %v4285_v44, %v4283_v18  ;;  %v3095_v3 = vmul.f32 %v4285_v44, %v4285_v44 }
 0x208   : > { %v3123_v53 = vadd.f32 %v3122_v46, %v3092_v23  ;;  %v3557_v35 = vpack.c.bf16 %v4286_v25, %v4284_v52  ;;  %v3054_v47 = vadd.f32 %v4286_v25, %v3053_v9  ;;  %v3093_v13 = vmul.f32 %v4286_v25, %v4286_v25 }
 0x209   : > { %3594 = vst [vmem:[%s5360_s8 + $0x58] sm:$0xff] %v3562_v40   ;;  %v4049_v62 = vpop.f32.mrb[24].mxu1 }
 0x20a   : > { %3593 = vst [vmem:[%s5360_s8 + $0x50] sm:$0xff] %v3557_v35   ;;  %v3055_v32 = vadd.f32 %v4283_v18, %v3054_v47  ;;  %v3124_v36 = vadd.f32 %v3123_v53, %v3093_v13  ;;  %v4241_v58 = vpop.f32.mrb[24].mxu0  ;;  %v1754_v6 = vpop.f32.mrb[25].mxu1 }
 0x20b   : > { %v4287_v55 = vadd.f32 %v4241_v58, %v4049_v62  ;;  %v2811_v39 = vpop.f32.mrb[25].mxu0  ;;  %v4050_v7 = vpop.f32.mrb[26].mxu1 }
 0x20c   : > { %v3125_v19 = vadd.f32 %v3124_v36, %v3094_v29  ;;  %v4288_v8 = vadd.f32 %v2811_v39, %v1754_v6  ;;  %v3056_v27 = vadd.f32 %v4285_v44, %v3055_v32  ;;  %v4242_v48 = vpop.f32.mrb[26].mxu0  ;;  %v1757_v38 = vpop.f32.mrb[27].mxu1 }
 0x20d   : > { %v4289_v57 = vadd.f32 %v4242_v48, %v4050_v7  ;;  %v2814_v22 = vpop.f32.mrb[27].mxu0  ;;  %v3098_v14 = vmul.f32 %v4287_v55, %v4287_v55 }
 0x20e   : > { %v3057_v30 = vadd.f32 %v4288_v8, %v3056_v27  ;;  %v3096_v17 = vmul.f32 %v4288_v8, %v4288_v8  ;;  %v3126_v20 = vadd.f32 %v3125_v19, %v3095_v3  ;;  %v4290_v0 = vadd.f32 %v2814_v22, %v1757_v38 }
 0x20f   : > { %v3572_v33 = vpack.c.bf16 %v4289_v57, %v4287_v55  ;;  %v3099_v5 = vmul.f32 %v4289_v57, %v4289_v57 }
 0x210   : > { %v3127_v4 = vadd.f32 %v3126_v20, %v3096_v17  ;;  %v3567_v49 = vpack.c.bf16 %v4290_v0, %v4288_v8  ;;  %v3058_v50 = vadd.f32 %v4290_v0, %v3057_v30  ;;  %v3097_v31 = vmul.f32 %v4290_v0, %v4290_v0 }
 0x211   : > { %3596 = vst [vmem:[%s5360_s8 + $0x68] sm:$0xff] %v3572_v33   ;;  %v4053_v61 = vpop.f32.mrb[28].mxu1 }
 0x212   : > { %3595 = vst [vmem:[%s5360_s8 + $0x60] sm:$0xff] %v3567_v49   ;;  %v3059_v15 = vadd.f32 %v4287_v55, %v3058_v50  ;;  %v3128_v16 = vadd.f32 %v3127_v4, %v3097_v31  ;;  %v4245_v34 = vpop.f32.mrb[28].mxu0  ;;  %v1770_v60 = vpop.f32.mrb[29].mxu1 }
 0x213   : > { %v4291_v26 = vadd.f32 %v4245_v34, %v4053_v61  ;;  %v2827_v42 = vpop.f32.mrb[29].mxu0  ;;  %v4054_v10 = vpop.f32.mrb[30].mxu1 }
 0x214   : > { %v3129_v51 = vadd.f32 %v3128_v16, %v3098_v14  ;;  %v4292_v59 = vadd.f32 %v2827_v42, %v1770_v60  ;;  %v3060_v28 = vadd.f32 %v4289_v57, %v3059_v15  ;;  %v4246_v11 = vpop.f32.mrb[30].mxu0  ;;  %v1773_v24 = vpop.f32.mrb[31].mxu1 }
 0x215   : > { %v4293_v37 = vadd.f32 %v4246_v11, %v4054_v10  ;;  %v2830_v56 = vpop.f32.mrb[31].mxu0  ;;  %v3102_v1 = vmul.f32 %v4291_v26, %v4291_v26 }
 0x216   : > { %v3061_v12 = vadd.f32 %v4292_v59, %v3060_v28  ;;  %v3100_v18 = vmul.f32 %v4292_v59, %v4292_v59  ;;  %v3130_v63 = vadd.f32 %v3129_v51, %v3099_v5  ;;  %v4294_v2 = vadd.f32 %v2830_v56, %v1773_v24 }
 0x217   : > { %v3582_v43 = vpack.c.bf16 %v4293_v37, %v4291_v26  ;;  %v3103_v9 = vmul.f32 %v4293_v37, %v4293_v37 }
 0x218   : > { %v3131_v45 = vadd.f32 %v3130_v63, %v3100_v18  ;;  %v3577_v52 = vpack.c.bf16 %v4294_v2, %v4292_v59  ;;  %v3062_v54 = vadd.f32 %v4294_v2, %v3061_v12  ;;  %v3101_v21 = vmul.f32 %v4294_v2, %v4294_v2 }
 0x219   : > { %3598 = vst [vmem:[%s5360_s8 + $0x78] sm:$0xff] %v3582_v43  }
 0x21a   : > { %3597 = vst [vmem:[%s5360_s8 + $0x70] sm:$0xff] %v3577_v52   ;;  %v3063_v44 = vadd.f32 %v4291_v26, %v3062_v54  ;;  %v3132_v41 = vadd.f32 %v3131_v45, %v3101_v21 }
 0x21c   : > { %v3064_v23 = vadd.f32 %v4293_v37, %v3063_v44  ;;  %v3133_v46 = vadd.f32 %v3132_v41, %v3102_v1 }
 0x21e   : > { %v3065_v25 = vrot.slane %v3064_v23, 4  ;;  %v3134_v40 = vadd.f32 %v3133_v46, %v3103_v9 }
 0x220   : > { %v3066_v53 = vadd.f32 %v3065_v25, %v3064_v23  ;;  %v3135_v35 = vrot.slane %v3134_v40, 4 }
 0x222   : > { %v3067_v47 = vrot.slane %v3066_v53, 2  ;;  %v3136_v13 = vadd.f32 %v3135_v35, %v3134_v40 }
 0x224   : > { %v3068_v62 = vadd.f32 %v3067_v47, %v3066_v53  ;;  %v3137_v29 = vrot.slane %v3136_v13, 2 }
 0x226   : > { %v3069_v32 = vrot.slane %v3068_v62, 1  ;;  %v3138_v36 = vadd.f32 %v3137_v29, %v3136_v13 }
 0x228   : > { %v3070_v58 = vadd.f32 %v3069_v32, %v3068_v62  ;;  %v3139_v6 = vrot.slane %v3138_v36, 1 }
 0x22a   : > { %3071 = vst [vmem:[%s181_s15] sm:$0x1] %v3070_v58  ;;  %v3140_v55 = vadd.f32 %v3139_v6, %v3138_v36 }
 0x22c   : > { %3141 = vst [vmem:[%s181_s15 + $0x1] sm:$0x1] %v3140_v55 }
 0x22d PF: > { %s14_s12 = sadd.s32 1, %s4614_s12  }
 0x22e   : > { %p11_p4 = scmp.ge.s32.totalorder %s14_s12, 4  }
 0x230   :  { %13 = sbr.rel (!%p11_p4) target bundleno = 1 (0x1), region = 78 }

// kernel: residual_block_pallas.4
= control target key start
LH: loop header
LB: loop body
LE: loop exit
PB: predicated region body
PF: predicated region fallthrough
CT: control target
= control target key end

     0   :  { %s5037_s18 = smov 0   ;;  %s5903_s0 = inlined_call_operand.vmem [shape: bf16[2,16,16,128], index: 0, kind: input, shape index: {}]   ;;  %s5904_s1 = inlined_call_operand.vmem [shape: f32[1,128], index: 1, kind: input, shape index: {}]   ;;  %s5905_s2 = inlined_call_operand.vmem [shape: f32[1,128], index: 2, kind: input, shape index: {}]   ;;  %s5906_s3 = inlined_call_operand.vmem [shape: bf16[9,128,128], index: 3, kind: input, shape index: {}]   ;;  %s5907_s4 = inlined_call_operand.vmem [shape: bf16[2,16,16,128], index: 4, kind: output, shape index: {0}]   ;;  %s5908_s5 = inlined_call_operand.vmem [shape: f32[2,2,128], index: 5, kind: output, shape index: {1}]  }
   0x1 LB: > { %s3532_s19 = sadd.s32 4294967295, %s5004_s18   ;;  %p3536_p0 = scmp.ge.s32.totalorder %s5004_s18, 1  ;;  %s5004_s18 = sphi %s5037_s18, %s16_s18  }
   0x2   : > { %p190_p1 = scmp.lt.s32.totalorder %s5004_s18, 3 }
   0x4   : > { %p191_p2 = pnand %p3536_p0, %p190_p1 }
   0x6   : > { %194 = sbr.rel (%p191_p2) target bundleno = 576 (0x240), region = 36 }
   0xd   : > { %v4915_v0 = vld [vmem:[%s5906_s3 + $0x40] sm:$0xff]   ;;  %v5006_v2 = vmov 0.0   ;;  %v4917_v3 = vld [vmem:[%s5906_s3 + $0x48] sm:$0xff]   ;;  %p222_p3 = scmp.lt.s32.totalorder %s3532_s19, 1  ;;  %v4919_v5 = vld [vmem:[%s5906_s3 + $0x50] sm:$0xff]   ;;  %vm1269_vm1 = vcmask 1046528  }
   0xe   : > { %v4916_v1 = vld [vmem:[%s5906_s3 + $0x100] sm:$0xff]   ;;  %411 = vst [vmem:[#allocation2] sm:$0xff] %v5006_v2  ;;  %412 = vst [vmem:[#allocation2 + $0x8] sm:$0xff] %v5006_v2  ;;  %4202 = vmatprep.subr.bf16.mxu1 %v4915_v0  ;;  %v4918_v4 = vld [vmem:[%s5906_s3 + $0x108] sm:$0xff]   ;;  %vm593_vm0 = vsmask.f32 7424 }
   0xf   : > { %413 = vst [vmem:[#allocation2 + $0x10] sm:$0x3] %v5006_v2  ;;  %415 = vst [vmem:[#allocation2 + $0x198] sm:$0xff] %v5006_v2  ;;  %4394 = vmatprep.subr.bf16.mxu0 %v4916_v1  ;;  %4203 = vmatpush3.bf16.msra.mxu1 %v4915_v0  ;;  %v4920_v6 = vld [vmem:[%s5906_s3 + $0x110] sm:$0xff]   ;;  %s5922_s19 = smov (!%p222_p3, %s3532_s19), 1  ;;  %v4921_v7 = vld [vmem:[%s5906_s3 + $0x58] sm:$0xff]  }
  0x10   : > { %417 = vst [vmem:[#allocation2 + $0x1a8] sm:$0x3] %v5006_v2  ;;  %419 = vst [vmem:[#allocation2 + $0x18] sm:$0x1] %v5006_v2  ;;  %4395 = vmatpush3.bf16.msra.mxu0 %v4916_v1  ;;  %4204 = vmatprep.subr.bf16.mxu1 %v4917_v3  ;;  %v4922_v8 = vld [vmem:[%s5906_s3 + $0x118] sm:$0xff]   ;;  %s3778_s11 = sshll.u32 %s5922_s19, 7 }
  0x11   : > { %420 = vst [vmem:[#allocation2 + $0x30] sm:$0x1] %v5006_v2  ;;  %421 = vst [vmem:[#allocation2 + $0x48] sm:$0x1] %v5006_v2  ;;  %4396 = vmatprep.subr.bf16.mxu0 %v4918_v4  ;;  %v4923_v9 = vld [vmem:[%s5906_s3 + $0x60] sm:$0xff]   ;;  %s5128_s20 = scalar_lea.vmem %s5903_s0, %s3778_s11  ;;  %v4925_v11 = vld [vmem:[%s5906_s3 + $0x68] sm:$0xff]   ;;  %s5874_s16 = scalar_lea.vmem %s5907_s4, %s3778_s11 }
  0x12   : > { %422 = vst [vmem:[#allocation2 + $0x60] sm:$0x1] %v5006_v2  ;;  %423 = vst [vmem:[#allocation2 + $0x78] sm:$0x1] %v5006_v2  ;;  %v4924_v10 = vld [vmem:[%s5906_s3 + $0x120] sm:$0xff]   ;;  %v4926_v15 = vld [vmem:[%s5906_s3 + $0x128] sm:$0xff]  }
  0x13   : > { %424 = vst [vmem:[#allocation2 + $0x90] sm:$0x1] %v5006_v2  ;;  %425 = vst [vmem:[#allocation2 + $0xa8] sm:$0x1] %v5006_v2  ;;  %4205 = vmatpush3.bf16.msra.mxu1 %v4917_v3  ;;  %v3813_v14 = vld [vmem:[%s5128_s20] sm:$0xff]   ;;  %v3956_v22 = vld [vmem:[%s5128_s20 + $0x8] sm:$0xff]  }
  0x14   : > { %426 = vst [vmem:[#allocation2 + $0xc0] sm:$0x1] %v5006_v2  ;;  %427 = vst [vmem:[#allocation2 + $0xd8] sm:$0x1] %v5006_v2  ;;  %4397 = vmatpush3.bf16.msra.mxu0 %v4918_v4  ;;  %4206 = vmatprep.subr.bf16.mxu1 %v4919_v5  ;;  %v3814_v18 = vunpack.c.l.bf16 %v3813_v14  ;;  %v3815_v19 = vunpack.c.h.bf16 %v3813_v14  ;;  %v5145_v20 = vld [vmem:[%s5904_s1] ss:$0 sm:$0xff]  ;;  %v3818_v29 = vunpack.c.l.bf16 %v3956_v22  ;;  %v3819_v30 = vunpack.c.h.bf16 %v3956_v22 }
  0x15   : > { %428 = vst [vmem:[#allocation2 + $0xf0] sm:$0x1] %v5006_v2  ;;  %429 = vst [vmem:[#allocation2 + $0x108] sm:$0x1] %v5006_v2  ;;  %4398 = vmatprep.subr.bf16.mxu0 %v4920_v6  ;;  %v5150_v21 = vld [vmem:[%s5905_s2] ss:$0 sm:$0xff] }
  0x16   : > { %430 = vst [vmem:[#allocation2 + $0x120] sm:$0x1] %v5006_v2  ;;  %431 = vst [vmem:[#allocation2 + $0x138] sm:$0x1] %v5006_v2  ;;  %v4927_v23 = vld [vmem:[%s5906_s3 + $0x70] sm:$0xff]   ;;  %v308_v27 = vmul.f32 %v3814_v18, %v5145_v20  ;;  %v309_v28 = vmul.f32 %v3815_v19, %v5145_v20  ;;  %v310_v37 = vmul.f32 %v3818_v29, %v5145_v20  ;;  %v3958_v40 = vld [vmem:[%s5128_s20 + $0x18] sm:$0xff]  }
  0x17   : > { %432 = vst [vmem:[#allocation2 + $0x150] sm:$0x1] %v5006_v2  ;;  %433 = vst [vmem:[#allocation2 + $0x168] sm:$0x1] %v5006_v2  ;;  %4207 = vmatpush3.bf16.msra.mxu1 %v4919_v5  ;;  %v4928_v31 = vld [vmem:[%s5906_s3 + $0x130] sm:$0xff]   ;;  %v311_v38 = vmul.f32 %v3819_v30, %v5145_v20  ;;  %v4929_v41 = vld [vmem:[%s5906_s3 + $0x78] sm:$0xff]   ;;  %v3826_v45 = vunpack.c.l.bf16 %v3958_v40  ;;  %v3827_v53 = vunpack.c.h.bf16 %v3958_v40 }
  0x18   : > { %434 = vst [vmem:[#allocation2 + $0x180] sm:$0x1] %v5006_v2  ;;  %437 = vst [vmem:[#allocation2 + $0x29] sm:$0x1] %v5006_v2  ;;  %4399 = vmatpush3.bf16.msra.mxu0 %v4920_v6  ;;  %4208 = vmatprep.subr.bf16.mxu1 %v4921_v7  ;;  %v347_v34 = vadd.f32 %v5150_v21, %v308_v27  ;;  %v3957_v35 = vld [vmem:[%s5128_s20 + $0x10] sm:$0xff]   ;;  %v348_v36 = vadd.f32 %v5150_v21, %v309_v28  ;;  %v4930_v46 = vld [vmem:[%s5906_s3 + $0x138] sm:$0xff]  }
  0x19   : > { %438 = vst [vmem:[#allocation2 + $0x41] sm:$0x1] %v5006_v2  ;;  %439 = vst [vmem:[#allocation2 + $0x59] sm:$0x1] %v5006_v2  ;;  %4400 = vmatprep.subr.bf16.mxu0 %v4922_v8  ;;  %v3822_v39 = vunpack.c.l.bf16 %v3957_v35  ;;  %v3823_v44 = vunpack.c.h.bf16 %v3957_v35  ;;  %v349_v48 = vadd.f32 %v5150_v21, %v310_v37  ;;  %v350_v49 = vadd.f32 %v5150_v21, %v311_v38  ;;  %v3959_v55 = vld [vmem:[%s5128_s20 + $0x20] sm:$0xff]   ;;  %v3960_v60 = vld [vmem:[%s5128_s20 + $0x28] sm:$0xff]  }
  0x1a   : > { %440 = vst [vmem:[#allocation2 + $0x71] sm:$0x1] %v5006_v2  ;;  %441 = vst [vmem:[#allocation2 + $0x89] sm:$0x1] %v5006_v2  ;;  %v379_v43 = vmax.f32 %v347_v34, 0.0  ;;  %v380_v47 = vmax.f32 %v348_v36, 0.0  ;;  %v314_v54 = vmul.f32 %v3826_v45, %v5145_v20  ;;  %v3830_v59 = vunpack.c.l.bf16 %v3959_v55 }
  0x1b   : > { %442 = vst [vmem:[#allocation2 + $0xa1] sm:$0x1] %v5006_v2  ;;  %443 = vst [vmem:[#allocation2 + $0xb9] sm:$0x1] %v5006_v2  ;;  %4209 = vmatpush3.bf16.msra.mxu1 %v4921_v7  ;;  %v312_v50 = vmul.f32 %v3822_v39, %v5145_v20  ;;  %v313_v52 = vmul.f32 %v3823_v44, %v5145_v20  ;;  %v381_v56 = vmax.f32 %v349_v48, 0.0  ;;  %v382_v57 = vmax.f32 %v350_v49, 0.0 }
  0x1c   : > { %444 = vst [vmem:[#allocation2 + $0xd1] sm:$0x1] %v5006_v2  ;;  %445 = vst [vmem:[#allocation2 + $0xe9] sm:$0x1] %v5006_v2  ;;  %4401 = vmatpush3.bf16.msra.mxu0 %v4922_v8  ;;  %4210 = vmatprep.subr.bf16.mxu1 %v4923_v9  ;;  %v5188_v61 = vld [vmem:[%s5906_s3] sm:$0xff]   ;;  %v315_v63 = vmul.f32 %v3827_v53, %v5145_v20  ;;  %v353_v0 = vadd.f32 %v5150_v21, %v314_v54  ;;  %v3831_v1 = vunpack.c.h.bf16 %v3959_v55  ;;  %v3961_v7 = vld [vmem:[%s5128_s20 + $0x30] sm:$0xff]  }
  0x1d   : > { %446 = vst [vmem:[#allocation2 + $0x101] sm:$0x1] %v5006_v2  ;;  %447 = vst [vmem:[#allocation2 + $0x119] sm:$0x1] %v5006_v2  ;;  %4402 = vmatprep.subr.bf16.mxu0 %v4924_v10  ;;  %v351_v58 = vadd.f32 %v5150_v21, %v312_v50  ;;  %v352_v62 = vadd.f32 %v5150_v21, %v313_v52  ;;  %v316_v4 = vmul.f32 %v3830_v59, %v5145_v20  ;;  %v3962_v18 = vld [vmem:[%s5128_s20 + $0x38] sm:$0xff]   ;;  %s3541_s11 = sshll.u32 %s5922_s19, 1 }
  0x1e   : > { %448 = vst [vmem:[#allocation2 + $0x131] sm:$0x1] %v5006_v2  ;;  %449 = vst [vmem:[#allocation2 + $0x149] sm:$0x1] %v5006_v2  ;;  %v3834_v5 = vunpack.c.l.bf16 %v3960_v60  ;;  %v3835_v6 = vunpack.c.h.bf16 %v3960_v60  ;;  %v3843_v34 = vunpack.c.h.bf16 %v3962_v18  ;;  %s235_s22 = scalar_lea.vmem %s5908_s5, %s3541_s11 }
  0x1f   : > { %450 = vst [vmem:[#allocation2 + $0x161] sm:$0x1] %v5006_v2  ;;  %451 = vst [vmem:[#allocation2 + $0x179] sm:$0x1] %v5006_v2  ;;  %4211 = vmatpush3.bf16.msra.mxu1 %v4923_v9  ;;  %v383_v3 = vmax.f32 %v351_v58, 0.0  ;;  %v384_v8 = vmax.f32 %v352_v62, 0.0  ;;  %v354_v9 = vadd.f32 %v5150_v21, %v315_v63 }
  0x20   : > { %452 = vst [vmem:[#allocation2 + $0x191] sm:$0x1] %v5006_v2  ;;  %418 = vst [vmem:[#allocation2] sm:$0x1] %v5006_v2  ;;  %4403 = vmatpush3.bf16.msra.mxu0 %v4924_v10  ;;  %4212 = vmatprep.subr.bf16.mxu1 %v4925_v11  ;;  %v385_v10 = vmax.f32 %v353_v0, 0.0  ;;  %v319_v14 = vmul.f32 %v3835_v6, %v5145_v20  ;;  %v323_v45 = vmul.f32 %v3843_v34, %v5145_v20 }
  0x21   : > { %436 = vst [vmem:[#allocation2 + $0x11] sm:$0x1] %v5006_v2  ;;  %435 = vst [vmem:[#allocation2 + $0x198] sm:$0x1] %v5006_v2  ;;  %4404 = vmatprep.subr.bf16.mxu0 %v4926_v15  ;;  %v386_v19 = vmax.f32 %v354_v9, 0.0 }
  0x22   : > { %453 = vst [vmem:[#allocation2 + $0x1a9] sm:$0x1] %v5006_v2  ;;  %455 = vst [vmem:[#allocation2 + $0x19] sm:$0xff] %v379_v43  ;;  %v358_v28 = vadd.f32 %v5150_v21, %v319_v14  ;;  %v362_v55 = vadd.f32 %v5150_v21, %v323_v45 }
  0x23   : > { %4213 = vmatpush3.bf16.msra.mxu1 %v4925_v11  ;;  %456 = vst [vmem:[#allocation2 + $0x21] sm:$0xff] %v380_v47  ;;  %457 = vst [vmem:[#allocation2 + $0x31] sm:$0xff] %v381_v56  ;;  %v317_v11 = vmul.f32 %v3831_v1, %v5145_v20 }
  0x24   : > { %4405 = vmatpush3.bf16.msra.mxu0 %v4926_v15  ;;  %4214 = vmatprep.subr.bf16.mxu1 %v4927_v23  ;;  %458 = vst [vmem:[#allocation2 + $0x39] sm:$0xff] %v382_v57  ;;  %459 = vst [vmem:[#allocation2 + $0x49] sm:$0xff] %v383_v3  ;;  %v3838_v15 = vunpack.c.l.bf16 %v3961_v7  ;;  %v390_v39 = vmax.f32 %v358_v28, 0.0 }
  0x25   : > { %4406 = vmatprep.subr.bf16.mxu0 %v4928_v31  ;;  %460 = vst [vmem:[#allocation2 + $0x51] sm:$0xff] %v384_v8  ;;  %461 = vst [vmem:[#allocation2 + $0x61] sm:$0xff] %v385_v10  ;;  %v356_v22 = vadd.f32 %v5150_v21, %v317_v11  ;;  %v4934_v8 = vld [vmem:[%s5906_s3 + $0x8] sm:$0xff]  }
  0x26   : > { %v320_v29 = vmul.f32 %v3838_v15, %v5145_v20  ;;  %462 = vst [vmem:[#allocation2 + $0x69] sm:$0xff] %v386_v19  ;;  %466 = vst [vmem:[#allocation2 + $0x99] sm:$0xff] %v390_v39 }
  0x27   : > { %v487_v12 = vld [vmem:[#allocation2] sm:$0xff]  ;;  %4215 = vmatpush3.bf16.msra.mxu1 %v4927_v23  ;;  %v3839_v23 = vunpack.c.h.bf16 %v3961_v7 }
  0x28   : > { %v489_v13 = vld [vmem:[#allocation2 + $0x10] sm:$0x3]  ;;  %v5138_v16 = vpack.c.bf16 %v5006_v2, %v487_v12  ;;  %4407 = vmatpush3.bf16.msra.mxu0 %v4928_v31  ;;  %4216 = vmatprep.subr.bf16.mxu1 %v4929_v41  ;;  %v5196_v2 = vld [vmem:[%s5906_s3 + $0x140] sm:$0xff]   ;;  %v355_v12 = vadd.f32 %v5150_v21, %v316_v4  ;;  %v359_v43 = vadd.f32 %v5150_v21, %v320_v29  ;;  %v394_v4 = vmax.f32 %v362_v55, 0.0 }
  0x29   : > { %v5140_v17 = vpack.c.bf16 %v489_v13, %v489_v13  ;;  %4408 = vmatprep.subr.bf16.mxu0 %v4930_v46  ;;  %v318_v13 = vmul.f32 %v3834_v5, %v5145_v20 }
  0x2a   : > { %v595_v24 = vshrl.u32 %v5138_v16, 16  ;;  %v597_v25 = vshll.u32 %v5138_v16, 16  ;;  %v491_v30 = vld [vmem:[#allocation2 + $0x20] sm:$0xff]  ;;  %v492_v31 = vld [vmem:[#allocation2 + $0x28] sm:$0x3]  ;;  %v493_v40 = vld [vmem:[#allocation2 + $0x30] sm:$0xff] }
  0x2b   : > { %v602_v26 = vshll.u32 %v5140_v17, 16  ;;  %4217 = vmatpush3.bf16.msra.mxu1 %v4929_v41  ;;  %v357_v27 = vadd.f32 %v5150_v21, %v318_v13  ;;  %v5216_v37 = vpack.c.bf16 %v492_v31, %v492_v31  ;;  %v494_v41 = vld [vmem:[#allocation2 + $0x38] sm:$0xff]  ;;  %v496_v52 = vld [vmem:[#allocation2 + $0x48] sm:$0xff]  ;;  %v391_v53 = vmax.f32 %v359_v43, 0.0  ;;  %470 = vst [vmem:[#allocation2 + $0xc9] sm:$0xff] %v394_v4 }
  0x2c   : > { %v599_v32 = vrot.slane %v597_v25, 1  ;;  %4409 = vmatpush3.bf16.msra.mxu0 %v4930_v46  ;;  %v490_v25 = vld [vmem:[#allocation2 + $0x18] sm:$0xff]  ;;  %4250 = vmatprep.subr.bf16.mxu1 %v5188_v61  ;;  %v5225_v50 = vpack.c.bf16 %v494_v41, %v493_v40  ;;  %v497_v60 = vld [vmem:[#allocation2 + $0x50] sm:$0xff]  ;;  %v499_v62 = vld [vmem:[#allocation2 + $0x60] sm:$0xff] }
  0x2d   : > { %v604_v33 = vrot.slane %v602_v26, 1  ;;  %v387_v26 = vmax.f32 %v355_v12, 0.0  ;;  %4442 = vmatprep.subr.bf16.mxu0 %v5196_v2  ;;  %v5214_v36 = vpack.c.bf16 %v491_v30, %v490_v25  ;;  %v389_v38 = vmax.f32 %v357_v27, 0.0  ;;  %v498_v0 = vld [vmem:[#allocation2 + $0x58] sm:$0x3]  ;;  %467 = vst [vmem:[#allocation2 + $0xa9] sm:$0xff] %v391_v53 }
  0x2e   : > { %v600_v42 = vor.u32 %v599_v32, %v595_v24  ;;  %v3842_v24 = vunpack.c.l.bf16 %v3962_v18  ;;  %v388_v32 = vmax.f32 %v356_v22, 0.0  ;;  %v614_v49 = vshll.u32 %v5216_v37, 16  ;;  %v500_v9 = vld [vmem:[#allocation2 + $0x68] sm:$0xff]  ;;  %v501_v10 = vld [vmem:[#allocation2 + $0x70] sm:$0x3] }
  0x2f   : > { %463 = vst [vmem:[#allocation2 + $0x79] sm:$0xff] %v387_v26  ;;  %v607_v47 = vshrl.u32 %v5214_v36, 16  ;;  %v609_v48 = vshll.u32 %v5214_v36, 16  ;;  %465 = vst [vmem:[#allocation2 + $0x91] sm:$0xff] %v389_v38  ;;  %v619_v58 = vshrl.u32 %v5225_v50, 16  ;;  %v621_v59 = vshll.u32 %v5225_v50, 16 }
  0x30   : > { %v605_v51 = vsel %vm593_vm0, %v600_v42, %v604_v33  ;;  %v321_v33 = vmul.f32 %v3839_v23, %v5145_v20  ;;  %v322_v35 = vmul.f32 %v3842_v24, %v5145_v20  ;;  %v495_v42 = vld [vmem:[#allocation2 + $0x40] sm:$0x3]  ;;  %464 = vst [vmem:[#allocation2 + $0x81] sm:$0xff] %v388_v32  ;;  %v616_v57 = vrot.slane %v614_v49, 1  ;;  %v4933_v26 = vld [vmem:[%s5906_s3 + $0x148] sm:$0xff]  }
  0x31   : > { %4218 = vmatprep.mubr.bf16.mxu1 %v605_v51  ;;  %v5227_v51 = vpack.c.bf16 %v495_v42, %v495_v42  ;;  %v611_v56 = vrot.slane %v609_v48, 1  ;;  %v5233_v1 = vpack.c.bf16 %v497_v60, %v496_v52  ;;  %v623_v6 = vrot.slane %v621_v59, 1  ;;  %v507_v39 = vld [vmem:[#allocation2 + $0xa0] sm:$0x3] }
  0x32   : > { %v360_v44 = vadd.f32 %v5150_v21, %v321_v33  ;;  %v361_v46 = vadd.f32 %v5150_v21, %v322_v35  ;;  %v5235_v7 = vpack.c.bf16 %v498_v0, %v498_v0  ;;  %v5242_v14 = vpack.c.bf16 %v500_v9, %v499_v62 }
  0x33   : > { %v626_v63 = vshll.u32 %v5227_v51, 16  ;;  %v612_v5 = vor.u32 %v611_v56, %v607_v47  ;;  %v631_v12 = vshrl.u32 %v5233_v1, 16  ;;  %v633_v13 = vshll.u32 %v5233_v1, 16 }
  0x34   : > { %v392_v54 = vmax.f32 %v360_v44, 0.0  ;;  %v393_v3 = vmax.f32 %v361_v46, 0.0  ;;  %v624_v19 = vor.u32 %v623_v6, %v619_v58  ;;  %v638_v22 = vshll.u32 %v5235_v7, 16  ;;  %v508_v48 = vld [vmem:[#allocation2 + $0xa8] sm:$0xff]  ;;  %v513_v6 = vld [vmem:[#allocation2 + $0xd0] sm:$0x3] }
  0x35   : > { %v628_v11 = vrot.slane %v626_v63, 1  ;;  %v617_v18 = vsel %vm593_vm0, %v612_v5, %v616_v57  ;;  %v5246_v23 = vpack.c.bf16 %v501_v10, %v501_v10  ;;  %v635_v27 = vrot.slane %v633_v13, 1  ;;  %v4940_v5 = vld [vmem:[%s5906_s3 + $0x18] sm:$0xff]  }
  0x36   : > { %468 = vst [vmem:[#allocation2 + $0xb1] sm:$0xff] %v392_v54  ;;  %v502_v15 = vld [vmem:[#allocation2 + $0x78] sm:$0xff]  ;;  %469 = vst [vmem:[#allocation2 + $0xc1] sm:$0xff] %v393_v3  ;;  %4410 = vmatprep.mubr.bf16.mxu0 %v617_v18  ;;  %4219 = vmatmul.mubr.bf16.vlgmr.msra.gmra.mrb[0].mxu1 %v617_v18  ;;  %v643_v28 = vshrl.u32 %v5242_v14, 16  ;;  %v645_v29 = vshll.u32 %v5242_v14, 16  ;;  %v505_v31 = vld [vmem:[#allocation2 + $0x90] sm:$0xff]  ;;  %v5273_v47 = vpack.c.bf16 %v507_v39, %v507_v39 }
  0x37   : > { %v503_v24 = vld [vmem:[#allocation2 + $0x80] sm:$0xff]  ;;  %v504_v25 = vld [vmem:[#allocation2 + $0x88] sm:$0x3]  ;;  %v506_v32 = vld [vmem:[#allocation2 + $0x98] sm:$0xff]  ;;  %v5256_v33 = vsel %vm593_vm0, %v624_v19, %v628_v11  ;;  %4251 = vmatpush3.bf16.msra.mxu1 %v5188_v61  ;;  %v640_v34 = vrot.slane %v638_v22, 1  ;;  %v650_v35 = vshll.u32 %v5246_v23, 16  ;;  %v636_v40 = vor.u32 %v635_v27, %v631_v12 }
  0x38   : > { %v5253_v30 = vpack.c.bf16 %v503_v24, %v502_v15  ;;  %v5260_v38 = vpack.c.bf16 %v504_v25, %v504_v25  ;;  %4411 = vmatmul.mubr.bf16.vlgmr.msra.gmra.mrb[0].mxu0 %v5256_v33  ;;  %4222 = vmatprep.mubr.bf16.mxu1 %v5256_v33  ;;  %v647_v41 = vrot.slane %v645_v29, 1  ;;  %v4937_v61 = vld [vmem:[%s5906_s3 + $0x10] sm:$0xff]   ;;  %v5271_v46 = vpack.c.bf16 %v506_v32, %v505_v31  ;;  %v3963_v12 = vld [vmem:[%s5128_s20 + $0x40] sm:$0xff]   ;;  %v4936_v13 = vld [vmem:[%s5906_s3 + $0x158] sm:$0xff]  }
  0x39   : > { %4443 = vmatpush3.bf16.msra.mxu0 %v5196_v2  ;;  %4252 = vmatprep.subr.bf16.mxu1 %v4934_v8  ;;  %v652_v44 = vrot.slane %v650_v35, 1  ;;  %v5276_v53 = vsel %vm593_vm0, %v636_v40, %v640_v34  ;;  %v4935_v2 = vld [vmem:[%s5906_s3 + $0x150] sm:$0xff]   ;;  %v674_v3 = vshll.u32 %v5273_v47, 16  ;;  %v5309_v22 = vpack.c.bf16 %v513_v6, %v513_v6  ;;  %v4943_v25 = vld [vmem:[%s5906_s3 + $0x20] sm:$0xff]   ;;  %v3964_v29 = vld [vmem:[%s5128_s20 + $0x48] sm:$0xff]  }
  0x3a   : > { %v655_v42 = vshrl.u32 %v5253_v30, 16  ;;  %v657_v43 = vshll.u32 %v5253_v30, 16  ;;  %v662_v45 = vshll.u32 %v5260_v38, 16  ;;  %4444 = vmatprep.subr.bf16.mxu0 %v4933_v26  ;;  %v648_v54 = vor.u32 %v647_v41, %v643_v28  ;;  %4414 = vmatprep.mubr.bf16.mxu0 %v5276_v53  ;;  %v4938_v31 = vld [vmem:[%s5906_s3 + $0x160] sm:$0xff]   ;;  %v3966_v6 = vld [vmem:[%s5128_s20 + $0x58] sm:$0xff]  }
  0x3b   : > { %4253 = vmatpush3.bf16.msra.mxu1 %v4934_v8  ;;  %v667_v58 = vshrl.u32 %v5271_v46, 16  ;;  %v669_v59 = vshll.u32 %v5271_v46, 16  ;;  %v676_v27 = vrot.slane %v674_v3, 1  ;;  %v3846_v28 = vunpack.c.l.bf16 %v3963_v12 }
  0x3c   : > { %v659_v55 = vrot.slane %v657_v43, 1  ;;  %v664_v57 = vrot.slane %v662_v45, 1  ;;  %v5287_v63 = vsel %vm593_vm0, %v648_v54, %v652_v44  ;;  %4254 = vmatprep.subr.bf16.mxu1 %v4937_v61  ;;  %v3847_v35 = vunpack.c.h.bf16 %v3963_v12  ;;  %v3965_v43 = vld [vmem:[%s5128_s20 + $0x50] sm:$0xff]   ;;  %v3967_v12 = vld [vmem:[%s5128_s20 + $0x60] sm:$0xff]  }
  0x3d   : > { %v509_v49 = vld [vmem:[#allocation2 + $0xb0] sm:$0xff]  ;;  %v510_v52 = vld [vmem:[#allocation2 + $0xb8] sm:$0x3]  ;;  %v511_v60 = vld [vmem:[#allocation2 + $0xc0] sm:$0xff]  ;;  %4445 = vmatpush3.bf16.msra.mxu0 %v4933_v26  ;;  %v671_v8 = vrot.slane %v669_v59, 1  ;;  %v1273_v40 = vrot.slane %v5214_v36, 1  ;;  %v3854_v3 = vunpack.c.l.bf16 %v3965_v43 }
  0x3e   : > { %v5281_v56 = vpack.c.bf16 %v509_v49, %v508_v48  ;;  %v512_v62 = vld [vmem:[#allocation2 + $0xc8] sm:$0xff]  ;;  %v660_v0 = vor.u32 %v659_v55, %v655_v42  ;;  %v5290_v4 = vpack.c.bf16 %v510_v52, %v510_v52  ;;  %4223 = vmatmul.mubr.bf16.gmra.mrb[4].mxu1 %v5276_v53  ;;  %4446 = vmatprep.subr.bf16.mxu0 %v4935_v2  ;;  %v1274_v41 = vrot.slane %v5216_v37, 1 }
  0x3f   : > { %v5297_v11 = vpack.c.bf16 %v512_v62, %v511_v60  ;;  %4226 = vmatprep.mubr.bf16.mxu1 %v5287_v63  ;;  %4255 = vmatpush3.bf16.msra.mxu1 %v4937_v61  ;;  %v672_v26 = vor.u32 %v671_v8, %v667_v58  ;;  %v324_v42 = vmul.f32 %v3846_v28, %v5145_v20  ;;  %v698_v44 = vshll.u32 %v5309_v22, 16  ;;  %v4939_v55 = vld [vmem:[%s5906_s3 + $0x168] sm:$0xff]  }
  0x40   : > { %v679_v9 = vshrl.u32 %v5281_v56, 16  ;;  %v681_v10 = vshll.u32 %v5281_v56, 16  ;;  %v5305_v15 = vsel %vm593_vm0, %v660_v0, %v664_v57  ;;  %v686_v18 = vshll.u32 %v5290_v4, 16  ;;  %4415 = vmatmul.mubr.bf16.gmra.mrb[4].mxu0 %v5287_v63  ;;  %4256 = vmatprep.subr.bf16.mxu1 %v4940_v5 }
  0x41   : > { %v693_v24 = vshll.u32 %v5297_v11, 16  ;;  %4447 = vmatpush3.bf16.msra.mxu0 %v4935_v2  ;;  %4418 = vmatprep.mubr.bf16.mxu0 %v5305_v15  ;;  %v691_v39 = vshrl.u32 %v5297_v11, 16  ;;  %v325_v45 = vmul.f32 %v3847_v35, %v5145_v20  ;;  %v3850_v48 = vunpack.c.l.bf16 %v3964_v29  ;;  %v4945_v2 = vld [vmem:[%s5906_s3 + $0x28] sm:$0xff]  }
  0x42   : > { %v683_v19 = vrot.slane %v681_v10, 1  ;;  %v688_v34 = vrot.slane %v686_v18, 1  ;;  %4448 = vmatprep.subr.bf16.mxu0 %v4936_v13  ;;  %v5329_v49 = vsel %vm593_vm0, %v672_v26, %v676_v27  ;;  %v363_v52 = vadd.f32 %v5150_v21, %v324_v42 }
  0x43   : > { %v695_v61 = vrot.slane %v693_v24, 1  ;;  %4257 = vmatpush3.bf16.msra.mxu1 %v4940_v5  ;;  %v1276_v54 = vrot.slane %v5225_v50, 1  ;;  %v3851_v37 = vunpack.c.h.bf16 %v3964_v29  ;;  %v364_v58 = vadd.f32 %v5150_v21, %v325_v45  ;;  %v4947_v24 = vld [vmem:[%s5906_s3 + $0x30] sm:$0xff]  }
  0x44   : > { %v684_v32 = vor.u32 %v683_v19, %v679_v9  ;;  %4258 = vmatprep.subr.bf16.mxu1 %v4943_v25  ;;  %v1277_v59 = vrot.slane %v5227_v51, 1  ;;  %v326_v60 = vmul.f32 %v3850_v48, %v5145_v20  ;;  %v395_v62 = vmax.f32 %v363_v52, 0.0  ;;  %v4941_v29 = vld [vmem:[%s5906_s3 + $0x170] sm:$0xff]  }
  0x45   : > { %4449 = vmatpush3.bf16.msra.mxu0 %v4936_v13  ;;  %v327_v0 = vmul.f32 %v3851_v37, %v5145_v20  ;;  %v3855_v5 = vunpack.c.h.bf16 %v3965_v43  ;;  %v696_v8 = vor.u32 %v695_v61, %v691_v39  ;;  %v396_v9 = vmax.f32 %v364_v58, 0.0  ;;  %v3968_v43 = vld [vmem:[%s5128_s20 + $0x68] sm:$0xff]  }
  0x46   : > { %v5340_v57 = vsel %vm593_vm0, %v684_v32, %v688_v34  ;;  %4227 = vmatmul.mubr.bf16.gmra.mrb[8].mxu1 %v5305_v15  ;;  %4450 = vmatprep.subr.bf16.mxu0 %v4938_v31  ;;  %v365_v10 = vadd.f32 %v5150_v21, %v326_v60  ;;  %v700_v51 = vrot.slane %v698_v44, 1  ;;  %471 = vst [vmem:[#allocation2 + $0xd9] sm:$0xff] %v395_v62  ;;  %v3858_v27 = vunpack.c.l.bf16 %v3966_v6  ;;  %v5380_v44 = vld [vmem:[%s5906_s3 + $0x178] sm:$0xff]  }
  0x47   : > { %4230 = vmatprep.mubr.bf16.mxu1 %v5329_v49  ;;  %4259 = vmatpush3.bf16.msra.mxu1 %v4943_v25  ;;  %v366_v13 = vadd.f32 %v5150_v21, %v327_v0  ;;  %v328_v18 = vmul.f32 %v3854_v3, %v5145_v20  ;;  %v329_v19 = vmul.f32 %v3855_v5, %v5145_v20  ;;  %v3859_v28 = vunpack.c.h.bf16 %v3966_v6  ;;  %v4949_v60 = vld [vmem:[%s5906_s3 + $0x38] sm:$0xff]   ;;  %v5398_v3 = vld [vmem:[%s5906_s3 + $0x80] sm:$0xff]  }
  0x48   : > { %4419 = vmatmul.mubr.bf16.gmra.mrb[8].mxu0 %v5329_v49  ;;  %4260 = vmatprep.subr.bf16.mxu1 %v4945_v2  ;;  %v5360_v25 = vsel %vm1269_vm1, %v1273_v40, %v1274_v41  ;;  %472 = vst [vmem:[#allocation2 + $0xe1] sm:$0xff] %v396_v9  ;;  %v397_v26 = vmax.f32 %v365_v10, 0.0  ;;  %v5366_v32 = vsel %vm1269_vm1, %v1276_v54, %v1277_v59  ;;  %v1279_v39 = vrot.slane %v5233_v1, 1  ;;  %v5387_v59 = vld [vmem:[%s5128_s20 + $0x70] sm:$0xff]  }
  0x49   : > { %4451 = vmatpush3.bf16.msra.mxu0 %v4938_v31  ;;  %4422 = vmatprep.mubr.bf16.mxu0 %v5340_v57  ;;  %v398_v34 = vmax.f32 %v366_v13, 0.0  ;;  %v367_v31 = vadd.f32 %v5150_v21, %v328_v18  ;;  %v368_v35 = vadd.f32 %v5150_v21, %v329_v19  ;;  %v330_v40 = vmul.f32 %v3858_v27, %v5145_v20 }
  0x4a   : > { %4452 = vmatprep.subr.bf16.mxu0 %v4939_v55  ;;  %473 = vst [vmem:[#allocation2 + $0xf1] sm:$0xff] %v397_v26  ;;  %v331_v41 = vmul.f32 %v3859_v28, %v5145_v20  ;;  %v3862_v42 = vunpack.c.l.bf16 %v3967_v12  ;;  %v5375_v61 = vsel %vm593_vm0, %v696_v8, %v700_v51  ;;  %v3863_v52 = vunpack.c.h.bf16 %v3967_v12 }
  0x4b   : > { %4261 = vmatpush3.bf16.msra.mxu1 %v4945_v2  ;;  %474 = vst [vmem:[#allocation2 + $0xf9] sm:$0xff] %v398_v34  ;;  %v399_v45 = vmax.f32 %v367_v31, 0.0  ;;  %v400_v48 = vmax.f32 %v368_v35, 0.0  ;;  %v1280_v54 = vrot.slane %v5235_v7, 1  ;;  %v369_v37 = vadd.f32 %v5150_v21, %v330_v40 }
  0x4c   : > { %4262 = vmatprep.subr.bf16.mxu1 %v4947_v24  ;;  %v370_v2 = vadd.f32 %v5150_v21, %v331_v41  ;;  %v332_v58 = vmul.f32 %v3862_v42, %v5145_v20  ;;  %v333_v7 = vmul.f32 %v3863_v52, %v5145_v20  ;;  %v3866_v62 = vunpack.c.l.bf16 %v3968_v43 }
  0x4d   : > { %4453 = vmatpush3.bf16.msra.mxu0 %v4939_v55  ;;  %475 = vst [vmem:[#allocation2 + $0x109] sm:$0xff] %v399_v45  ;;  %476 = vst [vmem:[#allocation2 + $0x111] sm:$0xff] %v400_v48  ;;  %v1282_v55 = vrot.slane %v5242_v14, 1  ;;  %v3867_v0 = vunpack.c.h.bf16 %v3968_v43  ;;  %v514_v5 = vld [vmem:[#allocation2 + $0xd8] sm:$0xff]  ;;  %v1283_v6 = vrot.slane %v5246_v23, 1  ;;  %v401_v8 = vmax.f32 %v369_v37, 0.0 }
  0x4e   : > { %4231 = vmatmul.mubr.bf16.gmra.mrb[12].mxu1 %v5340_v57  ;;  %4454 = vmatprep.subr.bf16.mxu0 %v4941_v29  ;;  %v402_v9 = vmax.f32 %v370_v2, 0.0  ;;  %v371_v10 = vadd.f32 %v5150_v21, %v332_v58  ;;  %v1285_v13 = vrot.slane %v5253_v30, 1  ;;  %v372_v18 = vadd.f32 %v5150_v21, %v333_v7 }
  0x4f   : > { %4234 = vmatprep.mubr.bf16.mxu1 %v5375_v61  ;;  %4263 = vmatpush3.bf16.msra.mxu1 %v4947_v24  ;;  %v515_v12 = vld [vmem:[#allocation2 + $0xe0] sm:$0xff]  ;;  %v516_v51 = vld [vmem:[#allocation2 + $0xe8] sm:$0x3]  ;;  %v334_v19 = vmul.f32 %v3866_v62, %v5145_v20  ;;  %v335_v26 = vmul.f32 %v3867_v0, %v5145_v20  ;;  %477 = vst [vmem:[#allocation2 + $0x121] sm:$0xff] %v401_v8  ;;  %v1286_v34 = vrot.slane %v5260_v38, 1  ;;  %v3870_v42 = vunpack.c.l.bf16 %v5387_v59  ;;  %v4950_v38 = vld [vmem:[%s5906_s3 + $0x198] sm:$0xff]  }
  0x50   : > { %4423 = vmatmul.mubr.bf16.gmra.mrb[12].mxu0 %v5375_v61  ;;  %v5409_v27 = vpack.c.bf16 %v515_v12, %v514_v5  ;;  %v5411_v28 = vpack.c.bf16 %v516_v51, %v516_v51  ;;  %v4944_v24 = vld [vmem:[%s5906_s3 + $0x180] sm:$0xff]   ;;  %478 = vst [vmem:[#allocation2 + $0x129] sm:$0xff] %v402_v9  ;;  %v403_v31 = vmax.f32 %v371_v10, 0.0  ;;  %v404_v40 = vmax.f32 %v372_v18, 0.0  ;;  %4264 = vmatprep.subr.bf16.mxu1 %v4949_v60 }
  0x51   : > { %4455 = vmatpush3.bf16.msra.mxu0 %v4941_v29  ;;  %4458 = vmatprep.mubr.bf16.mxu0 %v5360_v25  ;;  %v517_v35 = vld [vmem:[#allocation2 + $0xf0] sm:$0xff]  ;;  %v373_v29 = vadd.f32 %v5150_v21, %v334_v19  ;;  %v374_v41 = vadd.f32 %v5150_v21, %v335_v26  ;;  %v5427_v2 = vsel %vm1269_vm1, %v1279_v39, %v1280_v54  ;;  %v3871_v39 = vunpack.c.h.bf16 %v5387_v59 }
  0x52   : > { %4456 = vmatprep.subr.bf16.mxu0 %v5380_v44  ;;  %v703_v43 = vshrl.u32 %v5409_v27, 16  ;;  %v705_v45 = vshll.u32 %v5409_v27, 16  ;;  %v710_v48 = vshll.u32 %v5411_v28, 16  ;;  %v518_v52 = vld [vmem:[#allocation2 + $0xf8] sm:$0xff]  ;;  %v519_v37 = vld [vmem:[#allocation2 + $0x100] sm:$0x3]  ;;  %v336_v54 = vmul.f32 %v3870_v42, %v5145_v20 }
  0x53   : > { %479 = vst [vmem:[#allocation2 + $0x139] sm:$0xff] %v403_v31  ;;  %4265 = vmatpush3.bf16.msra.mxu1 %v4949_v60  ;;  %v5429_v58 = vpack.c.bf16 %v518_v52, %v517_v35  ;;  %v5431_v7 = vpack.c.bf16 %v519_v37, %v519_v37  ;;  %480 = vst [vmem:[#allocation2 + $0x141] sm:$0xff] %v404_v40  ;;  %v405_v62 = vmax.f32 %v373_v29, 0.0  ;;  %v406_v0 = vmax.f32 %v374_v41, 0.0 }
  0x54   : > { %4298 = vmatprep.subr.bf16.mxu1 %v5398_v3  ;;  %v707_v5 = vrot.slane %v705_v45, 1  ;;  %v712_v8 = vrot.slane %v710_v48, 1  ;;  %v520_v9 = vld [vmem:[#allocation2 + $0x108] sm:$0xff]  ;;  %v521_v10 = vld [vmem:[#allocation2 + $0x110] sm:$0xff]  ;;  %v522_v12 = vld [vmem:[#allocation2 + $0x118] sm:$0x3]  ;;  %v337_v59 = vmul.f32 %v3871_v39, %v5145_v20  ;;  %v375_v35 = vadd.f32 %v5150_v21, %v336_v54 }
  0x55   : > { %4457 = vmatpush3.bf16.msra.mxu0 %v5380_v44  ;;  %v715_v60 = vshrl.u32 %v5429_v58, 16  ;;  %v717_v51 = vshll.u32 %v5429_v58, 16  ;;  %v722_v18 = vshll.u32 %v5431_v7, 16  ;;  %v5440_v19 = vpack.c.bf16 %v521_v10, %v520_v9  ;;  %v4946_v44 = vld [vmem:[%s5906_s3 + $0x188] sm:$0xff]   ;;  %481 = vst [vmem:[#allocation2 + $0x151] sm:$0xff] %v405_v62  ;;  %482 = vst [vmem:[#allocation2 + $0x159] sm:$0xff] %v406_v0 }
  0x56   : > { %4490 = vmatprep.subr.bf16.mxu0 %v4944_v24  ;;  %v708_v26 = vor.u32 %v707_v5, %v703_v43  ;;  %v5445_v31 = vpack.c.bf16 %v522_v12, %v522_v12  ;;  %v523_v45 = vld [vmem:[#allocation2 + $0x120] sm:$0xff]  ;;  %v376_v62 = vadd.f32 %v5150_v21, %v337_v59  ;;  %v5471_v21 = vsel %vm1269_vm1, %v1282_v55, %v1283_v6 }
  0x57   : > { %v719_v40 = vrot.slane %v717_v51, 1  ;;  %v724_v29 = vrot.slane %v722_v18, 1  ;;  %v727_v41 = vshrl.u32 %v5440_v19, 16  ;;  %v729_v42 = vshll.u32 %v5440_v19, 16  ;;  %v524_v48 = vld [vmem:[#allocation2 + $0x128] sm:$0xff] }
  0x58   : > { %4459 = vmatmul.mubr.bf16.vlgmr.msra.gmra.mrb[0].mxu0 %v5366_v32  ;;  %v5453_v52 = vsel %vm593_vm0, %v708_v26, %v712_v8  ;;  %v734_v20 = vshll.u32 %v5445_v31, 16  ;;  %v525_v43 = vld [vmem:[#allocation2 + $0x130] sm:$0x3]  ;;  %v5457_v37 = vpack.c.bf16 %v524_v48, %v523_v45  ;;  %v407_v8 = vmax.f32 %v375_v35, 0.0 }
  0x59   : > { %4491 = vmatpush3.bf16.msra.mxu0 %v4944_v24  ;;  %4462 = vmatprep.mubr.bf16.mxu0 %v5427_v2  ;;  %v720_v0 = vor.u32 %v719_v40, %v715_v60  ;;  %v731_v5 = vrot.slane %v729_v42, 1  ;;  %v5461_v9 = vpack.c.bf16 %v525_v43, %v525_v43  ;;  %v4948_v24 = vld [vmem:[%s5906_s3 + $0x190] sm:$0xff]   ;;  %v5487_v55 = vsel %vm1269_vm1, %v1285_v13, %v1286_v34 }
  0x5a   : > { %4235 = vmatmul.mubr.bf16.gmra.mrb[16].mxu1 %v5453_v52  ;;  %4492 = vmatprep.subr.bf16.mxu0 %v4946_v44  ;;  %v526_v10 = vld [vmem:[#allocation2 + $0x138] sm:$0xff]  ;;  %v736_v12 = vrot.slane %v734_v20, 1  ;;  %v739_v39 = vshrl.u32 %v5457_v37, 16  ;;  %v741_v54 = vshll.u32 %v5457_v37, 16  ;;  %v527_v60 = vld [vmem:[#allocation2 + $0x140] sm:$0xff]  ;;  %483 = vst [vmem:[#allocation2 + $0x169] sm:$0xff] %v407_v8 }
  0x5b   : > { %v528_v51 = vld [vmem:[#allocation2 + $0x148] sm:$0x3]  ;;  %v5476_v18 = vsel %vm593_vm0, %v720_v0, %v724_v29  ;;  %v732_v26 = vor.u32 %v731_v5, %v727_v41  ;;  %v746_v59 = vshll.u32 %v5461_v9, 16  ;;  %v5479_v35 = vpack.c.bf16 %v527_v60, %v526_v10  ;;  %v4952_v8 = vld [vmem:[%s5906_s3 + $0x1a0] sm:$0xff]  }
  0x5c   : > { %4238 = vmatprep.mubr.bf16.mxu1 %v5476_v18  ;;  %v743_v23 = vrot.slane %v741_v54, 1  ;;  %v5489_v6 = vpack.c.bf16 %v528_v51, %v528_v51  ;;  %v529_v40 = vld [vmem:[#allocation2 + $0x150] sm:$0xff]  ;;  %v530_v29 = vld [vmem:[#allocation2 + $0x158] sm:$0xff]  ;;  %v531_v41 = vld [vmem:[#allocation2 + $0x160] sm:$0x3]  ;;  %v408_v42 = vmax.f32 %v376_v62, 0.0 }
  0x5d   : > { %4493 = vmatpush3.bf16.msra.mxu0 %v4946_v44  ;;  %v5492_v45 = vsel %vm593_vm0, %v732_v26, %v736_v12  ;;  %v748_v48 = vrot.slane %v746_v59, 1  ;;  %v751_v44 = vshrl.u32 %v5479_v35, 16  ;;  %v753_v20 = vshll.u32 %v5479_v35, 16  ;;  %v3970_v51 = vld [vmem:[%s5128_s20 + $0x78] sm:$0xff]  }
  0x5e   : > { %5915 = vst [vmem:[#allocation3_spill] sm:$0xff] %v5492_v45  ;;  %4494 = vmatprep.subr.bf16.mxu0 %v4948_v24  ;;  %v744_v13 = vor.u32 %v743_v23, %v739_v39  ;;  %v758_v34 = vshll.u32 %v5489_v6, 16  ;;  %v5500_v43 = vpack.c.bf16 %v530_v29, %v529_v40  ;;  %v5502_v62 = vpack.c.bf16 %v531_v41, %v531_v41 }
  0x5f   : > { %484 = vst [vmem:[#allocation2 + $0x171] sm:$0xff] %v408_v42  ;;  %v755_v0 = vrot.slane %v753_v20, 1  ;;  %v1288_v5 = vrot.slane %v5271_v46, 1  ;;  %v1289_v10 = vrot.slane %v5273_v47, 1  ;;  %v1291_v60 = vrot.slane %v5281_v56, 1 }
  0x60   : > { %4463 = vmatmul.mubr.bf16.gmra.mrb[4].mxu0 %v5471_v21  ;;  %v5511_v12 = vsel %vm593_vm0, %v744_v13, %v748_v48  ;;  %v763_v39 = vshrl.u32 %v5500_v43, 16  ;;  %v765_v54 = vshll.u32 %v5500_v43, 16  ;;  %v770_v47 = vshll.u32 %v5502_v62, 16 }
  0x61   : > { %5916 = vst [vmem:[#allocation4_spill] sm:$0xff] %v5511_v12  ;;  %4466 = vmatprep.mubr.bf16.mxu0 %v5487_v55  ;;  %4495 = vmatpush3.bf16.msra.mxu0 %v4948_v24  ;;  %v1292_v26 = vrot.slane %v5290_v4, 1  ;;  %v756_v59 = vor.u32 %v755_v0, %v751_v44  ;;  %v760_v23 = vrot.slane %v758_v34, 1  ;;  %v532_v29 = vld [vmem:[#allocation2 + $0x168] sm:$0xff]  ;;  %v3874_v41 = vunpack.c.l.bf16 %v3970_v51 }
  0x62   : > { %4239 = vmatmul.mubr.bf16.gmra.mrb[20].mxu1 %v5492_v45  ;;  %4496 = vmatprep.subr.bf16.mxu0 %v4950_v38  ;;  %v767_v40 = vrot.slane %v765_v54, 1  ;;  %v772_v24 = vrot.slane %v770_v47, 1  ;;  %v3875_v42 = vunpack.c.h.bf16 %v3970_v51  ;;  %v5523_v48 = vsel %vm1269_vm1, %v1288_v5, %v1289_v10  ;;  %v4954_v44 = vld [vmem:[%s5906_s3 + $0x1a8] sm:$0xff]   ;;  %v4956_v10 = vld [vmem:[%s5906_s3 + $0x1b0] sm:$0xff]  }
  0x63   : > { %4242 = vmatprep.mubr.bf16.mxu1 %v5511_v12  ;;  %v5526_v13 = vsel %vm1269_vm1, %v1291_v60, %v1292_v26  ;;  %v5532_v34 = vsel %vm593_vm0, %v756_v59, %v760_v23  ;;  %v1294_v5 = vrot.slane %v5297_v11, 1  ;;  %v1295_v59 = vrot.slane %v5309_v22, 1 }
  0x64   : > { %v768_v20 = vor.u32 %v767_v40, %v763_v39  ;;  %5917 = vst [vmem:[#allocation5_spill] sm:$0xff] %v5532_v34  ;;  %v4987_v39 = vld [vmem:[%s5904_s1] ss:$0 sm:$0xff]  ;;  %v1297_v23 = vrot.slane %v5409_v27, 1  ;;  %v1298_v40 = vrot.slane %v5411_v28, 1  ;;  %v1301_v12 = vrot.slane %v5431_v7, 1 }
  0x65   : > { %4497 = vmatpush3.bf16.msra.mxu0 %v4950_v38  ;;  %v338_v60 = vmul.f32 %v4987_v39, %v3874_v41  ;;  %v5565_v28 = vsel %vm1269_vm1, %v1294_v5, %v1295_v59  ;;  %v1303_v5 = vrot.slane %v5440_v19, 1  ;;  %v1304_v7 = vrot.slane %v5445_v31, 1  ;;  %v4953_v31 = vld [vmem:[%s5906_s3 + $0x88] sm:$0xff]   ;;  %v4955_v59 = vld [vmem:[%s5906_s3 + $0x90] sm:$0xff]  }
  0x66   : > { %v533_v45 = vld [vmem:[#allocation2 + $0x170] sm:$0xff]  ;;  %v534_v4 = vld [vmem:[#allocation2 + $0x178] sm:$0x3]  ;;  %4498 = vmatprep.subr.bf16.mxu0 %v4952_v8  ;;  %v5540_v38 = vsel %vm593_vm0, %v768_v20, %v772_v24  ;;  %v4988_v24 = vld [vmem:[%s5905_s2] ss:$0 sm:$0xff] }
  0x67   : > { %v5534_v0 = vpack.c.bf16 %v533_v45, %v532_v29  ;;  %v5536_v54 = vpack.c.bf16 %v534_v4, %v534_v4  ;;  %v339_v45 = vmul.f32 %v4987_v39, %v3875_v42  ;;  %v377_v29 = vadd.f32 %v4988_v24, %v338_v60 }
  0x68   : > { %4467 = vmatmul.mubr.bf16.gmra.mrb[8].mxu0 %v5523_v48  ;;  %v5570_v60 = vsel %vm1269_vm1, %v1297_v23, %v1298_v40  ;;  %v1313_v40 = vrot.slane %v5502_v62, 1 }
  0x69   : > { %4470 = vmatprep.mubr.bf16.mxu0 %v5526_v13  ;;  %v775_v51 = vshrl.u32 %v5534_v0, 16  ;;  %v777_v47 = vshll.u32 %v5534_v0, 16  ;;  %v782_v26 = vshll.u32 %v5536_v54, 16  ;;  %4499 = vmatpush3.bf16.msra.mxu0 %v4952_v8  ;;  %v378_v41 = vadd.f32 %v4988_v24, %v339_v45  ;;  %v4958_v8 = vld [vmem:[%s5906_s3 + $0x1b8] sm:$0xff]  }
  0x6a   : > { %4243 = vmatmul.mubr.bf16.gmra.mrb[24].mxu1 %v5532_v34  ;;  %4500 = vmatprep.subr.bf16.mxu0 %v4954_v44  ;;  %v409_v4 = vmax.f32 %v377_v29, 0.0  ;;  %v1300_v34 = vrot.slane %v5429_v58, 1  ;;  %v1315_v24 = vrot.slane %v5534_v0, 1  ;;  %v1316_v29 = vrot.slane %v5536_v54, 1 }
  0x6b   : > { %4246 = vmatprep.mubr.bf16.mxu1 %v5540_v38  ;;  %v779_v42 = vrot.slane %v777_v47, 1  ;;  %v784_v20 = vrot.slane %v782_v26, 1  ;;  %v410_v22 = vmax.f32 %v378_v41, 0.0  ;;  %v1306_v47 = vrot.slane %v5457_v37, 1 }
  0x6c   : > { %485 = vst [vmem:[#allocation2 + $0x181] sm:$0xff] %v409_v4  ;;  %v1307_v26 = vrot.slane %v5461_v9, 1  ;;  %v4959_v4 = vld [vmem:[%s5906_s3 + $0xa0] sm:$0xff]   ;;  %v5636_v54 = vsel %vm1269_vm1, %v1315_v24, %v1316_v29  ;;  %v1270_v24 = vrot.slane %v5138_v16, 1  ;;  %v1271_v29 = vrot.slane %v5140_v17, 1  ;;  %v4969_v17 = vld [vmem:[%s5906_s3 + $0xc8] sm:$0xff]  }
  0x6d   : > { %v780_v39 = vor.u32 %v779_v42, %v775_v51  ;;  %4501 = vmatpush3.bf16.msra.mxu0 %v4954_v44  ;;  %486 = vst [vmem:[#allocation2 + $0x189] sm:$0xff] %v410_v22  ;;  %v5583_v44 = vld [vmem:[%s5906_s3 + $0x1c0] sm:$0xff]   ;;  %v5587_v51 = vsel %vm1269_vm1, %v1300_v34, %v1301_v12  ;;  %v1309_v12 = vrot.slane %v5479_v35, 1  ;;  %v1310_v34 = vrot.slane %v5489_v6, 1 }
  0x6e   : > { %4502 = vmatprep.subr.bf16.mxu0 %v4956_v10  ;;  %v5609_v23 = vsel %vm1269_vm1, %v1306_v47, %v1307_v26  ;;  %v1312_v6 = vrot.slane %v5500_v43, 1  ;;  %v4965_v26 = vld [vmem:[%s5906_s3 + $0xb8] sm:$0xff]  }
  0x6f   : > { %v5573_v45 = vsel %vm593_vm0, %v780_v39, %v784_v20  ;;  %v5612_v9 = vsel %vm1269_vm1, %v1309_v12, %v1310_v34  ;;  %v4961_v39 = vld [vmem:[%s5906_s3 + $0xa8] sm:$0xff]   ;;  %v4967_v12 = vld [vmem:[%s5906_s3 + $0xc0] sm:$0xff]  }
  0x70   : > { %4471 = vmatmul.mubr.bf16.gmra.mrb[12].mxu0 %v5565_v28  ;;  %v5629_v22 = vsel %vm1269_vm1, %v1312_v6, %v1313_v40  ;;  %v4962_v34 = vld [vmem:[%s5906_s3 + $0x1c8] sm:$0xff]   ;;  %v4972_v40 = vld [vmem:[%s5906_s3 + $0x1f0] sm:$0xff]  }
  0x71   : > { %4474 = vmatprep.mubr.bf16.mxu0 %v5570_v60  ;;  %4503 = vmatpush3.bf16.msra.mxu0 %v4956_v10  ;;  %v5590_v10 = vsel %vm1269_vm1, %v1303_v5, %v1304_v7  ;;  %v4970_v6 = vld [vmem:[%s5906_s3 + $0x1e8] sm:$0xff]  }
  0x72   : > { %4247 = vmatmul.mubr.bf16.gmra.mrb[28].mxu1 %v5573_v45  ;;  %4504 = vmatprep.subr.bf16.mxu0 %v4958_v8 }
  0x73   : > { %4266 = vmatprep.mubr.bf16.mxu1 %v5138_v16  ;;  %v535_v41 = vld [vmem:[#allocation2 + $0x180] sm:$0xff] }
  0x74   : > { %v536_v42 = vld [vmem:[#allocation2 + $0x188] sm:$0xff]  ;;  %v537_v20 = vld [vmem:[#allocation2 + $0x190] sm:$0x3]  ;;  %v4976_v16 = vld [vmem:[%s5906_s3 + $0x200] sm:$0xff]  }
  0x75   : > { %4505 = vmatpush3.bf16.msra.mxu0 %v4958_v8  ;;  %v5631_v62 = vpack.c.bf16 %v536_v42, %v535_v41  ;;  %v5633_v8 = vpack.c.bf16 %v537_v20, %v537_v20  ;;  %v4974_v41 = vld [vmem:[%s5906_s3 + $0x1f8] sm:$0xff]   ;;  %v1272_v42 = vsel %vm1269_vm1, %v1270_v24, %v1271_v29  ;;  %v4971_v20 = vld [vmem:[%s5906_s3 + $0xd0] sm:$0xff]   ;;  %v540_v29 = vld [vmem:[#allocation2 + $0x1a8] sm:$0x3] }
  0x76   : > { %4538 = vmatprep.subr.bf16.mxu0 %v5583_v44 }
  0x77   : > { %v2123_v5 = vrot.slane %v5631_v62, 1  ;;  %v2124_v7 = vrot.slane %v5633_v8, 1  ;;  %v1858_v24 = vshll.u32 %v5633_v8, 16  ;;  %v4993_v8 = vld [vmem:[%s5906_s3 + $0x118] sm:$0xff]  }
  0x78   : > { %4475 = vmatmul.mubr.bf16.gmra.mrb[16].mxu0 %v5587_v51 }
  0x79   : > { %4478 = vmatprep.mubr.bf16.mxu0 %v5590_v10  ;;  %v5651_v47 = vsel %vm1269_vm1, %v2123_v5, %v2124_v7  ;;  %v538_v5 = vld [vmem:[#allocation2 + $0x198] sm:$0xff]  ;;  %v4989_v7 = vld [vmem:[#allocation2 + $0x8] sm:$0xff] }
  0x7a   : > { %4267 = vmatmul.mubr.bf16.vlgmr.msra.gmra.mrb[0].mxu1 %v5214_v36 }
  0x7b   : > { %4299 = vmatpush3.bf16.msra.mxu1 %v5398_v3  ;;  %4270 = vmatprep.mubr.bf16.mxu1 %v5225_v50  ;;  %v4957_v3 = vld [vmem:[%s5906_s3 + $0x98] sm:$0xff]  }
  0x7c   : > { %4300 = vmatprep.subr.bf16.mxu1 %v4953_v31 }
  0x7f   : > { %4301 = vmatpush3.bf16.msra.mxu1 %v4953_v31  ;;  %v4963_v31 = vld [vmem:[%s5906_s3 + $0xb0] sm:$0xff]  }
  0x80   : > { %4479 = vmatmul.mubr.bf16.gmra.mrb[20].mxu0 %v5609_v23  ;;  %4302 = vmatprep.subr.bf16.mxu1 %v4955_v59 }
  0x81   : > { %4482 = vmatprep.mubr.bf16.mxu0 %v5612_v9 }
  0x82   : > { %4271 = vmatmul.mubr.bf16.gmra.mrb[4].mxu1 %v5233_v1 }
  0x83   : > { %4274 = vmatprep.mubr.bf16.mxu1 %v5242_v14  ;;  %4303 = vmatpush3.bf16.msra.mxu1 %v4955_v59  ;;  %v4964_v59 = vld [vmem:[%s5906_s3 + $0x1d0] sm:$0xff]  }
  0x84   : > { %4304 = vmatprep.subr.bf16.mxu1 %v4957_v3 }
  0x87   : > { %4305 = vmatpush3.bf16.msra.mxu1 %v4957_v3  ;;  %v4966_v3 = vld [vmem:[%s5906_s3 + $0x1d8] sm:$0xff]  }
  0x88   : > { %4483 = vmatmul.mubr.bf16.gmra.mrb[24].mxu0 %v5629_v22  ;;  %4306 = vmatprep.subr.bf16.mxu1 %v4959_v4 }
  0x89   : > { %4486 = vmatprep.mubr.bf16.mxu0 %v5636_v54 }
  0x8a   : > { %4275 = vmatmul.mubr.bf16.gmra.mrb[8].mxu1 %v5253_v30 }
  0x8b   : > { %4278 = vmatprep.mubr.bf16.mxu1 %v5271_v46  ;;  %4307 = vmatpush3.bf16.msra.mxu1 %v4959_v4  ;;  %v4973_v4 = vld [vmem:[%s5906_s3 + $0xd8] sm:$0xff]  }
  0x8c   : > { %4308 = vmatprep.subr.bf16.mxu1 %v4961_v39 }
  0x8f   : > { %4309 = vmatpush3.bf16.msra.mxu1 %v4961_v39  ;;  %v4977_v39 = vld [vmem:[%s5906_s3 + $0xe8] sm:$0xff]  }
  0x90   : > { %4487 = vmatmul.mubr.bf16.gmra.mrb[28].mxu0 %v5651_v47  ;;  %4310 = vmatprep.subr.bf16.mxu1 %v4963_v31 }
  0x91   : > { %4506 = vmatprep.mubr.bf16.mxu0 %v5225_v50 }
  0x92   : > { %4279 = vmatmul.mubr.bf16.gmra.mrb[12].mxu1 %v5281_v56 }
  0x93   : > { %4282 = vmatprep.mubr.bf16.mxu1 %v5297_v11  ;;  %4311 = vmatpush3.bf16.msra.mxu1 %v4963_v31  ;;  %v5733_v31 = vpack.c.bf16 %v4989_v7, %v538_v5  ;;  %v4995_v7 = vld [vmem:[%s5906_s3 + $0x128] sm:$0xff]  }
  0x94   : > { %4312 = vmatprep.subr.bf16.mxu1 %v4965_v26 }
  0x97   : > { %4313 = vmatpush3.bf16.msra.mxu1 %v4965_v26  ;;  %v4979_v26 = vld [vmem:[%s5906_s3 + $0xf0] sm:$0xff]  }
  0x98   : > { %4507 = vmatmul.mubr.bf16.vlgmr.msra.gmra.mrb[0].mxu0 %v5233_v1  ;;  %4346 = vmatprep.subr.bf16.mxu1 %v4967_v12 }
  0x99   : > { %4539 = vmatpush3.bf16.msra.mxu0 %v5583_v44  ;;  %4510 = vmatprep.mubr.bf16.mxu0 %v5242_v14  ;;  %v4968_v44 = vld [vmem:[%s5906_s3 + $0x1e0] sm:$0xff]  }
  0x9a   : > { %4283 = vmatmul.mubr.bf16.gmra.mrb[16].mxu1 %v5409_v27  ;;  %4540 = vmatprep.subr.bf16.mxu0 %v4962_v34 }
  0x9b   : > { %4286 = vmatprep.mubr.bf16.mxu1 %v5429_v58 }
  0x9d   : > { %4541 = vmatpush3.bf16.msra.mxu0 %v4962_v34  ;;  %v4978_v34 = vld [vmem:[%s5906_s3 + $0x208] sm:$0xff]  }
  0x9e   : > { %4542 = vmatprep.subr.bf16.mxu0 %v4964_v59 }
  0xa0   : > { %4511 = vmatmul.mubr.bf16.gmra.mrb[4].mxu0 %v5253_v30 }
  0xa1   : > { %4514 = vmatprep.mubr.bf16.mxu0 %v5271_v46  ;;  %4543 = vmatpush3.bf16.msra.mxu0 %v4964_v59  ;;  %v4990_v59 = vld [vmem:[%s5906_s3 + $0x100] sm:$0xff]  }
  0xa2   : > { %4287 = vmatmul.mubr.bf16.gmra.mrb[20].mxu1 %v5440_v19  ;;  %4544 = vmatprep.subr.bf16.mxu0 %v4966_v3 }
  0xa3   : > { %4290 = vmatprep.mubr.bf16.mxu1 %v5457_v37 }
  0xa5   : > { %4545 = vmatpush3.bf16.msra.mxu0 %v4966_v3  ;;  %v4984_v3 = vld [vmem:[%s5906_s3 + $0x228] sm:$0xff]  }
  0xa6   : > { %4546 = vmatprep.subr.bf16.mxu0 %v4968_v44 }
  0xa8   : > { %4515 = vmatmul.mubr.bf16.gmra.mrb[8].mxu0 %v5281_v56 }
  0xa9   : > { %4518 = vmatprep.mubr.bf16.mxu0 %v5297_v11  ;;  %4547 = vmatpush3.bf16.msra.mxu0 %v4968_v44  ;;  %v1853_v44 = vshll.u32 %v5631_v62, 16 }
  0xaa   : > { %4291 = vmatmul.mubr.bf16.gmra.mrb[24].mxu1 %v5479_v35  ;;  %4548 = vmatprep.subr.bf16.mxu0 %v4970_v6 }
  0xab   : > { %4294 = vmatprep.mubr.bf16.mxu1 %v5500_v43 }
  0xad   : > { %4549 = vmatpush3.bf16.msra.mxu0 %v4970_v6  ;;  %v4991_v6 = vld [vmem:[%s5906_s3 + $0x108] sm:$0xff]  }
  0xae   : > { %4550 = vmatprep.subr.bf16.mxu0 %v4972_v40 }
  0xb0   : > { %4519 = vmatmul.mubr.bf16.gmra.mrb[12].mxu0 %v5409_v27 }
  0xb1   : > { %4522 = vmatprep.mubr.bf16.mxu0 %v5429_v58  ;;  %4551 = vmatpush3.bf16.msra.mxu0 %v4972_v40  ;;  %v1851_v40 = vshrl.u32 %v5631_v62, 16 }
  0xb2   : > { %4295 = vmatmul.mubr.bf16.gmra.mrb[28].mxu1 %v5534_v0  ;;  %4552 = vmatprep.subr.bf16.mxu0 %v4974_v41 }
  0xb3   : > { %4314 = vmatprep.mubr.bf16.mxu1 %v1272_v42  ;;  %v2646_v42 = vshll.u32 %v5733_v31, 16 }
  0xb5   : > { %4553 = vmatpush3.bf16.msra.mxu0 %v4974_v41  ;;  %v5920_v41 = vld [vmem:[#allocation5_spill] sm:$0xff] }
  0xb6   : > { %4586 = vmatprep.subr.bf16.mxu0 %v4976_v16 }
  0xb8   : > { %4523 = vmatmul.mubr.bf16.gmra.mrb[16].mxu0 %v5440_v19 }
  0xb9   : > { %4526 = vmatprep.mubr.bf16.mxu0 %v5457_v37 }
  0xba   : > { %4315 = vmatmul.mubr.bf16.vlgmr.msra.gmra.mrb[0].mxu1 %v5360_v25  ;;  %v4975_v25 = vld [vmem:[%s5906_s3 + $0xe0] sm:$0xff]  }
  0xbb   : > { %4347 = vmatpush3.bf16.msra.mxu1 %v4967_v12  ;;  %4318 = vmatprep.mubr.bf16.mxu1 %v5366_v32  ;;  %v4981_v12 = vld [vmem:[%s5906_s3 + $0xf8] sm:$0xff]  }
  0xbc   : > { %4348 = vmatprep.subr.bf16.mxu1 %v4969_v17 }
  0xbf   : > { %4349 = vmatpush3.bf16.msra.mxu1 %v4969_v17  ;;  %v1860_v17 = vrot.slane %v1858_v24, 1 }
  0xc0   : > { %4527 = vmatmul.mubr.bf16.gmra.mrb[20].mxu0 %v5479_v35  ;;  %4350 = vmatprep.subr.bf16.mxu1 %v4971_v20 }
  0xc1   : > { %4530 = vmatprep.mubr.bf16.mxu0 %v5500_v43 }
  0xc2   : > { %4319 = vmatmul.mubr.bf16.gmra.mrb[4].mxu1 %v5427_v2 }
  0xc3   : > { %4322 = vmatprep.mubr.bf16.mxu1 %v5471_v21  ;;  %4351 = vmatpush3.bf16.msra.mxu1 %v4971_v20  ;;  %v2644_v20 = vshrl.u32 %v5733_v31, 16 }
  0xc4   : > { %4352 = vmatprep.subr.bf16.mxu1 %v4973_v4 }
  0xc7   : > { %4353 = vmatpush3.bf16.msra.mxu1 %v4973_v4  ;;  %v2648_v4 = vrot.slane %v2646_v42, 1 }
  0xc8   : > { %4531 = vmatmul.mubr.bf16.gmra.mrb[24].mxu0 %v5534_v0  ;;  %4354 = vmatprep.subr.bf16.mxu1 %v4975_v25 }
  0xc9   : > { %4534 = vmatprep.mubr.bf16.mxu0 %v5631_v62 }
  0xca   : > { %4323 = vmatmul.mubr.bf16.gmra.mrb[8].mxu1 %v5487_v55 }
  0xcb   : > { %4326 = vmatprep.mubr.bf16.mxu1 %v5523_v48  ;;  %4355 = vmatpush3.bf16.msra.mxu1 %v4975_v25 }
  0xcc   : > { %4356 = vmatprep.subr.bf16.mxu1 %v4977_v39 }
  0xcf   : > { %4357 = vmatpush3.bf16.msra.mxu1 %v4977_v39 }
  0xd0   : > { %4535 = vmatmul.mubr.bf16.gmra.mrb[28].mxu0 %v5733_v31  ;;  %4358 = vmatprep.subr.bf16.mxu1 %v4979_v26 }
  0xd1   : > { %4554 = vmatprep.mubr.bf16.mxu0 %v5256_v33  ;;  %v4980_v33 = vld [vmem:[%s5906_s3 + $0x210] sm:$0xff]  }
  0xd2   : > { %4327 = vmatmul.mubr.bf16.gmra.mrb[12].mxu1 %v5526_v13 }
  0xd3   : > { %4330 = vmatprep.mubr.bf16.mxu1 %v5565_v28  ;;  %4359 = vmatpush3.bf16.msra.mxu1 %v4979_v26 }
  0xd4   : > { %4360 = vmatprep.subr.bf16.mxu1 %v4981_v12 }
  0xd7   : > { %4361 = vmatpush3.bf16.msra.mxu1 %v4981_v12  ;;  %v4996_v12 = vld [vmem:[%s5906_s3 + $0x130] sm:$0xff]  }
  0xd8   : > { %4555 = vmatmul.mubr.bf16.vlgmr.msra.gmra.mrb[0].mxu0 %v5276_v53  ;;  %4634 = vmatprep.subr.bf16.mxu1 %v4990_v59  ;;  %v4982_v53 = vld [vmem:[%s5906_s3 + $0x218] sm:$0xff]  }
  0xd9   : > { %4587 = vmatpush3.bf16.msra.mxu0 %v4976_v16  ;;  %4558 = vmatprep.mubr.bf16.mxu0 %v5287_v63  ;;  %v4983_v63 = vld [vmem:[%s5906_s3 + $0x220] sm:$0xff]  }
  0xda   : > { %4331 = vmatmul.mubr.bf16.gmra.mrb[16].mxu1 %v5570_v60  ;;  %4588 = vmatprep.subr.bf16.mxu0 %v4978_v34 }
  0xdb   : > { %4334 = vmatprep.mubr.bf16.mxu1 %v5587_v51 }
  0xdd   : > { %4589 = vmatpush3.bf16.msra.mxu0 %v4978_v34 }
  0xde   : > { %4590 = vmatprep.subr.bf16.mxu0 %v4980_v33 }
  0xe0   : > { %4559 = vmatmul.mubr.bf16.gmra.mrb[4].mxu0 %v5305_v15  ;;  %v4985_v15 = vld [vmem:[%s5906_s3 + $0x230] sm:$0xff]  }
  0xe1   : > { %4562 = vmatprep.mubr.bf16.mxu0 %v5329_v49  ;;  %4591 = vmatpush3.bf16.msra.mxu0 %v4980_v33  ;;  %v4986_v49 = vld [vmem:[%s5906_s3 + $0x238] sm:$0xff]  }
  0xe2   : > { %4335 = vmatmul.mubr.bf16.gmra.mrb[20].mxu1 %v5590_v10  ;;  %4592 = vmatprep.subr.bf16.mxu0 %v4982_v53 }
  0xe3   : > { %4338 = vmatprep.mubr.bf16.mxu1 %v5609_v23 }
  0xe5   : > { %4593 = vmatpush3.bf16.msra.mxu0 %v4982_v53 }
  0xe6   : > { %4594 = vmatprep.subr.bf16.mxu0 %v4983_v63 }
  0xe8   : > { %4563 = vmatmul.mubr.bf16.gmra.mrb[8].mxu0 %v5340_v57  ;;  %v5918_v57 = vld [vmem:[#allocation3_spill] sm:$0xff] }
  0xe9   : > { %4566 = vmatprep.mubr.bf16.mxu0 %v5375_v61  ;;  %4595 = vmatpush3.bf16.msra.mxu0 %v4983_v63  ;;  %v5919_v61 = vld [vmem:[#allocation4_spill] sm:$0xff] }
  0xea   : > { %4339 = vmatmul.mubr.bf16.gmra.mrb[24].mxu1 %v5612_v9  ;;  %4596 = vmatprep.subr.bf16.mxu0 %v4984_v3 }
  0xeb   : > { %4342 = vmatprep.mubr.bf16.mxu1 %v5629_v22 }
  0xed   : > { %4597 = vmatpush3.bf16.msra.mxu0 %v4984_v3 }
  0xee   : > { %4598 = vmatprep.subr.bf16.mxu0 %v4985_v15 }
  0xf0   : > { %4567 = vmatmul.mubr.bf16.gmra.mrb[12].mxu0 %v5453_v52 }
  0xf1   : > { %4570 = vmatprep.mubr.bf16.mxu0 %v5476_v18  ;;  %4599 = vmatpush3.bf16.msra.mxu0 %v4985_v15 }
  0xf2   : > { %4343 = vmatmul.mubr.bf16.gmra.mrb[28].mxu1 %v5636_v54  ;;  %4600 = vmatprep.subr.bf16.mxu0 %v4986_v49 }
  0xf3   : > { %4362 = vmatprep.mubr.bf16.mxu1 %v5214_v36  ;;  %v1855_v36 = vrot.slane %v1853_v44, 1 }
  0xf5   : > { %4601 = vmatpush3.bf16.msra.mxu0 %v4986_v49  ;;  %v1856_v16 = vor.u32 %v1855_v36, %v1851_v40 }
  0xf7   : > { %v1861_v39 = vsel %vm593_vm0, %v1856_v16, %v1860_v17 }
  0xf8   : > { %4571 = vmatmul.mubr.bf16.gmra.mrb[16].mxu0 %v5918_v57 }
  0xf9   : > { %4574 = vmatprep.mubr.bf16.mxu0 %v5919_v61 }
  0xfa   : > { %4363 = vmatmul.mubr.bf16.vlgmr.msra.gmra.mrb[0].mxu1 %v5225_v50  ;;  %v4992_v50 = vld [vmem:[%s5906_s3 + $0x110] sm:$0xff]  }
  0xfb   : > { %4642 = vmatpush3.bf16.msra.mxu1 %v4990_v59  ;;  %4366 = vmatprep.mubr.bf16.mxu1 %v5233_v1  ;;  %v5800_v1 = vpack.c.bf16 %v540_v29, %v540_v29 }
  0xfc   : > { %4635 = vmatprep.subr.bf16.mxu1 %v4991_v6 }
  0xfd   : > { %v2651_v25 = vshll.u32 %v5800_v1, 16 }
  0xff   : > { %4643 = vmatpush3.bf16.msra.mxu1 %v4991_v6  ;;  %v2653_v5 = vrot.slane %v2651_v25, 1 }
 0x100   : > { %4575 = vmatmul.mubr.bf16.gmra.mrb[20].mxu0 %v5920_v41  ;;  %4636 = vmatprep.subr.bf16.mxu1 %v4992_v50 }
 0x101   : > { %4578 = vmatprep.mubr.bf16.mxu0 %v5540_v38 }
 0x102   : > { %4367 = vmatmul.mubr.bf16.gmra.mrb[4].mxu1 %v5242_v14  ;;  %v4994_v14 = vld [vmem:[%s5906_s3 + $0x120] sm:$0xff]  }
 0x103   : > { %4370 = vmatprep.mubr.bf16.mxu1 %v5253_v30  ;;  %4644 = vmatpush3.bf16.msra.mxu1 %v4992_v50  ;;  %v2649_v30 = vor.u32 %v2648_v4, %v2644_v20 }
 0x104   : > { %4637 = vmatprep.subr.bf16.mxu1 %v4993_v8 }
 0x105   : > { %v2654_v26 = vsel %vm593_vm0, %v2649_v30, %v2653_v5 }
 0x107   : > { %4645 = vmatpush3.bf16.msra.mxu1 %v4993_v8 }
 0x108   : > { %4579 = vmatmul.mubr.bf16.gmra.mrb[24].mxu0 %v5573_v45  ;;  %4638 = vmatprep.subr.bf16.mxu1 %v4994_v14 }
 0x109   : > { %4582 = vmatprep.mubr.bf16.mxu0 %v1861_v39 }
 0x10a   : > { %4371 = vmatmul.mubr.bf16.gmra.mrb[8].mxu1 %v5271_v46  ;;  %v4997_v46 = vld [vmem:[%s5906_s3 + $0x138] sm:$0xff]  }
 0x10b   : > { %4374 = vmatprep.mubr.bf16.mxu1 %v5281_v56  ;;  %4646 = vmatpush3.bf16.msra.mxu1 %v4994_v14  ;;  %v2916_v56 = vrot.slane %v5733_v31, 1 }
 0x10c   : > { %4639 = vmatprep.subr.bf16.mxu1 %v4995_v7 }
 0x10f   : > { %4647 = vmatpush3.bf16.msra.mxu1 %v4995_v7 }
 0x110   : > { %4583 = vmatmul.mubr.bf16.gmra.mrb[28].mxu0 %v2654_v26  ;;  %4640 = vmatprep.subr.bf16.mxu1 %v4996_v12 }
 0x111   : > { %4602 = vmatprep.mubr.bf16.mxu0 %v5366_v32 }
 0x112   : > { %4375 = vmatmul.mubr.bf16.gmra.mrb[12].mxu1 %v5297_v11  ;;  %v2917_v11 = vrot.slane %v5800_v1, 1 }
 0x113   : > { %4378 = vmatprep.mubr.bf16.mxu1 %v5409_v27  ;;  %4648 = vmatpush3.bf16.msra.mxu1 %v4996_v12 }
 0x114   : > { %4641 = vmatprep.subr.bf16.mxu1 %v4997_v46  ;;  %v2918_v32 = vsel %vm1269_vm1, %v2916_v56, %v2917_v11 }
 0x117   : > { %4649 = vmatpush3.bf16.msra.mxu1 %v4997_v46 }
 0x118   : > { %4603 = vmatmul.mubr.bf16.vlgmr.msra.gmra.mrb[0].mxu0 %v5427_v2 }
 0x119   : > { %4606 = vmatprep.mubr.bf16.mxu0 %v5471_v21 }
 0x11a   : > { %4379 = vmatmul.mubr.bf16.gmra.mrb[16].mxu1 %v5429_v58 }
 0x11b   : > { %4382 = vmatprep.mubr.bf16.mxu1 %v5440_v19 }
 0x120   : > { %4607 = vmatmul.mubr.bf16.gmra.mrb[4].mxu0 %v5487_v55 }
 0x121   : > { %4610 = vmatprep.mubr.bf16.mxu0 %v5523_v48 }
 0x122   : > { %4383 = vmatmul.mubr.bf16.gmra.mrb[20].mxu1 %v5457_v37 }
 0x123   : > { %4386 = vmatprep.mubr.bf16.mxu1 %v5479_v35 }
 0x128   : > { %4611 = vmatmul.mubr.bf16.gmra.mrb[8].mxu0 %v5526_v13 }
 0x129   : > { %4614 = vmatprep.mubr.bf16.mxu0 %v5565_v28 }
 0x12a   : > { %4387 = vmatmul.mubr.bf16.gmra.mrb[24].mxu1 %v5500_v43 }
 0x12b   : > { %4390 = vmatprep.mubr.bf16.mxu1 %v5534_v0 }
 0x130   : > { %4615 = vmatmul.mubr.bf16.gmra.mrb[12].mxu0 %v5570_v60 }
 0x131   : > { %4618 = vmatprep.mubr.bf16.mxu0 %v5587_v51 }
 0x132   : > { %4391 = vmatmul.mubr.bf16.gmra.mrb[28].mxu1 %v5631_v62 }
 0x133   : > { %4426 = vmatprep.mubr.bf16.mxu1 %v5453_v52 }
 0x138   : > { %4619 = vmatmul.mubr.bf16.gmra.mrb[16].mxu0 %v5590_v10 }
 0x139   : > { %4622 = vmatprep.mubr.bf16.mxu0 %v5609_v23 }
 0x13a   : > { %4427 = vmatmul.mubr.bf16.vlgmr.msra.gmra.mrb[16].mxu1 %v5476_v18 }
 0x13b   : > { %4430 = vmatprep.mubr.bf16.mxu1 %v5918_v57 }
 0x140   : > { %4623 = vmatmul.mubr.bf16.gmra.mrb[20].mxu0 %v5612_v9 }
 0x141   : > { %4626 = vmatprep.mubr.bf16.mxu0 %v5629_v22 }
 0x142   : > { %4431 = vmatmul.mubr.bf16.gmra.mrb[20].mxu1 %v5919_v61 }
 0x143   : > { %4434 = vmatprep.mubr.bf16.mxu1 %v5920_v41 }
 0x148   : > { %4627 = vmatmul.mubr.bf16.gmra.mrb[24].mxu0 %v5636_v54 }
 0x149   : > { %4630 = vmatprep.mubr.bf16.mxu0 %v5651_v47 }
 0x14a   : > { %4435 = vmatmul.mubr.bf16.gmra.mrb[24].mxu1 %v5540_v38 }
 0x14b   : > { %4438 = vmatprep.mubr.bf16.mxu1 %v5573_v45 }
 0x150   : > { %4631 = vmatmul.mubr.bf16.gmra.mrb[28].mxu0 %v2918_v32 }
 0x152   : > { %4439 = vmatmul.mubr.bf16.gmra.mrb[28].mxu1 %v1861_v39 }
 0x1cd   : > { %v4364_v27 = vpop.f32.mrb[0].mxu1 }
 0x1ce   : > { %v1691_v2 = vpop.f32.mrb[1].mxu1 }
 0x1cf   : > { %v4365_v58 = vpop.f32.mrb[2].mxu1 }
 0x1d0   : > { %v1694_v19 = vpop.f32.mrb[3].mxu1 }
 0x1d5   : > { %v4368_v52 = vpop.f32.mrb[4].mxu1 }
 0x1d6   : > { %v1707_v37 = vpop.f32.mrb[5].mxu1 }
 0x1d7   : > { %v4369_v21 = vpop.f32.mrb[6].mxu1 }
 0x1d8   : > { %v1710_v18 = vpop.f32.mrb[7].mxu1 }
 0x1dd   : > { %v4372_v35 = vpop.f32.mrb[8].mxu1 }
 0x1de   : > { %v1723_v55 = vpop.f32.mrb[9].mxu1 }
 0x1df   : > { %v4373_v43 = vpop.f32.mrb[10].mxu1 }
 0x1e0   : > { %v1726_v48 = vpop.f32.mrb[11].mxu1 }
 0x1e5   : > { %v5861_v13 = vpop.f32.mrb[12].mxu1 }
 0x1e6   : > { %v5863_v0 = vpop.f32.mrb[13].mxu1 }
 0x1e7   : > { %v5865_v38 = vpop.f32.mrb[14].mxu1 }
 0x1e8   : > { %v5867_v28 = vpop.f32.mrb[15].mxu1 }
 0x1eb   : > { %v4604_v60 = vpop.f32.mrb[0].mxu0 }
 0x1ec   : > { %v4650_v45 = vadd.f32 %v4604_v60, %v4364_v27  ;;  %v3019_v51 = vpop.f32.mrb[1].mxu0 }
 0x1ed   : > { %v4651_v10 = vadd.f32 %v3019_v51, %v1691_v2  ;;  %v4605_v23 = vpop.f32.mrb[2].mxu0 }
 0x1ee   : > { %v4652_v9 = vadd.f32 %v4605_v23, %v4365_v58  ;;  %v3022_v22 = vpop.f32.mrb[3].mxu0  ;;  %v3378_v33 = vmul.f32 %v4650_v45, %v4650_v45 }
 0x1ef   : > { %v4653_v62 = vadd.f32 %v3022_v22, %v1694_v19  ;;  %v3376_v47 = vmul.f32 %v4651_v10, %v4651_v10 }
 0x1f0   : > { %v3884_v54 = vpack.c.bf16 %v4652_v9, %v4650_v45  ;;  %v3379_v57 = vmul.f32 %v4652_v9, %v4652_v9 }
 0x1f1   : > { %v3879_v31 = vpack.c.bf16 %v4653_v62, %v4651_v10  ;;  %v3338_v34 = vadd.f32 %v4653_v62, %v4651_v10  ;;  %v3377_v59 = vmul.f32 %v4653_v62, %v4653_v62 }
 0x1f2   : > { %3971 = vst [vmem:[%s5874_s16 + $0x8] sm:$0xff] %v3884_v54  }
 0x1f3   : > { %3880 = vst [vmem:[%s5874_s16] sm:$0xff] %v3879_v31   ;;  %v3339_v53 = vadd.f32 %v4650_v45, %v3338_v34  ;;  %v3408_v63 = vadd.f32 %v3377_v59, %v3376_v47  ;;  %v4608_v3 = vpop.f32.mrb[4].mxu0 }
 0x1f4   : > { %v4654_v15 = vadd.f32 %v4608_v3, %v4368_v52  ;;  %v3035_v49 = vpop.f32.mrb[5].mxu0 }
 0x1f5   : > { %v3409_v61 = vadd.f32 %v3408_v63, %v3378_v33  ;;  %v4655_v44 = vadd.f32 %v3035_v49, %v1707_v37  ;;  %v3340_v6 = vadd.f32 %v4652_v9, %v3339_v53  ;;  %v4609_v40 = vpop.f32.mrb[6].mxu0 }
 0x1f6   : > { %v4656_v36 = vadd.f32 %v4609_v40, %v4369_v21  ;;  %v3038_v24 = vpop.f32.mrb[7].mxu0  ;;  %v3382_v4 = vmul.f32 %v4654_v15, %v4654_v15 }
 0x1f7   : > { %v3341_v29 = vadd.f32 %v4655_v44, %v3340_v6  ;;  %v3380_v41 = vmul.f32 %v4655_v44, %v4655_v44  ;;  %v3410_v50 = vadd.f32 %v3409_v61, %v3379_v57  ;;  %v4657_v1 = vadd.f32 %v3038_v24, %v1710_v18 }
 0x1f8   : > { %v3894_v42 = vpack.c.bf16 %v4656_v36, %v4654_v15  ;;  %v3383_v7 = vmul.f32 %v4656_v36, %v4656_v36 }
 0x1f9   : > { %v3411_v16 = vadd.f32 %v3410_v50, %v3380_v41  ;;  %v3889_v17 = vpack.c.bf16 %v4657_v1, %v4655_v44  ;;  %v3342_v8 = vadd.f32 %v4657_v1, %v3341_v29  ;;  %v3381_v20 = vmul.f32 %v4657_v1, %v4657_v1 }
 0x1fa   : > { %3973 = vst [vmem:[%s5874_s16 + $0x18] sm:$0xff] %v3894_v42  }
 0x1fb   : > { %3972 = vst [vmem:[%s5874_s16 + $0x10] sm:$0xff] %v3889_v17   ;;  %v3343_v25 = vadd.f32 %v4654_v15, %v3342_v8  ;;  %v3412_v39 = vadd.f32 %v3411_v16, %v3381_v20  ;;  %v4612_v14 = vpop.f32.mrb[8].mxu0 }
 0x1fc   : > { %v4658_v30 = vadd.f32 %v4612_v14, %v4372_v35  ;;  %v3051_v5 = vpop.f32.mrb[9].mxu0 }
 0x1fd   : > { %v3413_v26 = vadd.f32 %v3412_v39, %v3382_v4  ;;  %v4659_v12 = vadd.f32 %v3051_v5, %v1723_v55  ;;  %v3344_v46 = vadd.f32 %v4656_v36, %v3343_v25  ;;  %v4613_v56 = vpop.f32.mrb[10].mxu0 }
 0x1fe   : > { %v4660_v11 = vadd.f32 %v4613_v56, %v4373_v43  ;;  %v3054_v32 = vpop.f32.mrb[11].mxu0  ;;  %v3386_v35 = vmul.f32 %v4658_v30, %v4658_v30 }
 0x1ff   : > { %v3345_v27 = vadd.f32 %v4659_v12, %v3344_v46  ;;  %v3384_v2 = vmul.f32 %v4659_v12, %v4659_v12  ;;  %v3414_v58 = vadd.f32 %v3413_v26, %v3383_v7  ;;  %v4661_v19 = vadd.f32 %v3054_v32, %v1726_v48 }
 0x200   : > { %v3904_v52 = vpack.c.bf16 %v4660_v11, %v4658_v30  ;;  %v3387_v43 = vmul.f32 %v4660_v11, %v4660_v11 }
 0x201   : > { %v3415_v37 = vadd.f32 %v3414_v58, %v3384_v2  ;;  %v3899_v21 = vpack.c.bf16 %v4661_v19, %v4659_v12  ;;  %v3346_v18 = vadd.f32 %v4661_v19, %v3345_v27  ;;  %v3385_v60 = vmul.f32 %v4661_v19, %v4661_v19 }
 0x202   : > { %3975 = vst [vmem:[%s5874_s16 + $0x28] sm:$0xff] %v3904_v52  }
 0x203   : > { %3974 = vst [vmem:[%s5874_s16 + $0x20] sm:$0xff] %v3899_v21   ;;  %v3347_v45 = vadd.f32 %v4658_v30, %v3346_v18  ;;  %v3416_v51 = vadd.f32 %v3415_v37, %v3385_v60  ;;  %v4616_v55 = vpop.f32.mrb[12].mxu0 }
 0x204   : > { %v4662_v10 = vadd.f32 %v4616_v55, %v5861_v13  ;;  %v3067_v23 = vpop.f32.mrb[13].mxu0 }
 0x205   : > { %v3417_v9 = vadd.f32 %v3416_v51, %v3386_v35  ;;  %v4663_v22 = vadd.f32 %v3067_v23, %v5863_v0  ;;  %v3348_v48 = vadd.f32 %v4660_v11, %v3347_v45  ;;  %v4617_v62 = vpop.f32.mrb[14].mxu0 }
 0x206   : > { %v4664_v54 = vadd.f32 %v4617_v62, %v5865_v38  ;;  %v3070_v47 = vpop.f32.mrb[15].mxu0  ;;  %v3390_v49 = vmul.f32 %v4662_v10, %v4662_v10 }
 0x207   : > { %v3349_v31 = vadd.f32 %v4663_v22, %v3348_v48  ;;  %v3388_v34 = vmul.f32 %v4663_v22, %v4663_v22  ;;  %v3418_v59 = vadd.f32 %v3417_v9, %v3387_v43  ;;  %v4665_v33 = vadd.f32 %v3070_v47, %v5867_v28 }
 0x208   : > { %v3914_v53 = vpack.c.bf16 %v4664_v54, %v4662_v10  ;;  %v3391_v6 = vmul.f32 %v4664_v54, %v4664_v54 }
 0x209   : > { %v3419_v63 = vadd.f32 %v3418_v59, %v3388_v34  ;;  %v3909_v13 = vpack.c.bf16 %v4665_v33, %v4663_v22  ;;  %v3350_v3 = vadd.f32 %v4665_v33, %v3349_v31  ;;  %v3389_v15 = vmul.f32 %v4665_v33, %v4665_v33 }
 0x20a   : > { %3977 = vst [vmem:[%s5874_s16 + $0x38] sm:$0xff] %v3914_v53  }
 0x20b   : > { %3976 = vst [vmem:[%s5874_s16 + $0x30] sm:$0xff] %v3909_v13   ;;  %v3351_v0 = vadd.f32 %v4662_v10, %v3350_v3  ;;  %v3420_v57 = vadd.f32 %v3419_v63, %v3389_v15  ;;  %v4620_v61 = vpop.f32.mrb[16].mxu0 }
 0x20c   : > { %v3083_v44 = vpop.f32.mrb[17].mxu0 }
 0x20d   : > { %v3421_v38 = vadd.f32 %v3420_v57, %v3390_v49  ;;  %v4428_v40 = vpop.f32.mrb[16].mxu1  ;;  %v3352_v36 = vadd.f32 %v4664_v54, %v3351_v0  ;;  %v4621_v24 = vpop.f32.mrb[18].mxu0 }
 0x20e   : > { %v4666_v29 = vadd.f32 %v4620_v61, %v4428_v40  ;;  %v2026_v41 = vpop.f32.mrb[17].mxu1  ;;  %v3086_v28 = vpop.f32.mrb[19].mxu0 }
 0x20f   : > { %v4667_v50 = vadd.f32 %v3083_v44, %v2026_v41  ;;  %v3422_v1 = vadd.f32 %v3421_v38, %v3391_v6  ;;  %v4429_v42 = vpop.f32.mrb[18].mxu1 }
 0x210   : > { %v4668_v16 = vadd.f32 %v4621_v24, %v4429_v42  ;;  %v2029_v17 = vpop.f32.mrb[19].mxu1  ;;  %v3394_v12 = vmul.f32 %v4666_v29, %v4666_v29 }
 0x211   : > { %v3353_v8 = vadd.f32 %v4667_v50, %v3352_v36  ;;  %v3392_v20 = vmul.f32 %v4667_v50, %v4667_v50  ;;  %v4669_v4 = vadd.f32 %v3086_v28, %v2029_v17 }
 0x212   : > { %v3924_v25 = vpack.c.bf16 %v4668_v16, %v4666_v29  ;;  %v3395_v19 = vmul.f32 %v4668_v16, %v4668_v16 }
 0x213   : > { %v3423_v39 = vadd.f32 %v3422_v1, %v3392_v20  ;;  %v3919_v14 = vpack.c.bf16 %v4669_v4, %v4667_v50  ;;  %v3354_v30 = vadd.f32 %v4669_v4, %v3353_v8  ;;  %v3393_v5 = vmul.f32 %v4669_v4, %v4669_v4  ;;  %v4624_v7 = vpop.f32.mrb[20].mxu0 }
 0x214   : > { %3979 = vst [vmem:[%s5874_s16 + $0x48] sm:$0xff] %v3924_v25   ;;  %v3099_v26 = vpop.f32.mrb[21].mxu0 }
 0x215   : > { %3978 = vst [vmem:[%s5874_s16 + $0x40] sm:$0xff] %v3919_v14   ;;  %v3355_v46 = vadd.f32 %v4666_v29, %v3354_v30  ;;  %v3424_v56 = vadd.f32 %v3423_v39, %v3393_v5  ;;  %v4432_v11 = vpop.f32.mrb[20].mxu1  ;;  %v4625_v32 = vpop.f32.mrb[22].mxu0 }
 0x216   : > { %v4670_v27 = vadd.f32 %v4624_v7, %v4432_v11  ;;  %v2042_v2 = vpop.f32.mrb[21].mxu1  ;;  %v3102_v58 = vpop.f32.mrb[23].mxu0 }
 0x217   : > { %v3425_v52 = vadd.f32 %v3424_v56, %v3394_v12  ;;  %v4671_v37 = vadd.f32 %v3099_v26, %v2042_v2  ;;  %v3356_v21 = vadd.f32 %v4668_v16, %v3355_v46  ;;  %v4433_v18 = vpop.f32.mrb[22].mxu1 }
 0x218   : > { %v4672_v60 = vadd.f32 %v4625_v32, %v4433_v18  ;;  %v2045_v35 = vpop.f32.mrb[23].mxu1  ;;  %v3398_v47 = vmul.f32 %v4670_v27, %v4670_v27 }
 0x219   : > { %v3357_v45 = vadd.f32 %v4671_v37, %v3356_v21  ;;  %v3396_v51 = vmul.f32 %v4671_v37, %v4671_v37  ;;  %v3426_v55 = vadd.f32 %v3425_v52, %v3395_v19  ;;  %v4673_v10 = vadd.f32 %v3102_v58, %v2045_v35 }
 0x21a   : > { %v3934_v23 = vpack.c.bf16 %v4672_v60, %v4670_v27  ;;  %v3399_v3 = vmul.f32 %v4672_v60, %v4672_v60 }
 0x21b   : > { %v3427_v43 = vadd.f32 %v3426_v55, %v3396_v51  ;;  %v3929_v9 = vpack.c.bf16 %v4673_v10, %v4671_v37  ;;  %v3358_v22 = vadd.f32 %v4673_v10, %v3357_v45  ;;  %v3397_v48 = vmul.f32 %v4673_v10, %v4673_v10  ;;  %v4628_v62 = vpop.f32.mrb[24].mxu0 }
 0x21c   : > { %3981 = vst [vmem:[%s5874_s16 + $0x58] sm:$0xff] %v3934_v23   ;;  %v3115_v54 = vpop.f32.mrb[25].mxu0 }
 0x21d   : > { %3980 = vst [vmem:[%s5874_s16 + $0x50] sm:$0xff] %v3929_v9   ;;  %v3359_v31 = vadd.f32 %v4670_v27, %v3358_v22  ;;  %v3428_v34 = vadd.f32 %v3427_v43, %v3397_v48  ;;  %v4436_v59 = vpop.f32.mrb[24].mxu1  ;;  %v4629_v33 = vpop.f32.mrb[26].mxu0 }
 0x21e   : > { %v4674_v53 = vadd.f32 %v4628_v62, %v4436_v59  ;;  %v2058_v63 = vpop.f32.mrb[25].mxu1  ;;  %v3118_v13 = vpop.f32.mrb[27].mxu0 }
 0x21f   : > { %v3429_v15 = vadd.f32 %v3428_v34, %v3398_v47  ;;  %v4675_v49 = vadd.f32 %v3115_v54, %v2058_v63  ;;  %v3360_v0 = vadd.f32 %v4672_v60, %v3359_v31  ;;  %v4437_v57 = vpop.f32.mrb[26].mxu1 }
 0x220   : > { %v4676_v61 = vadd.f32 %v4629_v33, %v4437_v57  ;;  %v2061_v44 = vpop.f32.mrb[27].mxu1  ;;  %v3402_v16 = vmul.f32 %v4674_v53, %v4674_v53 }
 0x221   : > { %v3361_v6 = vadd.f32 %v4675_v49, %v3360_v0  ;;  %v3400_v38 = vmul.f32 %v4675_v49, %v4675_v49  ;;  %v3430_v40 = vadd.f32 %v3429_v15, %v3399_v3  ;;  %v4677_v36 = vadd.f32 %v3118_v13, %v2061_v44 }
 0x222   : > { %v3944_v24 = vpack.c.bf16 %v4676_v61, %v4674_v53  ;;  %v3403_v30 = vmul.f32 %v4676_v61, %v4676_v61 }
 0x223   : > { %v3431_v29 = vadd.f32 %v3430_v40, %v3400_v38  ;;  %v3939_v41 = vpack.c.bf16 %v4677_v36, %v4675_v49  ;;  %v3362_v28 = vadd.f32 %v4677_v36, %v3361_v6  ;;  %v3401_v50 = vmul.f32 %v4677_v36, %v4677_v36  ;;  %v4632_v1 = vpop.f32.mrb[28].mxu0 }
 0x224   : > { %3983 = vst [vmem:[%s5874_s16 + $0x68] sm:$0xff] %v3944_v24   ;;  %v3131_v42 = vpop.f32.mrb[29].mxu0 }
 0x225   : > { %3982 = vst [vmem:[%s5874_s16 + $0x60] sm:$0xff] %v3939_v41   ;;  %v3363_v17 = vadd.f32 %v4674_v53, %v3362_v28  ;;  %v3432_v8 = vadd.f32 %v3431_v29, %v3401_v50  ;;  %v4440_v20 = vpop.f32.mrb[28].mxu1  ;;  %v4633_v4 = vpop.f32.mrb[30].mxu0 }
 0x226   : > { %v4678_v25 = vadd.f32 %v4632_v1, %v4440_v20  ;;  %v2074_v39 = vpop.f32.mrb[29].mxu1  ;;  %v3134_v14 = vpop.f32.mrb[31].mxu0 }
 0x227   : > { %v3433_v5 = vadd.f32 %v3432_v8, %v3402_v16  ;;  %v4679_v7 = vadd.f32 %v3131_v42, %v2074_v39  ;;  %v3364_v26 = vadd.f32 %v4676_v61, %v3363_v17  ;;  %v4441_v12 = vpop.f32.mrb[30].mxu1 }
 0x228   : > { %v4680_v46 = vadd.f32 %v4633_v4, %v4441_v12  ;;  %v2077_v56 = vpop.f32.mrb[31].mxu1  ;;  %v3406_v18 = vmul.f32 %v4678_v25, %v4678_v25 }
 0x229   : > { %v3365_v11 = vadd.f32 %v4679_v7, %v3364_v26  ;;  %v3404_v32 = vmul.f32 %v4679_v7, %v4679_v7  ;;  %v3434_v27 = vadd.f32 %v3433_v5, %v3403_v30  ;;  %v4681_v2 = vadd.f32 %v3134_v14, %v2077_v56 }
 0x22a   : > { %v3954_v58 = vpack.c.bf16 %v4680_v46, %v4678_v25  ;;  %v3407_v45 = vmul.f32 %v4680_v46, %v4680_v46 }
 0x22b   : > { %v3435_v19 = vadd.f32 %v3434_v27, %v3404_v32  ;;  %v3949_v52 = vpack.c.bf16 %v4681_v2, %v4679_v7  ;;  %v3366_v37 = vadd.f32 %v4681_v2, %v3365_v11  ;;  %v3405_v21 = vmul.f32 %v4681_v2, %v4681_v2 }
 0x22c   : > { %3985 = vst [vmem:[%s5874_s16 + $0x78] sm:$0xff] %v3954_v58  }
 0x22d   : > { %3984 = vst [vmem:[%s5874_s16 + $0x70] sm:$0xff] %v3949_v52   ;;  %v3367_v60 = vadd.f32 %v4678_v25, %v3366_v37  ;;  %v3436_v35 = vadd.f32 %v3435_v19, %v3405_v21 }
 0x22f   : > { %v3368_v51 = vadd.f32 %v4680_v46, %v3367_v60  ;;  %v3437_v55 = vadd.f32 %v3436_v35, %v3406_v18 }
 0x231   : > { %v3369_v10 = vrot.slane %v3368_v51, 4  ;;  %v3438_v23 = vadd.f32 %v3437_v55, %v3407_v45 }
 0x233   : > { %v3370_v43 = vadd.f32 %v3369_v10, %v3368_v51  ;;  %v3439_v9 = vrot.slane %v3438_v23, 4 }
 0x235   : > { %v3371_v22 = vrot.slane %v3370_v43, 2  ;;  %v3440_v48 = vadd.f32 %v3439_v9, %v3438_v23 }
 0x237   : > { %v3372_v62 = vadd.f32 %v3371_v22, %v3370_v43  ;;  %v3441_v54 = vrot.slane %v3440_v48, 2 }
 0x239   : > { %v3373_v47 = vrot.slane %v3372_v62, 1  ;;  %v3442_v31 = vadd.f32 %v3441_v54, %v3440_v48 }
 0x23b   : > { %v3374_v34 = vadd.f32 %v3373_v47, %v3372_v62  ;;  %v3443_v59 = vrot.slane %v3442_v31, 1 }
 0x23d   : > { %3375 = vst [vmem:[%s235_s22] sm:$0x1] %v3374_v34  ;;  %v3444_v33 = vadd.f32 %v3443_v59, %v3442_v31 }
 0x23f   : > { %3445 = vst [vmem:[%s235_s22 + $0x1] sm:$0x1] %v3444_v33 }
 0x240 PF: > { %s16_s18 = sadd.s32 1, %s5004_s18  }
 0x241   : > { %p13_p4 = scmp.ge.s32.totalorder %s16_s18, 4  }
 0x243   :  { %15 = sbr.rel (!%p13_p4) target bundleno = 1 (0x1), region = 88 }

</bundles_post_ra>
